<compile_context>
chip_gen: v7x
topology: tpu7x:2x2x1
jax: 0.10.0
libtpu: 0.0.40
codegen_flags: <defaults>
</compile_context>

<pallas_src>
import functools

import jax
import jax.numpy as jnp
from jax import lax
from jax.experimental import pallas as pl
from jax.experimental.pallas import tpu as pltpu


NEG_SLOPE = 0.18
C_PAD = 128                 # lane-dense padded class dimension
MAX_BATCH_TILE = 1024       # multiple of 16; x tile (1024,1024) f32 = 4 MiB
VMEM_LIMIT_BYTES = 48 << 20 # safe on v5e/v6e (128 MiB) and v7x (64 MiB)


def _leaky_relu(v):
    return jnp.where(v >= 0, v, NEG_SLOPE * v)


def _round_up(v, m):
    return ((v + m - 1) // m) * m


def classifier_kernel(x_ref,
                      w1_ref, b1_ref,
                      w2_ref, b2_ref,
                      w3_ref, b3_ref,
                      w4_ref, b4_ref,
                      o_ref,
                      *, num_classes):
    # x arrives as f32; cast to bf16 in-kernel (single f32 HBM read, free cast).
    x = x_ref[...].astype(jnp.bfloat16)

    h1 = _leaky_relu(
        jnp.dot(x, w1_ref[...], preferred_element_type=jnp.float32) + b1_ref[...])
    h1 = h1.astype(jnp.bfloat16)

    h2 = _leaky_relu(
        jnp.dot(h1, w2_ref[...], preferred_element_type=jnp.float32) + b2_ref[...])
    h2 = h2.astype(jnp.bfloat16)

    h3 = _leaky_relu(
        jnp.dot(h2, w3_ref[...], preferred_element_type=jnp.float32) + b3_ref[...])
    h3 = h3.astype(jnp.bfloat16)

    logits = jnp.dot(h3, w4_ref[...], preferred_element_type=jnp.float32) + b4_ref[...]

    # Mask padded class columns so they do not affect the log-softmax.
    col = lax.broadcasted_iota(jnp.int32, logits.shape, 1)
    logits = jnp.where(col < num_classes, logits, -jnp.inf)

    # log_softmax over the class axis (last dim).
    m = jnp.max(logits, axis=-1, keepdims=True)
    shifted = logits - m
    lse = jnp.log(jnp.sum(jnp.exp(shifted), axis=-1, keepdims=True))
    o_ref[...] = (shifted - lse).astype(o_ref.dtype)


def prepare_params(params):
    """One-time parameter prep (do this at load time, NOT per forward).

    Casts fc1-fc3 weights to bf16, zero-pads fc4 weight/bias to C_PAD lanes,
    keeps biases f32 with shape (1, out).
    """
    (w1, b1), (w2, b2), (w3, b3), (w4, b4) = params
    num_classes = w4.shape[1]
    assert num_classes <= C_PAD

    w1b = w1.astype(jnp.bfloat16)
    w2b = w2.astype(jnp.bfloat16)
    w3b = w3.astype(jnp.bfloat16)
    w4b = jnp.zeros((w4.shape[0], C_PAD), jnp.bfloat16).at[:, :num_classes].set(
        w4.astype(jnp.bfloat16))

    b1f = b1.astype(jnp.float32)
    b2f = b2.astype(jnp.float32)
    b3f = b3.astype(jnp.float32)
    b4p = jnp.zeros((1, C_PAD), jnp.float32).at[:, :num_classes].set(
        b4.astype(jnp.float32))

    flat = (w1b, b1f, w2b, b2f, w3b, b3f, w4b, b4p)
    return flat, num_classes


def classifier_forward(x, prepared):
    flat, num_classes = prepared
    B, D_in = x.shape

    # Batch tiling: weights stay VMEM-resident (constant index_map) while
    # x / out tiles pipeline over a "parallel" grid axis.  For moderate B,
    # force >= 2 grid steps so v7x shards the axis across both TensorCores.
    if B <= 32:
        TB = B
    elif B <= MAX_BATCH_TILE:
        TB = min(_round_up(pl.cdiv(B, 2), 16), MAX_BATCH_TILE)
    else:
        TB = MAX_BATCH_TILE
    grid = (pl.cdiv(B, TB),)

    kernel = functools.partial(classifier_kernel, num_classes=num_classes)

    def run(single_buffer_weights):
        if single_buffer_weights:
            def resident(a):
                return pl.BlockSpec(a.shape, lambda i: (0, 0),
                                    pipeline_mode=pl.Buffered(1))
        else:
            def resident(a):
                return pl.BlockSpec(a.shape, lambda i: (0, 0))

        return pl.pallas_call(
            kernel,
            out_shape=jax.ShapeDtypeStruct((B, C_PAD), jnp.float32),
            grid=grid,
            in_specs=[pl.BlockSpec((TB, D_in), lambda i: (i, 0))]
                     + [resident(a) for a in flat],
            out_specs=pl.BlockSpec((TB, C_PAD), lambda i: (i, 0)),
            compiler_params=pltpu.CompilerParams(
                dimension_semantics=("parallel",),
                vmem_limit_bytes=VMEM_LIMIT_BYTES),
        )(x, *flat)

    try:
        out_padded = run(single_buffer_weights=True)
    except Exception:
        # Fallback if this jax build rejects pipeline_mode=pl.Buffered(1) for
        # resident blocks; costs only ~1.35 MiB of extra (dead) VMEM.
        out_padded = run(single_buffer_weights=False)

    return out_padded[:, :num_classes]


def init_params(key, num_classes):
    """Deterministic synthetic parameters matching nn.Linear shapes.

    Weights stored as (in, out); biases as (1, out) for clean 2-D VMEM layout.
    """
    dims = [(1024, 512), (512, 256), (256, 128), (128, num_classes)]
    params = []
    for (fan_in, fan_out) in dims:
        key, kw, kb = jax.random.split(key, 3)
        bound = 1.0 / jnp.sqrt(fan_in)
        w = jax.random.uniform(kw, (fan_in, fan_out), jnp.float32, -bound, bound)
        b = jax.random.uniform(kb, (1, fan_out), jnp.float32, -bound, bound)
        params.append((w, b))
    return params


def reference_forward(x, params):
    h = x
    for i, (w, b) in enumerate(params):
        h = h @ w + b
        if i < 3:
            h = jnp.where(h >= 0, h, NEG_SLOPE * h)
    return jax.nn.log_softmax(h, axis=1)


if __name__ == "__main__":
    num_classes = 14

    key = jax.random.PRNGKey(0)
    key, kx1, kx2 = jax.random.split(key, 3)
    params = init_params(key, num_classes)
    prepared = prepare_params(params)          # one-time prep (load time)

    # Small batch (the real use case): single grid step.
    x_small = jax.random.normal(kx1, (4, 1024), jnp.float32)
    out_small = jax.block_until_ready(classifier_forward(x_small, prepared))
    ref_small = reference_forward(x_small, params)
    assert out_small.shape == (4, num_classes)
    assert jnp.allclose(out_small, ref_small, atol=2e-2, rtol=2e-2), \
        "mismatch vs reference (small batch)"

    # Moderate batch: exercises the multi-step parallel grid + partial tile.
    x_mid = jax.random.normal(kx2, (48, 1024), jnp.float32)
    out_mid = jax.block_until_ready(classifier_forward(x_mid, prepared))
    ref_mid = reference_forward(x_mid, params)
    assert out_mid.shape == (48, num_classes)
    assert jnp.allclose(out_mid, ref_mid, atol=2e-2, rtol=2e-2), \
        "mismatch vs reference (moderate batch)"

    print("KERNEL_OK")
</pallas_src>

<mosaic_0001>
module attributes {stable_mosaic.version = 11 : i64} {
  func.func @classifier_kernel(%arg0: i32, %arg1: memref<4x1024xf32, #tpu.memory_space<vmem>>, %arg2: memref<1024x512xbf16, #tpu.memory_space<vmem>>, %arg3: memref<1x512xf32, #tpu.memory_space<vmem>>, %arg4: memref<512x256xbf16, #tpu.memory_space<vmem>>, %arg5: memref<1x256xf32, #tpu.memory_space<vmem>>, %arg6: memref<256x128xbf16, #tpu.memory_space<vmem>>, %arg7: memref<1x128xf32, #tpu.memory_space<vmem>>, %arg8: memref<128x128xbf16, #tpu.memory_space<vmem>>, %arg9: memref<1x128xf32, #tpu.memory_space<vmem>>, %arg10: memref<4x128xf32, #tpu.memory_space<vmem>>) attributes {dimension_semantics = [#tpu.dimension_semantics<parallel>], iteration_bounds = array<i64: 1>, scalar_prefetch = 0 : i64, scratch_operands = 0 : i64, tpu.core_type = #tpu.core_type<tc>, window_params = [{transform_indices = @transform_0, window_bounds = array<i64: 4, 1024>}, {pipeline_mode = #tpu.pipeline_mode<synchronous>, transform_indices = @transform_1, window_bounds = array<i64: 1024, 512>}, {pipeline_mode = #tpu.pipeline_mode<synchronous>, transform_indices = @transform_2, window_bounds = array<i64: 1, 512>}, {pipeline_mode = #tpu.pipeline_mode<synchronous>, transform_indices = @transform_3, window_bounds = array<i64: 512, 256>}, {pipeline_mode = #tpu.pipeline_mode<synchronous>, transform_indices = @transform_4, window_bounds = array<i64: 1, 256>}, {pipeline_mode = #tpu.pipeline_mode<synchronous>, transform_indices = @transform_5, window_bounds = array<i64: 256, 128>}, {pipeline_mode = #tpu.pipeline_mode<synchronous>, transform_indices = @transform_6, window_bounds = array<i64: 1, 128>}, {pipeline_mode = #tpu.pipeline_mode<synchronous>, transform_indices = @transform_7, window_bounds = array<i64: 128, 128>}, {pipeline_mode = #tpu.pipeline_mode<synchronous>, transform_indices = @transform_8, window_bounds = array<i64: 1, 128>}, {transform_indices = @transform_9, window_bounds = array<i64: 4, 128>}]} {
    %c0 = arith.constant 0 : index
    %c0_0 = arith.constant 0 : index
    %0 = vector.load %arg1[%c0, %c0_0] : memref<4x1024xf32, #tpu.memory_space<vmem>>, vector<4x1024xf32>
    %1 = arith.truncf %0 : vector<4x1024xf32> to vector<4x1024xbf16>
    %c0_1 = arith.constant 0 : index
    %c0_2 = arith.constant 0 : index
    %2 = vector.load %arg2[%c0_1, %c0_2] : memref<1024x512xbf16, #tpu.memory_space<vmem>>, vector<1024x512xbf16>
    %cst = arith.constant dense<0.000000e+00> : vector<4x512xf32>
    %3 = tpu.matmul %1, %2, %cst {dimension_numbers = #tpu.dot_dimension_numbers<[1], [0], [0], [1], [0, 0, 1, 1], [], []>} : vector<4x1024xbf16>, vector<1024x512xbf16>, vector<4x512xf32> -> vector<4x512xf32>
    %c0_3 = arith.constant 0 : index
    %c0_4 = arith.constant 0 : index
    %4 = vector.load %arg3[%c0_3, %c0_4] : memref<1x512xf32, #tpu.memory_space<vmem>>, vector<1x512xf32>
    %5 = vector.broadcast %4 : vector<1x512xf32> to vector<4x512xf32>
    %6 = arith.addf %3, %5 : vector<4x512xf32>
    %cst_5 = arith.constant 0.000000e+00 : f32
    %7 = vector.broadcast %cst_5 : f32 to vector<4x512xf32>
    %8 = arith.cmpf oge, %6, %7 : vector<4x512xf32>
    %cst_6 = arith.constant 1.800000e-01 : f32
    %9 = vector.broadcast %cst_6 : f32 to vector<4x512xf32>
    %10 = arith.mulf %9, %6 : vector<4x512xf32>
    %11 = arith.select %8, %6, %10 : vector<4x512xi1>, vector<4x512xf32>
    %12 = arith.truncf %11 : vector<4x512xf32> to vector<4x512xbf16>
    %c0_7 = arith.constant 0 : index
    %c0_8 = arith.constant 0 : index
    %13 = vector.load %arg4[%c0_7, %c0_8] : memref<512x256xbf16, #tpu.memory_space<vmem>>, vector<512x256xbf16>
    %cst_9 = arith.constant dense<0.000000e+00> : vector<4x256xf32>
    %14 = tpu.matmul %12, %13, %cst_9 {dimension_numbers = #tpu.dot_dimension_numbers<[1], [0], [0], [1], [0, 0, 1, 1], [], []>} : vector<4x512xbf16>, vector<512x256xbf16>, vector<4x256xf32> -> vector<4x256xf32>
    %c0_10 = arith.constant 0 : index
    %c0_11 = arith.constant 0 : index
    %15 = vector.load %arg5[%c0_10, %c0_11] : memref<1x256xf32, #tpu.memory_space<vmem>>, vector<1x256xf32>
    %16 = vector.broadcast %15 : vector<1x256xf32> to vector<4x256xf32>
    %17 = arith.addf %14, %16 : vector<4x256xf32>
    %cst_12 = arith.constant 0.000000e+00 : f32
    %18 = vector.broadcast %cst_12 : f32 to vector<4x256xf32>
    %19 = arith.cmpf oge, %17, %18 : vector<4x256xf32>
    %cst_13 = arith.constant 1.800000e-01 : f32
    %20 = vector.broadcast %cst_13 : f32 to vector<4x256xf32>
    %21 = arith.mulf %20, %17 : vector<4x256xf32>
    %22 = arith.select %19, %17, %21 : vector<4x256xi1>, vector<4x256xf32>
    %23 = arith.truncf %22 : vector<4x256xf32> to vector<4x256xbf16>
    %c0_14 = arith.constant 0 : index
    %c0_15 = arith.constant 0 : index
    %24 = vector.load %arg6[%c0_14, %c0_15] : memref<256x128xbf16, #tpu.memory_space<vmem>>, vector<256x128xbf16>
    %cst_16 = arith.constant dense<0.000000e+00> : vector<4x128xf32>
    %25 = tpu.matmul %23, %24, %cst_16 {dimension_numbers = #tpu.dot_dimension_numbers<[1], [0], [0], [1], [0, 0, 1, 1], [], []>} : vector<4x256xbf16>, vector<256x128xbf16>, vector<4x128xf32> -> vector<4x128xf32>
    %c0_17 = arith.constant 0 : index
    %c0_18 = arith.constant 0 : index
    %26 = vector.load %arg7[%c0_17, %c0_18] : memref<1x128xf32, #tpu.memory_space<vmem>>, vector<1x128xf32>
    %27 = vector.broadcast %26 : vector<1x128xf32> to vector<4x128xf32>
    %28 = arith.addf %25, %27 : vector<4x128xf32>
    %cst_19 = arith.constant 0.000000e+00 : f32
    %29 = vector.broadcast %cst_19 : f32 to vector<4x128xf32>
    %30 = arith.cmpf oge, %28, %29 : vector<4x128xf32>
    %cst_20 = arith.constant 1.800000e-01 : f32
    %31 = vector.broadcast %cst_20 : f32 to vector<4x128xf32>
    %32 = arith.mulf %31, %28 : vector<4x128xf32>
    %33 = arith.select %30, %28, %32 : vector<4x128xi1>, vector<4x128xf32>
    %34 = arith.truncf %33 : vector<4x128xf32> to vector<4x128xbf16>
    %c0_21 = arith.constant 0 : index
    %c0_22 = arith.constant 0 : index
    %35 = vector.load %arg8[%c0_21, %c0_22] : memref<128x128xbf16, #tpu.memory_space<vmem>>, vector<128x128xbf16>
    %cst_23 = arith.constant dense<0.000000e+00> : vector<4x128xf32>
    %36 = tpu.matmul %34, %35, %cst_23 {dimension_numbers = #tpu.dot_dimension_numbers<[1], [0], [0], [1], [0, 0, 1, 1], [], []>} : vector<4x128xbf16>, vector<128x128xbf16>, vector<4x128xf32> -> vector<4x128xf32>
    %c0_24 = arith.constant 0 : index
    %c0_25 = arith.constant 0 : index
    %37 = vector.load %arg9[%c0_24, %c0_25] : memref<1x128xf32, #tpu.memory_space<vmem>>, vector<1x128xf32>
    %38 = vector.broadcast %37 : vector<1x128xf32> to vector<4x128xf32>
    %39 = arith.addf %36, %38 : vector<4x128xf32>
    %40 = tpu.iota {dimensions = array<i32: 1>} : vector<4x128xi32>
    %c14_i32 = arith.constant 14 : i32
    %41 = vector.broadcast %c14_i32 : i32 to vector<4x128xi32>
    %42 = arith.cmpi slt, %40, %41 : vector<4x128xi32>
    %cst_26 = arith.constant 0xFF800000 : f32
    %43 = vector.broadcast %cst_26 : f32 to vector<4x128xf32>
    %44 = arith.select %42, %39, %43 : vector<4x128xi1>, vector<4x128xf32>
    %cst_27 = arith.constant dense<0xFF800000> : vector<4xf32>
    %45 = vector.multi_reduction <maximumf>, %44, %cst_27 [1] : vector<4x128xf32> to vector<4xf32>
    %46 = vector.shape_cast %45 : vector<4xf32> to vector<4x1xf32>
    %47 = vector.broadcast %46 : vector<4x1xf32> to vector<4x128xf32>
    %48 = arith.subf %44, %47 : vector<4x128xf32>
    %49 = math.exp %48 : vector<4x128xf32>
    %cst_28 = arith.constant dense<0.000000e+00> : vector<4xf32>
    %50 = vector.multi_reduction <add>, %49, %cst_28 [1] : vector<4x128xf32> to vector<4xf32>
    %51 = vector.shape_cast %50 : vector<4xf32> to vector<4x1xf32>
    %52 = math.log %51 : vector<4x1xf32>
    %53 = vector.broadcast %52 : vector<4x1xf32> to vector<4x128xf32>
    %54 = arith.subf %48, %53 : vector<4x128xf32>
    %c0_29 = arith.constant 0 : index
    %c0_30 = arith.constant 0 : index
    %55 = vector.load %arg10[%c0_29, %c0_30] : memref<4x128xf32, #tpu.memory_space<vmem>>, vector<4x128xf32>
    tpu.vector_store %arg10[%c0_29, %c0_30], %54 {strides = array<i32>} : memref<4x128xf32, #tpu.memory_space<vmem>>, vector<4x128xf32>,
    return
  }
  func.func @transform_0(%arg0: i32) -> (i32, i32) {
    %c0_i32 = arith.constant 0 : i32
    %c0_i32_0 = arith.constant 0 : i32
    return %arg0, %c0_i32 : i32, i32
  }
  func.func @transform_1(%arg0: i32) -> (i32, i32) {
    %c0_i32 = arith.constant 0 : i32
    %c0_i32_0 = arith.constant 0 : i32
    %c0_i32_1 = arith.constant 0 : i32
    return %c0_i32, %c0_i32_0 : i32, i32
  }
  func.func @transform_2(%arg0: i32) -> (i32, i32) {
    %c0_i32 = arith.constant 0 : i32
    %c0_i32_0 = arith.constant 0 : i32
    %c0_i32_1 = arith.constant 0 : i32
    return %c0_i32, %c0_i32_0 : i32, i32
  }
  func.func @transform_3(%arg0: i32) -> (i32, i32) {
    %c0_i32 = arith.constant 0 : i32
    %c0_i32_0 = arith.constant 0 : i32
    %c0_i32_1 = arith.constant 0 : i32
    return %c0_i32, %c0_i32_0 : i32, i32
  }
  func.func @transform_4(%arg0: i32) -> (i32, i32) {
    %c0_i32 = arith.constant 0 : i32
    %c0_i32_0 = arith.constant 0 : i32
    %c0_i32_1 = arith.constant 0 : i32
    return %c0_i32, %c0_i32_0 : i32, i32
  }
  func.func @transform_5(%arg0: i32) -> (i32, i32) {
    %c0_i32 = arith.constant 0 : i32
    %c0_i32_0 = arith.constant 0 : i32
    %c0_i32_1 = arith.constant 0 : i32
    return %c0_i32, %c0_i32_0 : i32, i32
  }
  func.func @transform_6(%arg0: i32) -> (i32, i32) {
    %c0_i32 = arith.constant 0 : i32
    %c0_i32_0 = arith.constant 0 : i32
    %c0_i32_1 = arith.constant 0 : i32
    return %c0_i32, %c0_i32_0 : i32, i32
  }
  func.func @transform_7(%arg0: i32) -> (i32, i32) {
    %c0_i32 = arith.constant 0 : i32
    %c0_i32_0 = arith.constant 0 : i32
    %c0_i32_1 = arith.constant 0 : i32
    return %c0_i32, %c0_i32_0 : i32, i32
  }
  func.func @transform_8(%arg0: i32) -> (i32, i32) {
    %c0_i32 = arith.constant 0 : i32
    %c0_i32_0 = arith.constant 0 : i32
    %c0_i32_1 = arith.constant 0 : i32
    return %c0_i32, %c0_i32_0 : i32, i32
  }
  func.func @transform_9(%arg0: i32) -> (i32, i32) {
    %c0_i32 = arith.constant 0 : i32
    %c0_i32_0 = arith.constant 0 : i32
    return %arg0, %c0_i32 : i32, i32
  }
}

module attributes {stable_mosaic.version = 11 : i64} {
  func.func @classifier_kernel(%arg0: i32, %arg1: memref<4x1024xf32, #tpu.memory_space<vmem>>, %arg2: memref<1024x512xbf16, #tpu.memory_space<vmem>>, %arg3: memref<1x512xf32, #tpu.memory_space<vmem>>, %arg4: memref<512x256xbf16, #tpu.memory_space<vmem>>, %arg5: memref<1x256xf32, #tpu.memory_space<vmem>>, %arg6: memref<256x128xbf16, #tpu.memory_space<vmem>>, %arg7: memref<1x128xf32, #tpu.memory_space<vmem>>, %arg8: memref<128x128xbf16, #tpu.memory_space<vmem>>, %arg9: memref<1x128xf32, #tpu.memory_space<vmem>>, %arg10: memref<4x128xf32, #tpu.memory_space<vmem>>) attributes {dimension_semantics = [#tpu.dimension_semantics<parallel>], iteration_bounds = array<i64: 1>, scalar_prefetch = 0 : i64, scratch_operands = 0 : i64, tpu.core_type = #tpu.core_type<tc>, window_params = [{transform_indices = @transform_0, window_bounds = array<i64: 4, 1024>}, {pipeline_mode = #tpu.pipeline_mode<synchronous>, transform_indices = @transform_1, window_bounds = array<i64: 1024, 512>}, {pipeline_mode = #tpu.pipeline_mode<synchronous>, transform_indices = @transform_2, window_bounds = array<i64: 1, 512>}, {pipeline_mode = #tpu.pipeline_mode<synchronous>, transform_indices = @transform_3, window_bounds = array<i64: 512, 256>}, {pipeline_mode = #tpu.pipeline_mode<synchronous>, transform_indices = @transform_4, window_bounds = array<i64: 1, 256>}, {pipeline_mode = #tpu.pipeline_mode<synchronous>, transform_indices = @transform_5, window_bounds = array<i64: 256, 128>}, {pipeline_mode = #tpu.pipeline_mode<synchronous>, transform_indices = @transform_6, window_bounds = array<i64: 1, 128>}, {pipeline_mode = #tpu.pipeline_mode<synchronous>, transform_indices = @transform_7, window_bounds = array<i64: 128, 128>}, {pipeline_mode = #tpu.pipeline_mode<synchronous>, transform_indices = @transform_8, window_bounds = array<i64: 1, 128>}, {transform_indices = @transform_9, window_bounds = array<i64: 4, 128>}]} {
    %c0 = arith.constant 0 : index
    %c0_0 = arith.constant 0 : index
    %0 = vector.load %arg1[%c0, %c0_0] : memref<4x1024xf32, #tpu.memory_space<vmem>>, vector<4x1024xf32>
    %1 = arith.truncf %0 : vector<4x1024xf32> to vector<4x1024xbf16>
    %c0_1 = arith.constant 0 : index
    %c0_2 = arith.constant 0 : index
    %2 = vector.load %arg2[%c0_1, %c0_2] : memref<1024x512xbf16, #tpu.memory_space<vmem>>, vector<1024x512xbf16>
    %cst = arith.constant dense<0.000000e+00> : vector<4x512xf32>
    %3 = tpu.matmul %1, %2, %cst {dimension_numbers = #tpu.dot_dimension_numbers<[1], [0], [0], [1], [0, 0, 1, 1], [], []>} : vector<4x1024xbf16>, vector<1024x512xbf16>, vector<4x512xf32> -> vector<4x512xf32>
    %c0_3 = arith.constant 0 : index
    %c0_4 = arith.constant 0 : index
    %4 = vector.load %arg3[%c0_3, %c0_4] : memref<1x512xf32, #tpu.memory_space<vmem>>, vector<1x512xf32>
    %5 = vector.broadcast %4 : vector<1x512xf32> to vector<4x512xf32>
    %6 = arith.addf %3, %5 : vector<4x512xf32>
    %cst_5 = arith.constant 0.000000e+00 : f32
    %7 = vector.broadcast %cst_5 : f32 to vector<4x512xf32>
    %8 = arith.cmpf oge, %6, %7 : vector<4x512xf32>
    %cst_6 = arith.constant 1.800000e-01 : f32
    %9 = vector.broadcast %cst_6 : f32 to vector<4x512xf32>
    %10 = arith.mulf %9, %6 : vector<4x512xf32>
    %11 = arith.select %8, %6, %10 : vector<4x512xi1>, vector<4x512xf32>
    %12 = arith.truncf %11 : vector<4x512xf32> to vector<4x512xbf16>
    %c0_7 = arith.constant 0 : index
    %c0_8 = arith.constant 0 : index
    %13 = vector.load %arg4[%c0_7, %c0_8] : memref<512x256xbf16, #tpu.memory_space<vmem>>, vector<512x256xbf16>
    %cst_9 = arith.constant dense<0.000000e+00> : vector<4x256xf32>
    %14 = tpu.matmul %12, %13, %cst_9 {dimension_numbers = #tpu.dot_dimension_numbers<[1], [0], [0], [1], [0, 0, 1, 1], [], []>} : vector<4x512xbf16>, vector<512x256xbf16>, vector<4x256xf32> -> vector<4x256xf32>
    %c0_10 = arith.constant 0 : index
    %c0_11 = arith.constant 0 : index
    %15 = vector.load %arg5[%c0_10, %c0_11] : memref<1x256xf32, #tpu.memory_space<vmem>>, vector<1x256xf32>
    %16 = vector.broadcast %15 : vector<1x256xf32> to vector<4x256xf32>
    %17 = arith.addf %14, %16 : vector<4x256xf32>
    %cst_12 = arith.constant 0.000000e+00 : f32
    %18 = vector.broadcast %cst_12 : f32 to vector<4x256xf32>
    %19 = arith.cmpf oge, %17, %18 : vector<4x256xf32>
    %cst_13 = arith.constant 1.800000e-01 : f32
    %20 = vector.broadcast %cst_13 : f32 to vector<4x256xf32>
    %21 = arith.mulf %20, %17 : vector<4x256xf32>
    %22 = arith.select %19, %17, %21 : vector<4x256xi1>, vector<4x256xf32>
    %23 = arith.truncf %22 : vector<4x256xf32> to vector<4x256xbf16>
    %c0_14 = arith.constant 0 : index
    %c0_15 = arith.constant 0 : index
    %24 = vector.load %arg6[%c0_14, %c0_15] : memref<256x128xbf16, #tpu.memory_space<vmem>>, vector<256x128xbf16>
    %cst_16 = arith.constant dense<0.000000e+00> : vector<4x128xf32>
    %25 = tpu.matmul %23, %24, %cst_16 {dimension_numbers = #tpu.dot_dimension_numbers<[1], [0], [0], [1], [0, 0, 1, 1], [], []>} : vector<4x256xbf16>, vector<256x128xbf16>, vector<4x128xf32> -> vector<4x128xf32>
    %c0_17 = arith.constant 0 : index
    %c0_18 = arith.constant 0 : index
    %26 = vector.load %arg7[%c0_17, %c0_18] : memref<1x128xf32, #tpu.memory_space<vmem>>, vector<1x128xf32>
    %27 = vector.broadcast %26 : vector<1x128xf32> to vector<4x128xf32>
    %28 = arith.addf %25, %27 : vector<4x128xf32>
    %cst_19 = arith.constant 0.000000e+00 : f32
    %29 = vector.broadcast %cst_19 : f32 to vector<4x128xf32>
    %30 = arith.cmpf oge, %28, %29 : vector<4x128xf32>
    %cst_20 = arith.constant 1.800000e-01 : f32
    %31 = vector.broadcast %cst_20 : f32 to vector<4x128xf32>
    %32 = arith.mulf %31, %28 : vector<4x128xf32>
    %33 = arith.select %30, %28, %32 : vector<4x128xi1>, vector<4x128xf32>
    %34 = arith.truncf %33 : vector<4x128xf32> to vector<4x128xbf16>
    %c0_21 = arith.constant 0 : index
    %c0_22 = arith.constant 0 : index
    %35 = vector.load %arg8[%c0_21, %c0_22] : memref<128x128xbf16, #tpu.memory_space<vmem>>, vector<128x128xbf16>
    %cst_23 = arith.constant dense<0.000000e+00> : vector<4x128xf32>
    %36 = tpu.matmul %34, %35, %cst_23 {dimension_numbers = #tpu.dot_dimension_numbers<[1], [0], [0], [1], [0, 0, 1, 1], [], []>} : vector<4x128xbf16>, vector<128x128xbf16>, vector<4x128xf32> -> vector<4x128xf32>
    %c0_24 = arith.constant 0 : index
    %c0_25 = arith.constant 0 : index
    %37 = vector.load %arg9[%c0_24, %c0_25] : memref<1x128xf32, #tpu.memory_space<vmem>>, vector<1x128xf32>
    %38 = vector.broadcast %37 : vector<1x128xf32> to vector<4x128xf32>
    %39 = arith.addf %36, %38 : vector<4x128xf32>
    %40 = tpu.iota {dimensions = array<i32: 1>} : vector<4x128xi32>
    %c14_i32 = arith.constant 14 : i32
    %41 = vector.broadcast %c14_i32 : i32 to vector<4x128xi32>
    %42 = arith.cmpi slt, %40, %41 : vector<4x128xi32>
    %cst_26 = arith.constant 0xFF800000 : f32
    %43 = vector.broadcast %cst_26 : f32 to vector<4x128xf32>
    %44 = arith.select %42, %39, %43 : vector<4x128xi1>, vector<4x128xf32>
    %cst_27 = arith.constant dense<0xFF800000> : vector<4xf32>
    %45 = vector.multi_reduction <maximumf>, %44, %cst_27 [1] : vector<4x128xf32> to vector<4xf32>
    %46 = vector.shape_cast %45 : vector<4xf32> to vector<4x1xf32>
    %47 = vector.broadcast %46 : vector<4x1xf32> to vector<4x128xf32>
    %48 = arith.subf %44, %47 : vector<4x128xf32>
    %49 = math.exp %48 : vector<4x128xf32>
    %cst_28 = arith.constant dense<0.000000e+00> : vector<4xf32>
    %50 = vector.multi_reduction <add>, %49, %cst_28 [1] : vector<4x128xf32> to vector<4xf32>
    %51 = vector.shape_cast %50 : vector<4xf32> to vector<4x1xf32>
    %52 = math.log %51 : vector<4x1xf32>
    %53 = vector.broadcast %52 : vector<4x1xf32> to vector<4x128xf32>
    %54 = arith.subf %48, %53 : vector<4x128xf32>
    %c0_29 = arith.constant 0 : index
    %c0_30 = arith.constant 0 : index
    %55 = vector.load %arg10[%c0_29, %c0_30] : memref<4x128xf32, #tpu.memory_space<vmem>>, vector<4x128xf32>
    tpu.vector_store %arg10[%c0_29, %c0_30], %54 {strides = array<i32>} : memref<4x128xf32, #tpu.memory_space<vmem>>, vector<4x128xf32>,
    return
  }
  func.func @transform_0(%arg0: i32) -> (i32, i32) {
    %c0_i32 = arith.constant 0 : i32
    %c0_i32_0 = arith.constant 0 : i32
    return %arg0, %c0_i32 : i32, i32
  }
  func.func @transform_1(%arg0: i32) -> (i32, i32) {
    %c0_i32 = arith.constant 0 : i32
    %c0_i32_0 = arith.constant 0 : i32
    %c0_i32_1 = arith.constant 0 : i32
    return %c0_i32, %c0_i32_0 : i32, i32
  }
  func.func @transform_2(%arg0: i32) -> (i32, i32) {
    %c0_i32 = arith.constant 0 : i32
    %c0_i32_0 = arith.constant 0 : i32
    %c0_i32_1 = arith.constant 0 : i32
    return %c0_i32, %c0_i32_0 : i32, i32
  }
  func.func @transform_3(%arg0: i32) -> (i32, i32) {
    %c0_i32 = arith.constant 0 : i32
    %c0_i32_0 = arith.constant 0 : i32
    %c0_i32_1 = arith.constant 0 : i32
    return %c0_i32, %c0_i32_0 : i32, i32
  }
  func.func @transform_4(%arg0: i32) -> (i32, i32) {
    %c0_i32 = arith.constant 0 : i32
    %c0_i32_0 = arith.constant 0 : i32
    %c0_i32_1 = arith.constant 0 : i32
    return %c0_i32, %c0_i32_0 : i32, i32
  }
  func.func @transform_5(%arg0: i32) -> (i32, i32) {
    %c0_i32 = arith.constant 0 : i32
    %c0_i32_0 = arith.constant 0 : i32
    %c0_i32_1 = arith.constant 0 : i32
    return %c0_i32, %c0_i32_0 : i32, i32
  }
  func.func @transform_6(%arg0: i32) -> (i32, i32) {
    %c0_i32 = arith.constant 0 : i32
    %c0_i32_0 = arith.constant 0 : i32
    %c0_i32_1 = arith.constant 0 : i32
    return %c0_i32, %c0_i32_0 : i32, i32
  }
  func.func @transform_7(%arg0: i32) -> (i32, i32) {
    %c0_i32 = arith.constant 0 : i32
    %c0_i32_0 = arith.constant 0 : i32
    %c0_i32_1 = arith.constant 0 : i32
    return %c0_i32, %c0_i32_0 : i32, i32
  }
  func.func @transform_8(%arg0: i32) -> (i32, i32) {
    %c0_i32 = arith.constant 0 : i32
    %c0_i32_0 = arith.constant 0 : i32
    %c0_i32_1 = arith.constant 0 : i32
    return %c0_i32, %c0_i32_0 : i32, i32
  }
  func.func @transform_9(%arg0: i32) -> (i32, i32) {
    %c0_i32 = arith.constant 0 : i32
    %c0_i32_0 = arith.constant 0 : i32
    return %arg0, %c0_i32 : i32, i32
  }
}

</mosaic_0001>

<bundles_post_ra>
// kernel: tpu_custom_call.1
= control target key start
LH: loop header
LB: loop body
LE: loop exit
PB: predicated region body
PF: predicated region fallthrough
CT: control target
= control target key end

     0   :  { %14 = vsyncpa [#allocation3], 0  ;;  %s4138_s0 = inlined_call_operand.hbm [shape: f32[4,1024], index: 0, kind: input, shape index: {}]   ;;  %s4139_s1 = inlined_call_operand.hbm [shape: bf16[1024,512], index: 1, kind: input, shape index: {}]   ;;  %s4140_s2 = inlined_call_operand.vmem [shape: f32[1,512], index: 2, kind: input, shape index: {}]   ;;  %s4141_s3 = inlined_call_operand.hbm [shape: bf16[512,256], index: 3, kind: input, shape index: {}]   ;;  %s4142_s4 = inlined_call_operand.vmem [shape: f32[1,256], index: 4, kind: input, shape index: {}]   ;;  %s4143_s5 = inlined_call_operand.hbm [shape: bf16[256,128], index: 5, kind: input, shape index: {}]   ;;  %s4144_s6 = inlined_call_operand.vmem [shape: f32[1,128], index: 6, kind: input, shape index: {}]   ;;  %s4145_s7 = inlined_call_operand.hbm [shape: bf16[128,128], index: 7, kind: input, shape index: {}]   ;;  %s4146_s8 = inlined_call_operand.vmem [shape: f32[1,128], index: 8, kind: input, shape index: {}]   ;;  %s4147_s9 = inlined_call_operand.hbm [shape: f32[4,128], index: 9, kind: output, shape index: {}]  }
   0x1   :  { %15 = vsyncpa [#allocation6], 0 }
   0x2   :  { %16 = vsyncpa [#allocation9], 0 }
   0x3   :  { %17 = vsyncpa [#allocation4], 0  ;;  %s3934_s30 = smov [#allocation5]   ;;  %s3794_s13 = scalar_lea.hbm %s4139_s1, 32768 }
   0x4   :  { %s33_s10 = sshll.u32 %s3934_s30, 4  ;;  %p3795_p0 = scmp.ne.s32.totalorder %s4139_s1, %s3794_s13  ;;  %s34_s10 = int_to_ptr.vmem [resolvable:$true] %s33_s10 }
   0x5   :  { %p3798_p1 = scmp.lt.u32.totalorder %s3794_s13, %s4139_s1 }
   0x7   :  { %p3800_p2 = pnand %p3798_p1, %p3795_p0 }
   0x9   :  { %3803 = shalt.err (!%p3800_p2)
}
   0xa   :  { %s3804_s18 = scalar_lea.vmem %s34_s10, 32768  ;;  %p3809_p4 = scmp.lt.s32.totalorder %s34_s10, %s34_s10 }
   0xb   :  { %p3805_p3 = scmp.ne.s32.totalorder %s34_s10, %s3804_s18  ;;  %p3810_p5 = scmp.lt.s32.totalorder %s3804_s18, %s3804_s18 }
   0xd   :  { %p3811_p6 = por %p3810_p5, %p3809_p4 }
   0xf   :  { %p3812_p7 = pnand %p3811_p6, %p3805_p3 }
  0x11   :  { %3815 = shalt.err (!%p3812_p7)
}
  0x12   :  { %s3935_s19 = smov 256   ;;  %s3936_s20 = smov 16  }
  0x13   :  { %39 = dma.hbm_to_vmem [thread:$0]  %s4139_s1, 32768, %s34_s10, [#allocation6], %s3935_s19, %s3935_s19, %s3936_s20  }
  0x14   :  { %s3937_s23 = smov [#allocation8]   ;;  %s3816_s27 = scalar_lea.hbm %s4143_s5, 2048 }
  0x15   :  { %s61_s24 = sshll.u32 %s3937_s23, 4  ;;  %p3817_p8 = scmp.ne.s32.totalorder %s4143_s5, %s3816_s27  ;;  %s62_s24 = int_to_ptr.vmem [resolvable:$true] %s61_s24 }
  0x16   :  { %p3820_p9 = scmp.lt.u32.totalorder %s3816_s27, %s4143_s5 }
  0x18   :  { %p3822_p10 = pnand %p3820_p9, %p3817_p8 }
  0x1a   :  { %3825 = shalt.err (!%p3822_p10)
}
  0x1b   :  { %s3826_s12 = scalar_lea.vmem %s62_s24, 2048  ;;  %p3831_p12 = scmp.lt.s32.totalorder %s62_s24, %s62_s24 }
  0x1c   :  { %p3827_p11 = scmp.ne.s32.totalorder %s62_s24, %s3826_s12  ;;  %p3832_p13 = scmp.lt.s32.totalorder %s3826_s12, %s3826_s12 }
  0x1e   :  { %p3833_p0 = por %p3832_p13, %p3831_p12 }
  0x20   :  { %p3834_p1 = pnand %p3833_p0, %p3827_p11 }
  0x22   :  { %3837 = shalt.err (!%p3834_p1)
}
  0x23   :  { %s3938_s1 = smov 64   ;;  %s3939_s10 = smov 4  }
  0x24   :  { %67 = dma.hbm_to_vmem [thread:$0]  %s4143_s5, 2048, %s62_s24, [#allocation9], %s3938_s1, %s3938_s1, %s3939_s10  }
  0x25   :  { %s3940_s15 = smov [#allocation2]   ;;  %s3941_s17 = smov [#allocation7]  }
  0x26   :  { %s24_s16 = sshll.u32 %s3940_s15, 4  ;;  %s47_s18 = sshll.u32 %s3941_s17, 4  ;;  %s25_s16 = int_to_ptr.vmem [resolvable:$true] %s24_s16  ;;  %s4025_s18 = int_to_ptr.vmem [resolvable:$true] %s47_s18 }
  0x27   :  { %s3838_s21 = scalar_lea.hbm %s4138_s0, 512 }
  0x28   :  { %p3839_p2 = scmp.ne.s32.totalorder %s4138_s0, %s3838_s21  ;;  %p3842_p3 = scmp.lt.u32.totalorder %s3838_s21, %s4138_s0 }
  0x2a   :  { %p3844_p4 = pnand %p3842_p3, %p3839_p2 }
  0x2c   :  { %3847 = shalt.err (!%p3844_p4)
}
  0x2d   :  { %s3848_s5 = scalar_lea.vmem %s25_s16, 512  ;;  %p3853_p6 = scmp.lt.s32.totalorder %s25_s16, %s25_s16 }
  0x2e   :  { %p3849_p5 = scmp.ne.s32.totalorder %s25_s16, %s3848_s5  ;;  %p3854_p7 = scmp.lt.s32.totalorder %s3848_s5, %s3848_s5 }
  0x30   :  { %p3855_p8 = por %p3854_p7, %p3853_p6 }
  0x32   :  { %p3856_p9 = pnand %p3855_p8, %p3849_p5 }
  0x34   :  { %3859 = shalt.err (!%p3856_p9)
}
  0x35   :  { %27 = dma.hbm_to_vmem [thread:$0]  %s4138_s0, 512, %s25_s16, [#allocation3]  }
  0x36   :  { %s3860_s30 = scalar_lea.hbm %s4141_s3, 8192 }
  0x37   :  { %p3861_p10 = scmp.ne.s32.totalorder %s4141_s3, %s3860_s30  ;;  %p3864_p11 = scmp.lt.u32.totalorder %s3860_s30, %s4141_s3 }
  0x39   :  { %p3866_p12 = pnand %p3864_p11, %p3861_p10 }
  0x3b   :  { %3869 = shalt.err (!%p3866_p12)
}
  0x3c   :  { %s3870_s15 = scalar_lea.vmem %s4025_s18, 8192  ;;  %p3875_p0 = scmp.lt.s32.totalorder %s4025_s18, %s4025_s18 }
  0x3d   :  { %p3871_p13 = scmp.ne.s32.totalorder %s4025_s18, %s3870_s15  ;;  %p3876_p1 = scmp.lt.s32.totalorder %s3870_s15, %s3870_s15 }
  0x3f   :  { %p3877_p2 = por %p3876_p1, %p3875_p0 }
  0x41   :  { %p3878_p3 = pnand %p3877_p2, %p3871_p13 }
  0x43   :  { %3881 = shalt.err (!%p3878_p3)
}
  0x44   :  { %s3942_s0 = smov 128   ;;  %s3943_s16 = smov 8  }
  0x45   :  { %53 = dma.hbm_to_vmem [thread:$0]  %s4141_s3, 8192, %s4025_s18, [#allocation6], %s3942_s0, %s3942_s0, %s3943_s16  }
  0x46   :  { %s3944_s20 = smov [#allocation10]   ;;  %s3882_s25 = scalar_lea.hbm %s4145_s7, 1024 }
  0x47   :  { %s75_s21 = sshll.u32 %s3944_s20, 4  ;;  %p3883_p4 = scmp.ne.s32.totalorder %s4145_s7, %s3882_s25  ;;  %s76_s21 = int_to_ptr.vmem [resolvable:$true] %s75_s21 }
  0x48   :  { %p3886_p5 = scmp.lt.u32.totalorder %s3882_s25, %s4145_s7 }
  0x4a   :  { %p3888_p6 = pnand %p3886_p5, %p3883_p4 }
  0x4c   :  { %3891 = shalt.err (!%p3888_p6)
}
  0x4d   :  { %s3892_s28 = scalar_lea.vmem %s76_s21, 1024  ;;  %p3897_p8 = scmp.lt.s32.totalorder %s76_s21, %s76_s21 }
  0x4e   :  { %p3893_p7 = scmp.ne.s32.totalorder %s76_s21, %s3892_s28  ;;  %p3898_p9 = scmp.lt.s32.totalorder %s3892_s28, %s3892_s28 }
  0x50   :  { %p3899_p10 = por %p3898_p9, %p3897_p8 }
  0x52   :  { %p3900_p11 = pnand %p3899_p10, %p3893_p7 }
  0x54   :  { %3903 = shalt.err (!%p3900_p11)
}
  0x55   :  { %81 = dma.hbm_to_vmem [thread:$0]  %s4145_s7, 1024, %s76_s21, [#allocation9], %s3938_s1, %s3938_s1, %s3939_s10  }
  0x56   :  { %3926 = dma.done.wait [#allocation3], 512  }
  0x57   :  { %3927 = vsyncadd [#allocation3], 4294966784 }
  0x58   :  { %3928 = dma.done.wait [#allocation6], 40960  }
  0x59   :  { %3929 = vsyncadd [#allocation6], 4294926336 }
  0x5a   :  { %3930 = dma.done.wait [#allocation9], 3072  }
  0x5b   :  { %3931 = vsyncadd [#allocation9], 4294964224  ;;  %v3282_v0 = vld [vmem:[#allocation5 + $0x4] ss:$16 sps:$4 sm:$0xff]   ;;  %v3284_v1 = vld [vmem:[#allocation5 + $0xc] ss:$16 sps:$4 sm:$0xff]  }
  0x5c   :  { %1682 = vmatprep.subr.bf16.mxu0 %v3282_v0  ;;  %v3286_v2 = vld [vmem:[#allocation5] ss:$16 sps:$4 sm:$0xff]   ;;  %v3287_v3 = vld [vmem:[#allocation5 + $0x8] ss:$16 sps:$4 sm:$0xff]   ;;  %1846 = vmatprep.subr.bf16.mxu1 %v3284_v1  ;;  %v3288_v4 = vld [vmem:[#allocation5 + $0x24] ss:$16 sps:$4 sm:$0xff]  }
  0x5d   :  { %1683 = vmatpush1.bf16.msra.mxu0 %v3286_v2  ;;  %1847 = vmatpush1.bf16.msra.mxu1 %v3287_v3  ;;  %v3290_v5 = vld [vmem:[#allocation5 + $0x2c] ss:$16 sps:$4 sm:$0xff]   ;;  %v3292_v6 = vld [vmem:[#allocation5 + $0x20] ss:$16 sps:$4 sm:$0xff]   ;;  %v3293_v7 = vld [vmem:[#allocation5 + $0x28] ss:$16 sps:$4 sm:$0xff]  }
  0x5e   :  { %1684 = vmatprep.subr.bf16.mxu0 %v3288_v4  ;;  %1848 = vmatprep.subr.bf16.mxu1 %v3290_v5  ;;  %v3294_v8 = vld [vmem:[#allocation5 + $0x44] ss:$16 sps:$4 sm:$0xff]   ;;  %v3296_v9 = vld [vmem:[#allocation5 + $0x4c] ss:$16 sps:$4 sm:$0xff]   ;;  %v3298_v10 = vld [vmem:[#allocation5 + $0x40] ss:$16 sps:$4 sm:$0xff]  }
  0x5f   :  { %v3299_v11 = vld [vmem:[#allocation5 + $0x48] ss:$16 sps:$4 sm:$0xff]   ;;  %v3300_v12 = vld [vmem:[#allocation5 + $0x64] ss:$16 sps:$4 sm:$0xff]   ;;  %v3302_v13 = vld [vmem:[#allocation5 + $0x6c] ss:$16 sps:$4 sm:$0xff]  }
  0x60   :  { %v3304_v14 = vld [vmem:[#allocation5 + $0x60] ss:$16 sps:$4 sm:$0xff]   ;;  %v3305_v15 = vld [vmem:[#allocation5 + $0x68] ss:$16 sps:$4 sm:$0xff]   ;;  %v3306_v16 = vld [vmem:[#allocation5 + $0x84] ss:$16 sps:$4 sm:$0xff]  }
  0x61   :  { %1685 = vmatpush1.bf16.msra.mxu0 %v3292_v6  ;;  %1849 = vmatpush1.bf16.msra.mxu1 %v3293_v7  ;;  %v3308_v17 = vld [vmem:[#allocation5 + $0x8c] ss:$16 sps:$4 sm:$0xff]   ;;  %v3310_v18 = vld [vmem:[#allocation5 + $0x80] ss:$16 sps:$4 sm:$0xff]   ;;  %v3311_v19 = vld [vmem:[#allocation5 + $0x88] ss:$16 sps:$4 sm:$0xff]  }
  0x62   :  { %1686 = vmatprep.subr.bf16.mxu0 %v3294_v8  ;;  %1850 = vmatprep.subr.bf16.mxu1 %v3296_v9  ;;  %v3312_v20 = vld [vmem:[#allocation5 + $0xa4] ss:$16 sps:$4 sm:$0xff]   ;;  %v3314_v21 = vld [vmem:[#allocation5 + $0xac] ss:$16 sps:$4 sm:$0xff]   ;;  %v3316_v22 = vld [vmem:[#allocation5 + $0xa0] ss:$16 sps:$4 sm:$0xff]  }
  0x63   :  { %v3317_v23 = vld [vmem:[#allocation5 + $0xa8] ss:$16 sps:$4 sm:$0xff]   ;;  %v3318_v24 = vld [vmem:[#allocation5 + $0xc4] ss:$16 sps:$4 sm:$0xff]   ;;  %v3320_v25 = vld [vmem:[#allocation5 + $0xcc] ss:$16 sps:$4 sm:$0xff]  }
  0x64   :  { %v3322_v26 = vld [vmem:[#allocation5 + $0xc0] ss:$16 sps:$4 sm:$0xff]   ;;  %v3323_v27 = vld [vmem:[#allocation5 + $0xc8] ss:$16 sps:$4 sm:$0xff]   ;;  %v3324_v28 = vld [vmem:[#allocation5 + $0xe4] ss:$16 sps:$4 sm:$0xff]  }
  0x65   :  { %1687 = vmatpush1.bf16.msra.mxu0 %v3298_v10  ;;  %1851 = vmatpush1.bf16.msra.mxu1 %v3299_v11  ;;  %v3326_v29 = vld [vmem:[#allocation5 + $0xec] ss:$16 sps:$4 sm:$0xff]   ;;  %v3328_v30 = vld [vmem:[#allocation5 + $0xe0] ss:$16 sps:$4 sm:$0xff]   ;;  %v3329_v31 = vld [vmem:[#allocation5 + $0xe8] ss:$16 sps:$4 sm:$0xff]  }
  0x66   :  { %1688 = vmatprep.subr.bf16.mxu0 %v3300_v12  ;;  %1852 = vmatprep.subr.bf16.mxu1 %v3302_v13  ;;  %v3330_v32 = vld [vmem:[#allocation5 + $0x104] ss:$16 sps:$4 sm:$0xff]   ;;  %v3332_v33 = vld [vmem:[#allocation5 + $0x10c] ss:$16 sps:$4 sm:$0xff]   ;;  %v3334_v34 = vld [vmem:[#allocation5 + $0x100] ss:$16 sps:$4 sm:$0xff]  }
  0x67   :  { %v3335_v35 = vld [vmem:[#allocation5 + $0x108] ss:$16 sps:$4 sm:$0xff]   ;;  %v3336_v36 = vld [vmem:[#allocation5 + $0x124] ss:$16 sps:$4 sm:$0xff]   ;;  %v3338_v37 = vld [vmem:[#allocation5 + $0x12c] ss:$16 sps:$4 sm:$0xff]  }
  0x68   :  { %v3340_v38 = vld [vmem:[#allocation5 + $0x120] ss:$16 sps:$4 sm:$0xff]   ;;  %v3341_v39 = vld [vmem:[#allocation5 + $0x128] ss:$16 sps:$4 sm:$0xff]   ;;  %v3342_v40 = vld [vmem:[#allocation5 + $0x144] ss:$16 sps:$4 sm:$0xff]  }
  0x69   :  { %1689 = vmatpush1.bf16.msra.mxu0 %v3304_v14  ;;  %1853 = vmatpush1.bf16.msra.mxu1 %v3305_v15  ;;  %v3344_v41 = vld [vmem:[#allocation5 + $0x14c] ss:$16 sps:$4 sm:$0xff]   ;;  %v3346_v42 = vld [vmem:[#allocation5 + $0x140] ss:$16 sps:$4 sm:$0xff]   ;;  %v3347_v43 = vld [vmem:[#allocation5 + $0x148] ss:$16 sps:$4 sm:$0xff]  }
  0x6a   :  { %1690 = vmatprep.subr.bf16.mxu0 %v3306_v16  ;;  %1854 = vmatprep.subr.bf16.mxu1 %v3308_v17  ;;  %v3348_v44 = vld [vmem:[#allocation5 + $0x164] ss:$16 sps:$4 sm:$0xff]   ;;  %v3350_v45 = vld [vmem:[#allocation5 + $0x16c] ss:$16 sps:$4 sm:$0xff]   ;;  %v3352_v47 = vld [vmem:[#allocation5 + $0x160] ss:$16 sps:$4 sm:$0xff]  }
  0x6b   :  { %v100_v46 = vld [vmem:[#allocation2] sm:$0xff]  ;;  %v3353_v49 = vld [vmem:[#allocation5 + $0x168] ss:$16 sps:$4 sm:$0xff]   ;;  %v3356_v51 = vld [vmem:[#allocation5 + $0x18c] ss:$16 sps:$4 sm:$0xff]   ;;  %vm3946_vm6 = vmmov 0  }
  0x6c   :  { %v108_v48 = vcombine.high %v100_v46, %v100_v46  ;;  %v3354_v50 = vld [vmem:[#allocation5 + $0x184] ss:$16 sps:$4 sm:$0xff]   ;;  %v3358_v53 = vld [vmem:[#allocation5 + $0x180] ss:$16 sps:$4 sm:$0xff]   ;;  %v3359_v54 = vld [vmem:[#allocation5 + $0x188] ss:$16 sps:$4 sm:$0xff]   ;;  %v116_v6 = vpack.c.bf16 %v100_v46, %v100_v46 }
  0x6d   :  { %1691 = vmatpush1.bf16.msra.mxu0 %v3310_v18  ;;  %1855 = vmatpush1.bf16.msra.mxu1 %v3311_v19  ;;  %v3360_v55 = vld [vmem:[#allocation5 + $0x1a4] ss:$16 sps:$4 sm:$0xff]   ;;  %v3362_v56 = vld [vmem:[#allocation5 + $0x1ac] ss:$16 sps:$4 sm:$0xff]   ;;  %v3364_v57 = vld [vmem:[#allocation5 + $0x1a0] ss:$16 sps:$4 sm:$0xff]  }
  0x6e   :  { %1692 = vmatprep.subr.bf16.mxu0 %v3312_v20  ;;  %1856 = vmatprep.subr.bf16.mxu1 %v3314_v21  ;;  %v117_v52 = vpack.c.bf16 %v108_v48, %v108_v48  ;;  %v3365_v58 = vld [vmem:[#allocation5 + $0x1a8] ss:$16 sps:$4 sm:$0xff]   ;;  %v3366_v59 = vld [vmem:[#allocation5 + $0x1c4] ss:$16 sps:$4 sm:$0xff]   ;;  %v3368_v60 = vld [vmem:[#allocation5 + $0x1cc] ss:$16 sps:$4 sm:$0xff]  }
  0x6f   :  { %v3370_v61 = vld [vmem:[#allocation5 + $0x1c0] ss:$16 sps:$4 sm:$0xff]   ;;  %v3371_v62 = vld [vmem:[#allocation5 + $0x1c8] ss:$16 sps:$4 sm:$0xff]   ;;  %v3372_v63 = vld [vmem:[#allocation5 + $0x1e4] ss:$16 sps:$4 sm:$0xff]  }
  0x70   :  { %1714 = vmatprep.mubr.bf16.mxu0 %v117_v52  ;;  %1878 = vmatprep.mubr.bf16.mxu1 %v117_v52  ;;  %v3374_v0 = vld [vmem:[#allocation5 + $0x1ec] ss:$16 sps:$4 sm:$0xff]   ;;  %v3376_v1 = vld [vmem:[#allocation5 + $0x1e0] ss:$16 sps:$4 sm:$0xff]   ;;  %v3377_v2 = vld [vmem:[#allocation5 + $0x1e8] ss:$16 sps:$4 sm:$0xff]  }
  0x71   :  { %1693 = vmatpush1.bf16.msra.mxu0 %v3316_v22  ;;  %1857 = vmatpush1.bf16.msra.mxu1 %v3317_v23  ;;  %v3381_v3 = vld [vmem:[#allocation5 + $0x204] ss:$16 sps:$4 sm:$0xff]   ;;  %v3384_v4 = vld [vmem:[#allocation5 + $0x20c] ss:$16 sps:$4 sm:$0xff]   ;;  %v3379_v5 = vld [vmem:[#allocation5 + $0x200] ss:$16 sps:$4 sm:$0xff]  }
  0x72   :  { %1694 = vmatprep.subr.bf16.mxu0 %v3318_v24  ;;  %1858 = vmatprep.subr.bf16.mxu1 %v3320_v25  ;;  %v3382_v7 = vld [vmem:[#allocation5 + $0x208] ss:$16 sps:$4 sm:$0xff]   ;;  %v3387_v8 = vld [vmem:[#allocation5 + $0x224] ss:$16 sps:$4 sm:$0xff]   ;;  %v3390_v9 = vld [vmem:[#allocation5 + $0x22c] ss:$16 sps:$4 sm:$0xff]  }
  0x73   :  { %v3385_v10 = vld [vmem:[#allocation5 + $0x220] ss:$16 sps:$4 sm:$0xff]   ;;  %v3388_v11 = vld [vmem:[#allocation5 + $0x228] ss:$16 sps:$4 sm:$0xff]   ;;  %v3393_v12 = vld [vmem:[#allocation5 + $0x244] ss:$16 sps:$4 sm:$0xff]  }
  0x74   :  { %v3396_v13 = vld [vmem:[#allocation5 + $0x24c] ss:$16 sps:$4 sm:$0xff]   ;;  %v3391_v14 = vld [vmem:[#allocation5 + $0x240] ss:$16 sps:$4 sm:$0xff]   ;;  %v3394_v15 = vld [vmem:[#allocation5 + $0x248] ss:$16 sps:$4 sm:$0xff]  }
  0x75   :  { %1695 = vmatpush1.bf16.msra.mxu0 %v3322_v26  ;;  %1859 = vmatpush1.bf16.msra.mxu1 %v3323_v27  ;;  %v3399_v16 = vld [vmem:[#allocation5 + $0x264] ss:$16 sps:$4 sm:$0xff]   ;;  %v3402_v17 = vld [vmem:[#allocation5 + $0x26c] ss:$16 sps:$4 sm:$0xff]   ;;  %v3397_v18 = vld [vmem:[#allocation5 + $0x260] ss:$16 sps:$4 sm:$0xff]  }
  0x76   :  { %1696 = vmatprep.subr.bf16.mxu0 %v3324_v28  ;;  %1860 = vmatprep.subr.bf16.mxu1 %v3326_v29  ;;  %v3400_v19 = vld [vmem:[#allocation5 + $0x268] ss:$16 sps:$4 sm:$0xff]   ;;  %v3405_v20 = vld [vmem:[#allocation5 + $0x284] ss:$16 sps:$4 sm:$0xff]   ;;  %v3408_v21 = vld [vmem:[#allocation5 + $0x28c] ss:$16 sps:$4 sm:$0xff]  }
  0x77   :  { %v3403_v22 = vld [vmem:[#allocation5 + $0x280] ss:$16 sps:$4 sm:$0xff]   ;;  %v3406_v23 = vld [vmem:[#allocation5 + $0x288] ss:$16 sps:$4 sm:$0xff]   ;;  %v3411_v24 = vld [vmem:[#allocation5 + $0x2a4] ss:$16 sps:$4 sm:$0xff]  }
  0x78   :  { %v3414_v25 = vld [vmem:[#allocation5 + $0x2ac] ss:$16 sps:$4 sm:$0xff]   ;;  %v3409_v26 = vld [vmem:[#allocation5 + $0x2a0] ss:$16 sps:$4 sm:$0xff]   ;;  %v3412_v27 = vld [vmem:[#allocation5 + $0x2a8] ss:$16 sps:$4 sm:$0xff]  }
  0x79   :  { %1697 = vmatpush1.bf16.msra.mxu0 %v3328_v30  ;;  %1861 = vmatpush1.bf16.msra.mxu1 %v3329_v31  ;;  %v3417_v28 = vld [vmem:[#allocation5 + $0x2c4] ss:$16 sps:$4 sm:$0xff]   ;;  %v3420_v29 = vld [vmem:[#allocation5 + $0x2cc] ss:$16 sps:$4 sm:$0xff]   ;;  %v3436_v46 = vld [vmem:[#allocation5 + $0x328] ss:$16 sps:$4 sm:$0xff]  }
  0x7a   :  { %1698 = vmatprep.subr.bf16.mxu0 %v3330_v32  ;;  %1862 = vmatprep.subr.bf16.mxu1 %v3332_v33  ;;  %v4071_v30 = vld [vmem:[#allocation2 + $0x8] sm:$0xff]  ;;  %v3415_v32 = vld [vmem:[#allocation5 + $0x2c0] ss:$16 sps:$4 sm:$0xff]   ;;  %vm2806_vm9 = vcmask 1043456  }
  0x7b   :  { %v109_v31 = vcombine.high %v4071_v30, %v4071_v30  ;;  %v3418_v33 = vld [vmem:[#allocation5 + $0x2c8] ss:$16 sps:$4 sm:$0xff]   ;;  %v3444_v48 = vld [vmem:[#allocation5 + $0x34c] ss:$16 sps:$4 sm:$0xff]  }
  0x7c   :  { %v3450_v52 = vld [vmem:[#allocation5 + $0x36c] ss:$16 sps:$4 sm:$0xff]  }
  0x7d   :  { %1699 = vmatpush1.bf16.msra.mxu0 %v3334_v34  ;;  %1863 = vmatpush1.bf16.msra.mxu1 %v3335_v35  ;;  %v119_v34 = vpack.c.bf16 %v109_v31, %v109_v31  ;;  %v3423_v35 = vld [vmem:[#allocation5 + $0x2e4] ss:$16 sps:$4 sm:$0xff]  }
  0x7e   :  { %1700 = vmatprep.subr.bf16.mxu0 %v3336_v36  ;;  %1864 = vmatprep.subr.bf16.mxu1 %v3338_v37  ;;  %v3426_v36 = vld [vmem:[#allocation5 + $0x2ec] ss:$16 sps:$4 sm:$0xff]   ;;  %v3421_v37 = vld [vmem:[#allocation5 + $0x2e0] ss:$16 sps:$4 sm:$0xff]   ;;  %v3508_v31 = vld [vmem:[#allocation5 + $0x4a4] ss:$16 sps:$4 sm:$0xff]  }
  0x81   :  { %1701 = vmatpush1.bf16.msra.mxu0 %v3340_v38  ;;  %1865 = vmatpush1.bf16.msra.mxu1 %v3341_v39  ;;  %v3424_v38 = vld [vmem:[#allocation5 + $0x2e8] ss:$16 sps:$4 sm:$0xff]   ;;  %v3429_v39 = vld [vmem:[#allocation5 + $0x304] ss:$16 sps:$4 sm:$0xff]  }
  0x82   :  { %1702 = vmatprep.subr.bf16.mxu0 %v3342_v40  ;;  %1866 = vmatprep.subr.bf16.mxu1 %v3344_v41  ;;  %v3432_v40 = vld [vmem:[#allocation5 + $0x30c] ss:$16 sps:$4 sm:$0xff]   ;;  %v3427_v41 = vld [vmem:[#allocation5 + $0x300] ss:$16 sps:$4 sm:$0xff]  }
  0x85   :  { %1703 = vmatpush1.bf16.msra.mxu0 %v3346_v42  ;;  %1867 = vmatpush1.bf16.msra.mxu1 %v3347_v43  ;;  %v3430_v42 = vld [vmem:[#allocation5 + $0x308] ss:$16 sps:$4 sm:$0xff]   ;;  %v3435_v43 = vld [vmem:[#allocation5 + $0x324] ss:$16 sps:$4 sm:$0xff]  }
  0x86   :  { %1704 = vmatprep.subr.bf16.mxu0 %v3348_v44  ;;  %1868 = vmatprep.subr.bf16.mxu1 %v3350_v45  ;;  %v3438_v44 = vld [vmem:[#allocation5 + $0x32c] ss:$16 sps:$4 sm:$0xff]   ;;  %v3433_v45 = vld [vmem:[#allocation5 + $0x320] ss:$16 sps:$4 sm:$0xff]  }
  0x89   :  { %1705 = vmatpush1.bf16.msra.mxu0 %v3352_v47  ;;  %1869 = vmatpush1.bf16.msra.mxu1 %v3353_v49  ;;  %v3441_v47 = vld [vmem:[#allocation5 + $0x344] ss:$16 sps:$4 sm:$0xff]   ;;  %v3439_v49 = vld [vmem:[#allocation5 + $0x340] ss:$16 sps:$4 sm:$0xff]  }
  0x8a   :  { %1706 = vmatprep.subr.bf16.mxu0 %v3354_v50  ;;  %1870 = vmatprep.subr.bf16.mxu1 %v3356_v51  ;;  %v3442_v50 = vld [vmem:[#allocation5 + $0x348] ss:$16 sps:$4 sm:$0xff]   ;;  %v3447_v51 = vld [vmem:[#allocation5 + $0x364] ss:$16 sps:$4 sm:$0xff]  }
  0x8d   :  { %1707 = vmatpush1.bf16.msra.mxu0 %v3358_v53  ;;  %1871 = vmatpush1.bf16.msra.mxu1 %v3359_v54  ;;  %v3445_v53 = vld [vmem:[#allocation5 + $0x360] ss:$16 sps:$4 sm:$0xff]   ;;  %v3448_v54 = vld [vmem:[#allocation5 + $0x368] ss:$16 sps:$4 sm:$0xff]  }
  0x8e   :  { %1708 = vmatprep.subr.bf16.mxu0 %v3360_v55  ;;  %1872 = vmatprep.subr.bf16.mxu1 %v3362_v56  ;;  %v3453_v55 = vld [vmem:[#allocation5 + $0x384] ss:$16 sps:$4 sm:$0xff]   ;;  %v3456_v56 = vld [vmem:[#allocation5 + $0x38c] ss:$16 sps:$4 sm:$0xff]  }
  0x91   :  { %1709 = vmatpush1.bf16.msra.mxu0 %v3364_v57  ;;  %1873 = vmatpush1.bf16.msra.mxu1 %v3365_v58  ;;  %v3451_v57 = vld [vmem:[#allocation5 + $0x380] ss:$16 sps:$4 sm:$0xff]   ;;  %v3454_v58 = vld [vmem:[#allocation5 + $0x388] ss:$16 sps:$4 sm:$0xff]  }
  0x92   :  { %1710 = vmatprep.subr.bf16.mxu0 %v3366_v59  ;;  %1874 = vmatprep.subr.bf16.mxu1 %v3368_v60  ;;  %v3459_v59 = vld [vmem:[#allocation5 + $0x3a4] ss:$16 sps:$4 sm:$0xff]   ;;  %v3462_v60 = vld [vmem:[#allocation5 + $0x3ac] ss:$16 sps:$4 sm:$0xff]  }
  0x95   :  { %1711 = vmatpush1.bf16.msra.mxu0 %v3370_v61  ;;  %1875 = vmatpush1.bf16.msra.mxu1 %v3371_v62  ;;  %v3457_v61 = vld [vmem:[#allocation5 + $0x3a0] ss:$16 sps:$4 sm:$0xff]   ;;  %v3460_v62 = vld [vmem:[#allocation5 + $0x3a8] ss:$16 sps:$4 sm:$0xff]  }
  0x96   :  { %1712 = vmatprep.subr.bf16.mxu0 %v3372_v63  ;;  %1876 = vmatprep.subr.bf16.mxu1 %v3374_v0  ;;  %v3465_v63 = vld [vmem:[#allocation5 + $0x3c4] ss:$16 sps:$4 sm:$0xff]   ;;  %v3468_v0 = vld [vmem:[#allocation5 + $0x3cc] ss:$16 sps:$4 sm:$0xff]  }
  0x99   :  { %1713 = vmatpush1.bf16.msra.mxu0 %v3376_v1  ;;  %1877 = vmatpush1.bf16.msra.mxu1 %v3377_v2  ;;  %v3463_v1 = vld [vmem:[#allocation5 + $0x3c0] ss:$16 sps:$4 sm:$0xff]   ;;  %v3466_v2 = vld [vmem:[#allocation5 + $0x3c8] ss:$16 sps:$4 sm:$0xff]  }
  0x9a   :  { %1723 = vmatprep.subr.bf16.mxu0 %v3381_v3  ;;  %1887 = vmatprep.subr.bf16.mxu1 %v3384_v4  ;;  %v3471_v3 = vld [vmem:[#allocation5 + $0x3e4] ss:$16 sps:$4 sm:$0xff]   ;;  %v3474_v4 = vld [vmem:[#allocation5 + $0x3ec] ss:$16 sps:$4 sm:$0xff]  }
  0x9c   :  { %1715 = vmatmul.mubr.bf16.vlgmr.msra.gmra.mrb[0].mxu0 %v116_v6  ;;  %1879 = vmatmul.mubr.bf16.vlgmr.msra.gmra.mrb[0].mxu1 %v116_v6  ;;  %v3472_v6 = vld [vmem:[#allocation5 + $0x3e8] ss:$16 sps:$4 sm:$0xff]  }
  0x9d   :  { %1724 = vmatpush1.bf16.msra.mxu0 %v3379_v5  ;;  %1888 = vmatpush1.bf16.msra.mxu1 %v3382_v7  ;;  %v3469_v5 = vld [vmem:[#allocation5 + $0x3e0] ss:$16 sps:$4 sm:$0xff]   ;;  %v3478_v7 = vld [vmem:[#allocation5 + $0x404] ss:$16 sps:$4 sm:$0xff]  }
  0x9e   :  { %1725 = vmatprep.subr.bf16.mxu0 %v3387_v8  ;;  %1889 = vmatprep.subr.bf16.mxu1 %v3390_v9  ;;  %v3481_v8 = vld [vmem:[#allocation5 + $0x40c] ss:$16 sps:$4 sm:$0xff]   ;;  %v118_v9 = vpack.c.bf16 %v4071_v30, %v4071_v30  ;;  %v3503_v30 = vld [vmem:[#allocation5 + $0x488] ss:$16 sps:$4 sm:$0xff]  }
  0x9f   :  { %1755 = vmatprep.mubr.bf16.mxu0 %v119_v34  ;;  %1919 = vmatprep.mubr.bf16.mxu1 %v119_v34  ;;  %v3509_v34 = vld [vmem:[#allocation5 + $0x4a8] ss:$16 sps:$4 sm:$0xff]  }
  0xa1   :  { %1726 = vmatpush1.bf16.msra.mxu0 %v3385_v10  ;;  %1890 = vmatpush1.bf16.msra.mxu1 %v3388_v11  ;;  %v3476_v10 = vld [vmem:[#allocation5 + $0x400] ss:$16 sps:$4 sm:$0xff]   ;;  %v3479_v11 = vld [vmem:[#allocation5 + $0x408] ss:$16 sps:$4 sm:$0xff]  }
  0xa2   :  { %1727 = vmatprep.subr.bf16.mxu0 %v3393_v12  ;;  %1891 = vmatprep.subr.bf16.mxu1 %v3396_v13  ;;  %v3484_v12 = vld [vmem:[#allocation5 + $0x424] ss:$16 sps:$4 sm:$0xff]  }
  0xa3   :  { %v4077_v13 = vld [vmem:[#allocation2 + $0x10] sm:$0xff] }
  0xa5   :  { %1728 = vmatpush1.bf16.msra.mxu0 %v3391_v14  ;;  %1892 = vmatpush1.bf16.msra.mxu1 %v3394_v15  ;;  %v3487_v14 = vld [vmem:[#allocation5 + $0x42c] ss:$16 sps:$4 sm:$0xff]   ;;  %v110_v15 = vcombine.high %v4077_v13, %v4077_v13 }
  0xa6   :  { %1729 = vmatprep.subr.bf16.mxu0 %v3399_v16  ;;  %1893 = vmatprep.subr.bf16.mxu1 %v3402_v17  ;;  %v3482_v16 = vld [vmem:[#allocation5 + $0x420] ss:$16 sps:$4 sm:$0xff]  }
  0xa7   :  { %v121_v17 = vpack.c.bf16 %v110_v15, %v110_v15  ;;  %v3573_v15 = vld [vmem:[#allocation5 + $0x600] ss:$16 sps:$4 sm:$0xff]  }
  0xa9   :  { %1730 = vmatpush1.bf16.msra.mxu0 %v3397_v18  ;;  %1894 = vmatpush1.bf16.msra.mxu1 %v3400_v19  ;;  %v3485_v18 = vld [vmem:[#allocation5 + $0x428] ss:$16 sps:$4 sm:$0xff]   ;;  %v3490_v19 = vld [vmem:[#allocation5 + $0x444] ss:$16 sps:$4 sm:$0xff]  }
  0xaa   :  { %1731 = vmatprep.subr.bf16.mxu0 %v3405_v20  ;;  %1895 = vmatprep.subr.bf16.mxu1 %v3408_v21  ;;  %v3493_v20 = vld [vmem:[#allocation5 + $0x44c] ss:$16 sps:$4 sm:$0xff]   ;;  %v3488_v21 = vld [vmem:[#allocation5 + $0x440] ss:$16 sps:$4 sm:$0xff]  }
  0xad   :  { %1732 = vmatpush1.bf16.msra.mxu0 %v3403_v22  ;;  %1896 = vmatpush1.bf16.msra.mxu1 %v3406_v23  ;;  %v3491_v22 = vld [vmem:[#allocation5 + $0x448] ss:$16 sps:$4 sm:$0xff]   ;;  %v3496_v23 = vld [vmem:[#allocation5 + $0x464] ss:$16 sps:$4 sm:$0xff]  }
  0xae   :  { %1733 = vmatprep.subr.bf16.mxu0 %v3411_v24  ;;  %1897 = vmatprep.subr.bf16.mxu1 %v3414_v25  ;;  %v3499_v24 = vld [vmem:[#allocation5 + $0x46c] ss:$16 sps:$4 sm:$0xff]   ;;  %v3494_v25 = vld [vmem:[#allocation5 + $0x460] ss:$16 sps:$4 sm:$0xff]  }
  0xb1   :  { %1734 = vmatpush1.bf16.msra.mxu0 %v3409_v26  ;;  %1898 = vmatpush1.bf16.msra.mxu1 %v3412_v27  ;;  %v3497_v26 = vld [vmem:[#allocation5 + $0x468] ss:$16 sps:$4 sm:$0xff]   ;;  %v3502_v27 = vld [vmem:[#allocation5 + $0x484] ss:$16 sps:$4 sm:$0xff]  }
  0xb2   :  { %1735 = vmatprep.subr.bf16.mxu0 %v3417_v28  ;;  %1899 = vmatprep.subr.bf16.mxu1 %v3420_v29  ;;  %v3505_v28 = vld [vmem:[#allocation5 + $0x48c] ss:$16 sps:$4 sm:$0xff]   ;;  %v3500_v29 = vld [vmem:[#allocation5 + $0x480] ss:$16 sps:$4 sm:$0xff]  }
  0xb5   :  { %1736 = vmatpush1.bf16.msra.mxu0 %v3415_v32  ;;  %1900 = vmatpush1.bf16.msra.mxu1 %v3418_v33  ;;  %v3511_v32 = vld [vmem:[#allocation5 + $0x4ac] ss:$16 sps:$4 sm:$0xff]   ;;  %v3506_v33 = vld [vmem:[#allocation5 + $0x4a0] ss:$16 sps:$4 sm:$0xff]  }
  0xb6   :  { %1737 = vmatprep.subr.bf16.mxu0 %v3423_v35  ;;  %1901 = vmatprep.subr.bf16.mxu1 %v3426_v36  ;;  %v3514_v35 = vld [vmem:[#allocation5 + $0x4c4] ss:$16 sps:$4 sm:$0xff]   ;;  %v3517_v36 = vld [vmem:[#allocation5 + $0x4cc] ss:$16 sps:$4 sm:$0xff]  }
  0xb9   :  { %1738 = vmatpush1.bf16.msra.mxu0 %v3421_v37  ;;  %1902 = vmatpush1.bf16.msra.mxu1 %v3424_v38  ;;  %v3512_v37 = vld [vmem:[#allocation5 + $0x4c0] ss:$16 sps:$4 sm:$0xff]   ;;  %v3515_v38 = vld [vmem:[#allocation5 + $0x4c8] ss:$16 sps:$4 sm:$0xff]  }
  0xba   :  { %1739 = vmatprep.subr.bf16.mxu0 %v3429_v39  ;;  %1903 = vmatprep.subr.bf16.mxu1 %v3432_v40  ;;  %v3520_v39 = vld [vmem:[#allocation5 + $0x4e4] ss:$16 sps:$4 sm:$0xff]   ;;  %v3523_v40 = vld [vmem:[#allocation5 + $0x4ec] ss:$16 sps:$4 sm:$0xff]  }
  0xbd   :  { %1740 = vmatpush1.bf16.msra.mxu0 %v3427_v41  ;;  %1904 = vmatpush1.bf16.msra.mxu1 %v3430_v42  ;;  %v3518_v41 = vld [vmem:[#allocation5 + $0x4e0] ss:$16 sps:$4 sm:$0xff]   ;;  %v3521_v42 = vld [vmem:[#allocation5 + $0x4e8] ss:$16 sps:$4 sm:$0xff]  }
  0xbe   :  { %1741 = vmatprep.subr.bf16.mxu0 %v3435_v43  ;;  %1905 = vmatprep.subr.bf16.mxu1 %v3438_v44  ;;  %v3526_v43 = vld [vmem:[#allocation5 + $0x504] ss:$16 sps:$4 sm:$0xff]   ;;  %v3529_v44 = vld [vmem:[#allocation5 + $0x50c] ss:$16 sps:$4 sm:$0xff]  }
  0xc1   :  { %1742 = vmatpush1.bf16.msra.mxu0 %v3433_v45  ;;  %1906 = vmatpush1.bf16.msra.mxu1 %v3436_v46  ;;  %v3524_v45 = vld [vmem:[#allocation5 + $0x500] ss:$16 sps:$4 sm:$0xff]   ;;  %v3527_v46 = vld [vmem:[#allocation5 + $0x508] ss:$16 sps:$4 sm:$0xff]  }
  0xc2   :  { %1743 = vmatprep.subr.bf16.mxu0 %v3441_v47  ;;  %1907 = vmatprep.subr.bf16.mxu1 %v3444_v48  ;;  %v3532_v47 = vld [vmem:[#allocation5 + $0x524] ss:$16 sps:$4 sm:$0xff]   ;;  %v3535_v48 = vld [vmem:[#allocation5 + $0x52c] ss:$16 sps:$4 sm:$0xff]  }
  0xc5   :  { %1744 = vmatpush1.bf16.msra.mxu0 %v3439_v49  ;;  %1908 = vmatpush1.bf16.msra.mxu1 %v3442_v50  ;;  %v3530_v49 = vld [vmem:[#allocation5 + $0x520] ss:$16 sps:$4 sm:$0xff]   ;;  %v3533_v50 = vld [vmem:[#allocation5 + $0x528] ss:$16 sps:$4 sm:$0xff]  }
  0xc6   :  { %1745 = vmatprep.subr.bf16.mxu0 %v3447_v51  ;;  %1909 = vmatprep.subr.bf16.mxu1 %v3450_v52  ;;  %v3538_v51 = vld [vmem:[#allocation5 + $0x544] ss:$16 sps:$4 sm:$0xff]   ;;  %v3541_v52 = vld [vmem:[#allocation5 + $0x54c] ss:$16 sps:$4 sm:$0xff]  }
  0xc9   :  { %1746 = vmatpush1.bf16.msra.mxu0 %v3445_v53  ;;  %1910 = vmatpush1.bf16.msra.mxu1 %v3448_v54  ;;  %v3536_v53 = vld [vmem:[#allocation5 + $0x540] ss:$16 sps:$4 sm:$0xff]   ;;  %v3539_v54 = vld [vmem:[#allocation5 + $0x548] ss:$16 sps:$4 sm:$0xff]  }
  0xca   :  { %1747 = vmatprep.subr.bf16.mxu0 %v3453_v55  ;;  %1911 = vmatprep.subr.bf16.mxu1 %v3456_v56  ;;  %v3544_v55 = vld [vmem:[#allocation5 + $0x564] ss:$16 sps:$4 sm:$0xff]   ;;  %v3547_v56 = vld [vmem:[#allocation5 + $0x56c] ss:$16 sps:$4 sm:$0xff]  }
  0xcd   :  { %1748 = vmatpush1.bf16.msra.mxu0 %v3451_v57  ;;  %1912 = vmatpush1.bf16.msra.mxu1 %v3454_v58  ;;  %v3542_v57 = vld [vmem:[#allocation5 + $0x560] ss:$16 sps:$4 sm:$0xff]   ;;  %v3545_v58 = vld [vmem:[#allocation5 + $0x568] ss:$16 sps:$4 sm:$0xff]  }
  0xce   :  { %1749 = vmatprep.subr.bf16.mxu0 %v3459_v59  ;;  %1913 = vmatprep.subr.bf16.mxu1 %v3462_v60  ;;  %v3550_v59 = vld [vmem:[#allocation5 + $0x584] ss:$16 sps:$4 sm:$0xff]   ;;  %v3553_v60 = vld [vmem:[#allocation5 + $0x58c] ss:$16 sps:$4 sm:$0xff]  }
  0xd1   :  { %1750 = vmatpush1.bf16.msra.mxu0 %v3457_v61  ;;  %1914 = vmatpush1.bf16.msra.mxu1 %v3460_v62  ;;  %v3548_v61 = vld [vmem:[#allocation5 + $0x580] ss:$16 sps:$4 sm:$0xff]   ;;  %v3551_v62 = vld [vmem:[#allocation5 + $0x588] ss:$16 sps:$4 sm:$0xff]  }
  0xd2   :  { %1751 = vmatprep.subr.bf16.mxu0 %v3465_v63  ;;  %1915 = vmatprep.subr.bf16.mxu1 %v3468_v0  ;;  %v3556_v63 = vld [vmem:[#allocation5 + $0x5a4] ss:$16 sps:$4 sm:$0xff]   ;;  %v3559_v0 = vld [vmem:[#allocation5 + $0x5ac] ss:$16 sps:$4 sm:$0xff]  }
  0xd5   :  { %1752 = vmatpush1.bf16.msra.mxu0 %v3463_v1  ;;  %1916 = vmatpush1.bf16.msra.mxu1 %v3466_v2  ;;  %v3554_v1 = vld [vmem:[#allocation5 + $0x5a0] ss:$16 sps:$4 sm:$0xff]   ;;  %v3557_v2 = vld [vmem:[#allocation5 + $0x5a8] ss:$16 sps:$4 sm:$0xff]  }
  0xd6   :  { %1753 = vmatprep.subr.bf16.mxu0 %v3471_v3  ;;  %1917 = vmatprep.subr.bf16.mxu1 %v3474_v4  ;;  %v3562_v3 = vld [vmem:[#allocation5 + $0x5c4] ss:$16 sps:$4 sm:$0xff]   ;;  %v3565_v4 = vld [vmem:[#allocation5 + $0x5cc] ss:$16 sps:$4 sm:$0xff]  }
  0xd9   :  { %1754 = vmatpush1.bf16.msra.mxu0 %v3469_v5  ;;  %1918 = vmatpush1.bf16.msra.mxu1 %v3472_v6  ;;  %v3560_v5 = vld [vmem:[#allocation5 + $0x5c0] ss:$16 sps:$4 sm:$0xff]   ;;  %v3563_v6 = vld [vmem:[#allocation5 + $0x5c8] ss:$16 sps:$4 sm:$0xff]  }
  0xda   :  { %1764 = vmatprep.subr.bf16.mxu0 %v3478_v7  ;;  %1928 = vmatprep.subr.bf16.mxu1 %v3481_v8  ;;  %v3568_v7 = vld [vmem:[#allocation5 + $0x5e4] ss:$16 sps:$4 sm:$0xff]   ;;  %v3571_v8 = vld [vmem:[#allocation5 + $0x5ec] ss:$16 sps:$4 sm:$0xff]  }
  0xdc   :  { %1756 = vmatmul.mubr.bf16.vlgmr.msra.gmra.mrb[0].mxu0 %v118_v9  ;;  %1920 = vmatmul.mubr.bf16.vlgmr.msra.gmra.mrb[0].mxu1 %v118_v9  ;;  %v3566_v9 = vld [vmem:[#allocation5 + $0x5e0] ss:$16 sps:$4 sm:$0xff]  }
  0xdd   :  { %1765 = vmatpush1.bf16.msra.mxu0 %v3476_v10  ;;  %1929 = vmatpush1.bf16.msra.mxu1 %v3479_v11  ;;  %v3569_v10 = vld [vmem:[#allocation5 + $0x5e8] ss:$16 sps:$4 sm:$0xff]  }
  0xde   :  { %1766 = vmatprep.subr.bf16.mxu0 %v3484_v12  ;;  %1930 = vmatprep.subr.bf16.mxu1 %v3487_v14  ;;  %v4081_v11 = vld [vmem:[#allocation2 + $0x18] sm:$0xff]  ;;  %v3575_v12 = vld [vmem:[#allocation5 + $0x604] ss:$16 sps:$4 sm:$0xff]  }
  0xdf   :  { %1796 = vmatprep.mubr.bf16.mxu0 %v121_v17  ;;  %1960 = vmatprep.mubr.bf16.mxu1 %v121_v17  ;;  %v3578_v14 = vld [vmem:[#allocation5 + $0x60c] ss:$16 sps:$4 sm:$0xff]   ;;  %v111_v17 = vcombine.high %v4081_v11, %v4081_v11 }
  0xe1   :  { %1767 = vmatpush1.bf16.msra.mxu0 %v3482_v16  ;;  %1931 = vmatpush1.bf16.msra.mxu1 %v3485_v18  ;;  %v3576_v16 = vld [vmem:[#allocation5 + $0x608] ss:$16 sps:$4 sm:$0xff]   ;;  %v120_v18 = vpack.c.bf16 %v4077_v13, %v4077_v13  ;;  %v3593_v13 = vld [vmem:[#allocation5 + $0x664] ss:$16 sps:$4 sm:$0xff]  }
  0xe2   :  { %1768 = vmatprep.subr.bf16.mxu0 %v3490_v19  ;;  %1932 = vmatprep.subr.bf16.mxu1 %v3493_v20  ;;  %v3581_v19 = vld [vmem:[#allocation5 + $0x624] ss:$16 sps:$4 sm:$0xff]   ;;  %v3584_v20 = vld [vmem:[#allocation5 + $0x62c] ss:$16 sps:$4 sm:$0xff]  }
  0xe5   :  { %1769 = vmatpush1.bf16.msra.mxu0 %v3488_v21  ;;  %1933 = vmatpush1.bf16.msra.mxu1 %v3491_v22  ;;  %v3579_v21 = vld [vmem:[#allocation5 + $0x620] ss:$16 sps:$4 sm:$0xff]   ;;  %v3582_v22 = vld [vmem:[#allocation5 + $0x628] ss:$16 sps:$4 sm:$0xff]  }
  0xe6   :  { %1770 = vmatprep.subr.bf16.mxu0 %v3496_v23  ;;  %1934 = vmatprep.subr.bf16.mxu1 %v3499_v24  ;;  %v123_v23 = vpack.c.bf16 %v111_v17, %v111_v17  ;;  %v3587_v24 = vld [vmem:[#allocation5 + $0x644] ss:$16 sps:$4 sm:$0xff]  }
  0xe7   :  { %v3672_v17 = vld [vmem:[#allocation7 + $0x4] ss:$8 sps:$4 sm:$0xff]  }
  0xe9   :  { %1771 = vmatpush1.bf16.msra.mxu0 %v3494_v25  ;;  %1935 = vmatpush1.bf16.msra.mxu1 %v3497_v26  ;;  %v3590_v25 = vld [vmem:[#allocation5 + $0x64c] ss:$16 sps:$4 sm:$0xff]   ;;  %v3585_v26 = vld [vmem:[#allocation5 + $0x640] ss:$16 sps:$4 sm:$0xff]  }
  0xea   :  { %1772 = vmatprep.subr.bf16.mxu0 %v3502_v27  ;;  %1936 = vmatprep.subr.bf16.mxu1 %v3505_v28  ;;  %v3588_v27 = vld [vmem:[#allocation5 + $0x648] ss:$16 sps:$4 sm:$0xff]   ;;  %v3596_v28 = vld [vmem:[#allocation5 + $0x66c] ss:$16 sps:$4 sm:$0xff]  }
  0xed   :  { %1773 = vmatpush1.bf16.msra.mxu0 %v3500_v29  ;;  %1937 = vmatpush1.bf16.msra.mxu1 %v3503_v30  ;;  %v3591_v29 = vld [vmem:[#allocation5 + $0x660] ss:$16 sps:$4 sm:$0xff]   ;;  %v3594_v30 = vld [vmem:[#allocation5 + $0x668] ss:$16 sps:$4 sm:$0xff]  }
  0xee   :  { %1774 = vmatprep.subr.bf16.mxu0 %v3508_v31  ;;  %1938 = vmatprep.subr.bf16.mxu1 %v3511_v32  ;;  %v3599_v31 = vld [vmem:[#allocation5 + $0x684] ss:$16 sps:$4 sm:$0xff]   ;;  %v3602_v32 = vld [vmem:[#allocation5 + $0x68c] ss:$16 sps:$4 sm:$0xff]  }
  0xf1   :  { %1775 = vmatpush1.bf16.msra.mxu0 %v3506_v33  ;;  %1939 = vmatpush1.bf16.msra.mxu1 %v3509_v34  ;;  %v3597_v33 = vld [vmem:[#allocation5 + $0x680] ss:$16 sps:$4 sm:$0xff]   ;;  %v3600_v34 = vld [vmem:[#allocation5 + $0x688] ss:$16 sps:$4 sm:$0xff]  }
  0xf2   :  { %1776 = vmatprep.subr.bf16.mxu0 %v3514_v35  ;;  %1940 = vmatprep.subr.bf16.mxu1 %v3517_v36  ;;  %v3605_v35 = vld [vmem:[#allocation5 + $0x6a4] ss:$16 sps:$4 sm:$0xff]   ;;  %v3608_v36 = vld [vmem:[#allocation5 + $0x6ac] ss:$16 sps:$4 sm:$0xff]  }
  0xf5   :  { %1777 = vmatpush1.bf16.msra.mxu0 %v3512_v37  ;;  %1941 = vmatpush1.bf16.msra.mxu1 %v3515_v38  ;;  %v3603_v37 = vld [vmem:[#allocation5 + $0x6a0] ss:$16 sps:$4 sm:$0xff]   ;;  %v3606_v38 = vld [vmem:[#allocation5 + $0x6a8] ss:$16 sps:$4 sm:$0xff]  }
  0xf6   :  { %1778 = vmatprep.subr.bf16.mxu0 %v3520_v39  ;;  %1942 = vmatprep.subr.bf16.mxu1 %v3523_v40  ;;  %v3611_v39 = vld [vmem:[#allocation5 + $0x6c4] ss:$16 sps:$4 sm:$0xff]   ;;  %v3614_v40 = vld [vmem:[#allocation5 + $0x6cc] ss:$16 sps:$4 sm:$0xff]  }
  0xf9   :  { %1779 = vmatpush1.bf16.msra.mxu0 %v3518_v41  ;;  %1943 = vmatpush1.bf16.msra.mxu1 %v3521_v42  ;;  %v3609_v41 = vld [vmem:[#allocation5 + $0x6c0] ss:$16 sps:$4 sm:$0xff]   ;;  %v3612_v42 = vld [vmem:[#allocation5 + $0x6c8] ss:$16 sps:$4 sm:$0xff]  }
  0xfa   :  { %1780 = vmatprep.subr.bf16.mxu0 %v3526_v43  ;;  %1944 = vmatprep.subr.bf16.mxu1 %v3529_v44  ;;  %v3617_v43 = vld [vmem:[#allocation5 + $0x6e4] ss:$16 sps:$4 sm:$0xff]   ;;  %v3620_v44 = vld [vmem:[#allocation5 + $0x6ec] ss:$16 sps:$4 sm:$0xff]  }
  0xfd   :  { %1781 = vmatpush1.bf16.msra.mxu0 %v3524_v45  ;;  %1945 = vmatpush1.bf16.msra.mxu1 %v3527_v46  ;;  %v3615_v45 = vld [vmem:[#allocation5 + $0x6e0] ss:$16 sps:$4 sm:$0xff]   ;;  %v3618_v46 = vld [vmem:[#allocation5 + $0x6e8] ss:$16 sps:$4 sm:$0xff]  }
  0xfe   :  { %1782 = vmatprep.subr.bf16.mxu0 %v3532_v47  ;;  %1946 = vmatprep.subr.bf16.mxu1 %v3535_v48  ;;  %v3623_v47 = vld [vmem:[#allocation5 + $0x704] ss:$16 sps:$4 sm:$0xff]   ;;  %v3626_v48 = vld [vmem:[#allocation5 + $0x70c] ss:$16 sps:$4 sm:$0xff]  }
 0x101   :  { %1783 = vmatpush1.bf16.msra.mxu0 %v3530_v49  ;;  %1947 = vmatpush1.bf16.msra.mxu1 %v3533_v50  ;;  %v3621_v49 = vld [vmem:[#allocation5 + $0x700] ss:$16 sps:$4 sm:$0xff]   ;;  %v3624_v50 = vld [vmem:[#allocation5 + $0x708] ss:$16 sps:$4 sm:$0xff]  }
 0x102   :  { %1784 = vmatprep.subr.bf16.mxu0 %v3538_v51  ;;  %1948 = vmatprep.subr.bf16.mxu1 %v3541_v52  ;;  %v3629_v51 = vld [vmem:[#allocation5 + $0x724] ss:$16 sps:$4 sm:$0xff]   ;;  %v3632_v52 = vld [vmem:[#allocation5 + $0x72c] ss:$16 sps:$4 sm:$0xff]  }
 0x105   :  { %1785 = vmatpush1.bf16.msra.mxu0 %v3536_v53  ;;  %1949 = vmatpush1.bf16.msra.mxu1 %v3539_v54  ;;  %v3627_v53 = vld [vmem:[#allocation5 + $0x720] ss:$16 sps:$4 sm:$0xff]   ;;  %v3630_v54 = vld [vmem:[#allocation5 + $0x728] ss:$16 sps:$4 sm:$0xff]  }
 0x106   :  { %1786 = vmatprep.subr.bf16.mxu0 %v3544_v55  ;;  %1950 = vmatprep.subr.bf16.mxu1 %v3547_v56  ;;  %v3635_v55 = vld [vmem:[#allocation5 + $0x744] ss:$16 sps:$4 sm:$0xff]   ;;  %v3638_v56 = vld [vmem:[#allocation5 + $0x74c] ss:$16 sps:$4 sm:$0xff]  }
 0x109   :  { %1787 = vmatpush1.bf16.msra.mxu0 %v3542_v57  ;;  %1951 = vmatpush1.bf16.msra.mxu1 %v3545_v58  ;;  %v3633_v57 = vld [vmem:[#allocation5 + $0x740] ss:$16 sps:$4 sm:$0xff]   ;;  %v3636_v58 = vld [vmem:[#allocation5 + $0x748] ss:$16 sps:$4 sm:$0xff]  }
 0x10a   :  { %1788 = vmatprep.subr.bf16.mxu0 %v3550_v59  ;;  %1952 = vmatprep.subr.bf16.mxu1 %v3553_v60  ;;  %v3641_v59 = vld [vmem:[#allocation5 + $0x764] ss:$16 sps:$4 sm:$0xff]   ;;  %v3644_v60 = vld [vmem:[#allocation5 + $0x76c] ss:$16 sps:$4 sm:$0xff]  }
 0x10d   :  { %1789 = vmatpush1.bf16.msra.mxu0 %v3548_v61  ;;  %1953 = vmatpush1.bf16.msra.mxu1 %v3551_v62  ;;  %v3639_v61 = vld [vmem:[#allocation5 + $0x760] ss:$16 sps:$4 sm:$0xff]   ;;  %v3642_v62 = vld [vmem:[#allocation5 + $0x768] ss:$16 sps:$4 sm:$0xff]  }
 0x10e   :  { %1790 = vmatprep.subr.bf16.mxu0 %v3556_v63  ;;  %1954 = vmatprep.subr.bf16.mxu1 %v3559_v0  ;;  %v3647_v63 = vld [vmem:[#allocation5 + $0x784] ss:$16 sps:$4 sm:$0xff]   ;;  %v3650_v0 = vld [vmem:[#allocation5 + $0x78c] ss:$16 sps:$4 sm:$0xff]  }
 0x111   :  { %1791 = vmatpush1.bf16.msra.mxu0 %v3554_v1  ;;  %1955 = vmatpush1.bf16.msra.mxu1 %v3557_v2  ;;  %v3645_v1 = vld [vmem:[#allocation5 + $0x780] ss:$16 sps:$4 sm:$0xff]   ;;  %v3648_v2 = vld [vmem:[#allocation5 + $0x788] ss:$16 sps:$4 sm:$0xff]  }
 0x112   :  { %1792 = vmatprep.subr.bf16.mxu0 %v3562_v3  ;;  %1956 = vmatprep.subr.bf16.mxu1 %v3565_v4  ;;  %v3653_v3 = vld [vmem:[#allocation5 + $0x7a4] ss:$16 sps:$4 sm:$0xff]   ;;  %v3656_v4 = vld [vmem:[#allocation5 + $0x7ac] ss:$16 sps:$4 sm:$0xff]  }
 0x115   :  { %1793 = vmatpush1.bf16.msra.mxu0 %v3560_v5  ;;  %1957 = vmatpush1.bf16.msra.mxu1 %v3563_v6  ;;  %v3651_v5 = vld [vmem:[#allocation5 + $0x7a0] ss:$16 sps:$4 sm:$0xff]   ;;  %v3654_v6 = vld [vmem:[#allocation5 + $0x7a8] ss:$16 sps:$4 sm:$0xff]  }
 0x116   :  { %1794 = vmatprep.subr.bf16.mxu0 %v3568_v7  ;;  %1958 = vmatprep.subr.bf16.mxu1 %v3571_v8  ;;  %v3659_v7 = vld [vmem:[#allocation5 + $0x7c4] ss:$16 sps:$4 sm:$0xff]   ;;  %v3662_v8 = vld [vmem:[#allocation5 + $0x7cc] ss:$16 sps:$4 sm:$0xff]  }
 0x119   :  { %1795 = vmatpush1.bf16.msra.mxu0 %v3566_v9  ;;  %1959 = vmatpush1.bf16.msra.mxu1 %v3569_v10  ;;  %v3657_v9 = vld [vmem:[#allocation5 + $0x7c0] ss:$16 sps:$4 sm:$0xff]   ;;  %v3660_v10 = vld [vmem:[#allocation5 + $0x7c8] ss:$16 sps:$4 sm:$0xff]  }
 0x11a   :  { %1805 = vmatprep.subr.bf16.mxu0 %v3575_v12  ;;  %1969 = vmatprep.subr.bf16.mxu1 %v3578_v14  ;;  %v3665_v12 = vld [vmem:[#allocation5 + $0x7e4] ss:$16 sps:$4 sm:$0xff]   ;;  %v3668_v14 = vld [vmem:[#allocation5 + $0x7ec] ss:$16 sps:$4 sm:$0xff]  }
 0x11c   :  { %1797 = vmatmul.mubr.bf16.vlgmr.msra.gmra.mrb[0].mxu0 %v120_v18  ;;  %1961 = vmatmul.mubr.bf16.vlgmr.msra.gmra.mrb[0].mxu1 %v120_v18  ;;  %v122_v18 = vpack.c.bf16 %v4081_v11, %v4081_v11  ;;  %v3682_v11 = vld [vmem:[#allocation7 + $0x40] ss:$8 sps:$4 sm:$0xff]  }
 0x11d   :  { %1806 = vmatpush1.bf16.msra.mxu0 %v3573_v15  ;;  %1970 = vmatpush1.bf16.msra.mxu1 %v3576_v16  ;;  %v3663_v15 = vld [vmem:[#allocation5 + $0x7e0] ss:$16 sps:$4 sm:$0xff]   ;;  %v3666_v16 = vld [vmem:[#allocation5 + $0x7e8] ss:$16 sps:$4 sm:$0xff]  }
 0x11e   :  { %1807 = vmatprep.subr.bf16.mxu0 %v3581_v19  ;;  %1971 = vmatprep.subr.bf16.mxu1 %v3584_v20  ;;  %v3670_v19 = vld [vmem:[#allocation7] ss:$8 sps:$4 sm:$0xff]   ;;  %v3675_v20 = vld [vmem:[#allocation7 + $0x14] ss:$8 sps:$4 sm:$0xff]  }
 0x11f   :  { %1837 = vmatprep.mubr.bf16.mxu0 %v123_v23  ;;  %2001 = vmatprep.mubr.bf16.mxu1 %v123_v23  ;;  %v3676_v23 = vld [vmem:[#allocation7 + $0x20] ss:$8 sps:$4 sm:$0xff]  }
 0x121   :  { %1808 = vmatpush1.bf16.msra.mxu0 %v3579_v21  ;;  %1972 = vmatpush1.bf16.msra.mxu1 %v3582_v22  ;;  %v3673_v21 = vld [vmem:[#allocation7 + $0x10] ss:$8 sps:$4 sm:$0xff]   ;;  %v3678_v22 = vld [vmem:[#allocation7 + $0x24] ss:$8 sps:$4 sm:$0xff]  }
 0x122   :  { %1809 = vmatprep.subr.bf16.mxu0 %v3587_v24  ;;  %1973 = vmatprep.subr.bf16.mxu1 %v3590_v25  ;;  %v3681_v24 = vld [vmem:[#allocation7 + $0x34] ss:$8 sps:$4 sm:$0xff]   ;;  %v3679_v25 = vld [vmem:[#allocation7 + $0x30] ss:$8 sps:$4 sm:$0xff]  }
 0x125   :  { %1810 = vmatpush1.bf16.msra.mxu0 %v3585_v26  ;;  %1974 = vmatpush1.bf16.msra.mxu1 %v3588_v27  ;;  %v3684_v26 = vld [vmem:[#allocation7 + $0x44] ss:$8 sps:$4 sm:$0xff]   ;;  %v3687_v27 = vld [vmem:[#allocation7 + $0x54] ss:$8 sps:$4 sm:$0xff]  }
 0x126   :  { %1811 = vmatprep.subr.bf16.mxu0 %v3593_v13  ;;  %1975 = vmatprep.subr.bf16.mxu1 %v3596_v28  ;;  %v3685_v13 = vld [vmem:[#allocation7 + $0x50] ss:$8 sps:$4 sm:$0xff]   ;;  %v3690_v28 = vld [vmem:[#allocation7 + $0x64] ss:$8 sps:$4 sm:$0xff]  }
 0x129   :  { %1812 = vmatpush1.bf16.msra.mxu0 %v3591_v29  ;;  %1976 = vmatpush1.bf16.msra.mxu1 %v3594_v30  ;;  %v3688_v29 = vld [vmem:[#allocation7 + $0x60] ss:$8 sps:$4 sm:$0xff]   ;;  %v3693_v30 = vld [vmem:[#allocation7 + $0x74] ss:$8 sps:$4 sm:$0xff]  }
 0x12a   :  { %1813 = vmatprep.subr.bf16.mxu0 %v3599_v31  ;;  %1977 = vmatprep.subr.bf16.mxu1 %v3602_v32  ;;  %v3691_v31 = vld [vmem:[#allocation7 + $0x70] ss:$8 sps:$4 sm:$0xff]   ;;  %v3696_v32 = vld [vmem:[#allocation7 + $0x84] ss:$8 sps:$4 sm:$0xff]  }
 0x12d   :  { %1814 = vmatpush1.bf16.msra.mxu0 %v3597_v33  ;;  %1978 = vmatpush1.bf16.msra.mxu1 %v3600_v34  ;;  %v3694_v33 = vld [vmem:[#allocation7 + $0x80] ss:$8 sps:$4 sm:$0xff]   ;;  %v3699_v34 = vld [vmem:[#allocation7 + $0x94] ss:$8 sps:$4 sm:$0xff]  }
 0x12e   :  { %1815 = vmatprep.subr.bf16.mxu0 %v3605_v35  ;;  %1979 = vmatprep.subr.bf16.mxu1 %v3608_v36  ;;  %v3697_v35 = vld [vmem:[#allocation7 + $0x90] ss:$8 sps:$4 sm:$0xff]   ;;  %v3702_v36 = vld [vmem:[#allocation7 + $0xa4] ss:$8 sps:$4 sm:$0xff]  }
 0x131   :  { %1816 = vmatpush1.bf16.msra.mxu0 %v3603_v37  ;;  %1980 = vmatpush1.bf16.msra.mxu1 %v3606_v38  ;;  %v3700_v37 = vld [vmem:[#allocation7 + $0xa0] ss:$8 sps:$4 sm:$0xff]   ;;  %v3705_v38 = vld [vmem:[#allocation7 + $0xb4] ss:$8 sps:$4 sm:$0xff]  }
 0x132   :  { %1817 = vmatprep.subr.bf16.mxu0 %v3611_v39  ;;  %1981 = vmatprep.subr.bf16.mxu1 %v3614_v40  ;;  %v3703_v39 = vld [vmem:[#allocation7 + $0xb0] ss:$8 sps:$4 sm:$0xff]   ;;  %v3708_v40 = vld [vmem:[#allocation7 + $0xc4] ss:$8 sps:$4 sm:$0xff]  }
 0x135   :  { %1818 = vmatpush1.bf16.msra.mxu0 %v3609_v41  ;;  %1982 = vmatpush1.bf16.msra.mxu1 %v3612_v42  ;;  %v3706_v41 = vld [vmem:[#allocation7 + $0xc0] ss:$8 sps:$4 sm:$0xff]   ;;  %v3711_v42 = vld [vmem:[#allocation7 + $0xd4] ss:$8 sps:$4 sm:$0xff]  }
 0x136   :  { %1819 = vmatprep.subr.bf16.mxu0 %v3617_v43  ;;  %1983 = vmatprep.subr.bf16.mxu1 %v3620_v44  ;;  %v3709_v43 = vld [vmem:[#allocation7 + $0xd0] ss:$8 sps:$4 sm:$0xff]   ;;  %v3714_v44 = vld [vmem:[#allocation7 + $0xe4] ss:$8 sps:$4 sm:$0xff]  }
 0x139   :  { %1820 = vmatpush1.bf16.msra.mxu0 %v3615_v45  ;;  %1984 = vmatpush1.bf16.msra.mxu1 %v3618_v46  ;;  %v3712_v45 = vld [vmem:[#allocation7 + $0xe0] ss:$8 sps:$4 sm:$0xff]   ;;  %v3717_v46 = vld [vmem:[#allocation7 + $0xf4] ss:$8 sps:$4 sm:$0xff]  }
 0x13a   :  { %1821 = vmatprep.subr.bf16.mxu0 %v3623_v47  ;;  %1985 = vmatprep.subr.bf16.mxu1 %v3626_v48  ;;  %v3715_v47 = vld [vmem:[#allocation7 + $0xf0] ss:$8 sps:$4 sm:$0xff]   ;;  %v3720_v48 = vld [vmem:[#allocation7 + $0x104] ss:$8 sps:$4 sm:$0xff]  }
 0x13d   :  { %1822 = vmatpush1.bf16.msra.mxu0 %v3621_v49  ;;  %1986 = vmatpush1.bf16.msra.mxu1 %v3624_v50  ;;  %v3766_v49 = vld [vmem:[#allocation8 + $0x40] sm:$0xff]  }
 0x13e   :  { %1823 = vmatprep.subr.bf16.mxu0 %v3629_v51  ;;  %1987 = vmatprep.subr.bf16.mxu1 %v3632_v52  ;;  %v3767_v50 = vld [vmem:[#allocation8] sm:$0xff]   ;;  %v3768_v51 = vld [vmem:[#allocation8 + $0x48] sm:$0xff]  }
 0x13f   :  { %v3769_v52 = vld [vmem:[#allocation8 + $0x8] sm:$0xff]  }
 0x141   :  { %1824 = vmatpush1.bf16.msra.mxu0 %v3627_v53  ;;  %1988 = vmatpush1.bf16.msra.mxu1 %v3630_v54  ;;  %v3770_v53 = vld [vmem:[#allocation8 + $0x50] sm:$0xff]  }
 0x142   :  { %1825 = vmatprep.subr.bf16.mxu0 %v3635_v55  ;;  %1989 = vmatprep.subr.bf16.mxu1 %v3638_v56  ;;  %v3771_v54 = vld [vmem:[#allocation8 + $0x10] sm:$0xff]   ;;  %v3772_v55 = vld [vmem:[#allocation8 + $0x58] sm:$0xff]  }
 0x143   :  { %v3773_v56 = vld [vmem:[#allocation8 + $0x18] sm:$0xff]  }
 0x145   :  { %1826 = vmatpush1.bf16.msra.mxu0 %v3633_v57  ;;  %1990 = vmatpush1.bf16.msra.mxu1 %v3636_v58  ;;  %v3774_v57 = vld [vmem:[#allocation8 + $0x60] sm:$0xff]  }
 0x146   :  { %1827 = vmatprep.subr.bf16.mxu0 %v3641_v59  ;;  %1991 = vmatprep.subr.bf16.mxu1 %v3644_v60  ;;  %v3775_v58 = vld [vmem:[#allocation8 + $0x20] sm:$0xff]   ;;  %v3776_v59 = vld [vmem:[#allocation8 + $0x68] sm:$0xff]  }
 0x147   :  { %v3777_v60 = vld [vmem:[#allocation8 + $0x28] sm:$0xff]  }
 0x149   :  { %1828 = vmatpush1.bf16.msra.mxu0 %v3639_v61  ;;  %1992 = vmatpush1.bf16.msra.mxu1 %v3642_v62  ;;  %v382_v61 = vlaneseq }
 0x14a   :  { %1829 = vmatprep.subr.bf16.mxu0 %v3647_v63  ;;  %1993 = vmatprep.subr.bf16.mxu1 %v3650_v0  ;;  %v4096_v0 = vld [vmem:[%s4140_s2] sm:$0xf] }
 0x14b   :  { %v4090_v62 = vshrl.u32 %v382_v61, 7 }
 0x14d   :  { %1830 = vmatpush1.bf16.msra.mxu0 %v3645_v1  ;;  %1994 = vmatpush1.bf16.msra.mxu1 %v3648_v2  ;;  %v384_v63 = vsub.s32 0, %v4090_v62  ;;  %v388_v1 = vsub.s32 1, %v4090_v62  ;;  %v396_v2 = vsub.s32 3, %v4090_v62 }
 0x14e   :  { %1831 = vmatprep.subr.bf16.mxu0 %v3653_v3  ;;  %1995 = vmatprep.subr.bf16.mxu1 %v3656_v4 }
 0x14f   :  { %v385_v3 = vrot.slane %v4096_v0, %v384_v63  ;;  %v389_v4 = vrot.slane %v4096_v0, %v388_v1 }
 0x151   :  { %1832 = vmatpush1.bf16.msra.mxu0 %v3651_v5  ;;  %1996 = vmatpush1.bf16.msra.mxu1 %v3654_v6  ;;  %v397_v5 = vrot.slane %v4096_v0, %v396_v2 }
 0x152   :  { %1833 = vmatprep.subr.bf16.mxu0 %v3659_v7  ;;  %1997 = vmatprep.subr.bf16.mxu1 %v3662_v8 }
 0x155   :  { %1834 = vmatpush1.bf16.msra.mxu0 %v3657_v9  ;;  %1998 = vmatpush1.bf16.msra.mxu1 %v3660_v10 }
 0x156   :  { %1835 = vmatprep.subr.bf16.mxu0 %v3665_v12  ;;  %1999 = vmatprep.subr.bf16.mxu1 %v3668_v14 }
 0x159   :  { %1836 = vmatpush1.bf16.msra.mxu0 %v3663_v15  ;;  %2000 = vmatpush1.bf16.msra.mxu1 %v3666_v16 }
 0x15a   :  { %2422 = vmatprep.subr.bf16.mxu0 %v3672_v17  ;;  %3183 = vmatprep.subr.bf16.mxu1 %v3766_v49  ;;  %v3756_v49 = vld [vmem:[#allocation7 + $0x1c4] ss:$8 sps:$4 sm:$0xff]  }
 0x15c   :  { %1838 = vmatmul.mubr.bf16.vlgmr.msra.gmra.mrb[0].mxu0 %v122_v18  ;;  %2002 = vmatmul.mubr.bf16.vlgmr.msra.gmra.mrb[0].mxu1 %v122_v18 }
 0x15d   :  { %2423 = vmatpush1.bf16.msra.mxu0 %v3670_v19  ;;  %3184 = vmatpush3.bf16.msra.mxu1 %v3767_v50  ;;  %v392_v50 = vsub.s32 2, %v4090_v62  ;;  %v3783_v62 = vld [vmem:[#allocation10 + $0x8] sm:$0xff]  }
 0x15e   :  { %2424 = vmatprep.subr.bf16.mxu0 %v3675_v20  ;;  %3185 = vmatprep.subr.bf16.mxu1 %v3768_v51  ;;  %v3754_v51 = vld [vmem:[#allocation7 + $0x1c0] ss:$8 sps:$4 sm:$0xff]  }
 0x161   :  { %2425 = vmatpush1.bf16.msra.mxu0 %v3673_v21  ;;  %3186 = vmatpush3.bf16.msra.mxu1 %v3769_v52  ;;  %v3759_v52 = vld [vmem:[#allocation7 + $0x1d4] ss:$8 sps:$4 sm:$0xff]  }
 0x162   :  { %2426 = vmatprep.subr.bf16.mxu0 %v3678_v22  ;;  %3187 = vmatprep.subr.bf16.mxu1 %v3770_v53  ;;  %v393_v53 = vrot.slane %v4096_v0, %v392_v50  ;;  %v3778_v0 = vld [vmem:[#allocation8 + $0x70] sm:$0xff]  }
 0x165   :  { %2427 = vmatpush1.bf16.msra.mxu0 %v3676_v23  ;;  %3188 = vmatpush3.bf16.msra.mxu1 %v3771_v54  ;;  %v3757_v54 = vld [vmem:[#allocation7 + $0x1d0] ss:$8 sps:$4 sm:$0xff]  }
 0x166   :  { %2428 = vmatprep.subr.bf16.mxu0 %v3681_v24  ;;  %3189 = vmatprep.subr.bf16.mxu1 %v3772_v55  ;;  %v3762_v55 = vld [vmem:[#allocation7 + $0x1e4] ss:$8 sps:$4 sm:$0xff]  }
 0x169   :  { %2429 = vmatpush1.bf16.msra.mxu0 %v3679_v25  ;;  %3190 = vmatpush3.bf16.msra.mxu1 %v3773_v56 }
 0x16a   :  { %2430 = vmatprep.subr.bf16.mxu0 %v3684_v26  ;;  %3191 = vmatprep.subr.bf16.mxu1 %v3774_v57  ;;  %v3718_v26 = vld [vmem:[#allocation7 + $0x100] ss:$8 sps:$4 sm:$0xff]  }
 0x16b   :  { %v3760_v57 = vld [vmem:[#allocation7 + $0x1e0] ss:$8 sps:$4 sm:$0xff]  }
 0x16d   :  { %2431 = vmatpush1.bf16.msra.mxu0 %v3682_v11  ;;  %3192 = vmatpush3.bf16.msra.mxu1 %v3775_v58  ;;  %v3765_v58 = vld [vmem:[#allocation7 + $0x1f4] ss:$8 sps:$4 sm:$0xff]  }
 0x16e   :  { %2432 = vmatprep.subr.bf16.mxu0 %v3687_v27  ;;  %3193 = vmatprep.subr.bf16.mxu1 %v3776_v59  ;;  %v3723_v27 = vld [vmem:[#allocation7 + $0x114] ss:$8 sps:$4 sm:$0xff]  }
 0x171   :  { %2433 = vmatpush1.bf16.msra.mxu0 %v3685_v13  ;;  %3194 = vmatpush3.bf16.msra.mxu1 %v3777_v60  ;;  %v3763_v60 = vld [vmem:[#allocation7 + $0x1f0] ss:$8 sps:$4 sm:$0xff]  }
 0x172   :  { %2434 = vmatprep.subr.bf16.mxu0 %v3690_v28  ;;  %v3721_v28 = vld [vmem:[#allocation7 + $0x110] ss:$8 sps:$4 sm:$0xff]   ;;  %3195 = vmatprep.subr.bf16.mxu1 %v3778_v0 }
 0x175   :  { %2435 = vmatpush1.bf16.msra.mxu0 %v3688_v29  ;;  %v3726_v29 = vld [vmem:[#allocation7 + $0x124] ss:$8 sps:$4 sm:$0xff]  }
 0x176   :  { %2436 = vmatprep.subr.bf16.mxu0 %v3693_v30  ;;  %v3724_v30 = vld [vmem:[#allocation7 + $0x120] ss:$8 sps:$4 sm:$0xff]  }
 0x179   :  { %2437 = vmatpush1.bf16.msra.mxu0 %v3691_v31  ;;  %v3729_v31 = vld [vmem:[#allocation7 + $0x134] ss:$8 sps:$4 sm:$0xff]  }
 0x17a   :  { %2438 = vmatprep.subr.bf16.mxu0 %v3696_v32  ;;  %v3727_v32 = vld [vmem:[#allocation7 + $0x130] ss:$8 sps:$4 sm:$0xff]  }
 0x17d   :  { %2439 = vmatpush1.bf16.msra.mxu0 %v3694_v33  ;;  %v3732_v33 = vld [vmem:[#allocation7 + $0x144] ss:$8 sps:$4 sm:$0xff]  }
 0x17e   :  { %2440 = vmatprep.subr.bf16.mxu0 %v3699_v34  ;;  %v3730_v34 = vld [vmem:[#allocation7 + $0x140] ss:$8 sps:$4 sm:$0xff]  }
 0x181   :  { %2441 = vmatpush1.bf16.msra.mxu0 %v3697_v35  ;;  %v3735_v35 = vld [vmem:[#allocation7 + $0x154] ss:$8 sps:$4 sm:$0xff]  }
 0x182   :  { %2442 = vmatprep.subr.bf16.mxu0 %v3702_v36  ;;  %v3733_v36 = vld [vmem:[#allocation7 + $0x150] ss:$8 sps:$4 sm:$0xff]  }
 0x185   :  { %2443 = vmatpush1.bf16.msra.mxu0 %v3700_v37  ;;  %v3738_v37 = vld [vmem:[#allocation7 + $0x164] ss:$8 sps:$4 sm:$0xff]  }
 0x186   :  { %2444 = vmatprep.subr.bf16.mxu0 %v3705_v38  ;;  %v3736_v38 = vld [vmem:[#allocation7 + $0x160] ss:$8 sps:$4 sm:$0xff]  }
 0x189   :  { %2445 = vmatpush1.bf16.msra.mxu0 %v3703_v39  ;;  %v3741_v39 = vld [vmem:[#allocation7 + $0x174] ss:$8 sps:$4 sm:$0xff]  }
 0x18a   :  { %2446 = vmatprep.subr.bf16.mxu0 %v3708_v40  ;;  %v3739_v40 = vld [vmem:[#allocation7 + $0x170] ss:$8 sps:$4 sm:$0xff]  }
 0x18d   :  { %2447 = vmatpush1.bf16.msra.mxu0 %v3706_v41  ;;  %v3744_v41 = vld [vmem:[#allocation7 + $0x184] ss:$8 sps:$4 sm:$0xff]  }
 0x18e   :  { %2448 = vmatprep.subr.bf16.mxu0 %v3711_v42  ;;  %v3742_v42 = vld [vmem:[#allocation7 + $0x180] ss:$8 sps:$4 sm:$0xff]  }
 0x191   :  { %2449 = vmatpush1.bf16.msra.mxu0 %v3709_v43  ;;  %v3747_v43 = vld [vmem:[#allocation7 + $0x194] ss:$8 sps:$4 sm:$0xff]  }
 0x192   :  { %2450 = vmatprep.subr.bf16.mxu0 %v3714_v44  ;;  %v3745_v44 = vld [vmem:[#allocation7 + $0x190] ss:$8 sps:$4 sm:$0xff]  }
 0x195   :  { %2451 = vmatpush1.bf16.msra.mxu0 %v3712_v45  ;;  %v3750_v45 = vld [vmem:[#allocation7 + $0x1a4] ss:$8 sps:$4 sm:$0xff]  }
 0x196   :  { %2452 = vmatprep.subr.bf16.mxu0 %v3717_v46  ;;  %v3748_v46 = vld [vmem:[#allocation7 + $0x1a0] ss:$8 sps:$4 sm:$0xff]  }
 0x199   :  { %2453 = vmatpush1.bf16.msra.mxu0 %v3715_v47  ;;  %v3753_v47 = vld [vmem:[#allocation7 + $0x1b4] ss:$8 sps:$4 sm:$0xff]  }
 0x19a   :  { %2463 = vmatprep.subr.bf16.mxu0 %v3720_v48  ;;  %v3751_v48 = vld [vmem:[#allocation7 + $0x1b0] ss:$8 sps:$4 sm:$0xff]  }
 0x22f   :  { %v1839_v6 = vpop.f32.mrb[0].mxu0  ;;  %v4107_v7 = vpop.f32.mrb[0].mxu1 }
 0x230   :  { %v3234_v8 = vadd.f32 %v1839_v6, %v385_v3  ;;  %v1841_v9 = vpop.f32.mrb[1].mxu0  ;;  %v2005_v10 = vpop.f32.mrb[1].mxu1  ;;  %v3236_v56 = vadd.f32 %v4107_v7, %v393_v53  ;;  %v3781_v6 = vld [vmem:[#allocation8 + $0x38] sm:$0xff]   ;;  %v3945_v7 = vmov 0.0  }
 0x231   :  { %v3235_v12 = vadd.f32 %v1841_v9, %v389_v4  ;;  %v3237_v14 = vadd.f32 %v2005_v10, %v397_v5  ;;  %v1843_v15 = vpop.f32.mrb[2].mxu0  ;;  %v2007_v16 = vpop.f32.mrb[2].mxu1  ;;  %v3779_v4 = vld [vmem:[#allocation8 + $0x30] sm:$0xff]   ;;  %v3780_v5 = vld [vmem:[#allocation8 + $0x78] sm:$0xff]  }
 0x232   :  { %vm2010_vm0 = vcmp.ge.f32.partialorder %v3234_v8, 0.0  ;;  %v2014_v17 = vmul.f32 0.18, %v3234_v8  ;;  %v1844_v21 = vpop.f32.mrb[3].mxu0  ;;  %v2008_v22 = vpop.f32.mrb[3].mxu1  ;;  %vm2012_vm3 = vcmp.ge.f32.partialorder %v3236_v56, 0.0  ;;  %3196 = vmatpush3.bf16.msra.mxu1 %v3779_v4 }
 0x233   :  { %vm2011_vm1 = vcmp.ge.f32.partialorder %v3235_v12, 0.0  ;;  %v2015_v18 = vmul.f32 0.18, %v3235_v12  ;;  %vm2013_vm2 = vcmp.ge.f32.partialorder %v3237_v14, 0.0  ;;  %v2017_v19 = vmul.f32 0.18, %v3237_v14  ;;  %3197 = vmatprep.subr.bf16.mxu1 %v3780_v5 }
 0x234   :  { %v2018_v20 = vsel %vm2010_vm0, %v3234_v8, %v2014_v17  ;;  %v2016_v59 = vmul.f32 0.18, %v3236_v56  ;;  %v2090_v8 = vld [vmem:[%s4142_s4] sm:$0x3] }
 0x235   :  { %v2019_v23 = vsel %vm2011_vm1, %v3235_v12, %v2015_v18  ;;  %v2021_v24 = vsel %vm2013_vm2, %v3237_v14, %v2017_v19  ;;  %v2022_v11 = vpack.c.bf16 %v2018_v20, %v2018_v20  ;;  %v2095_v9 = vrot.slane %v2090_v8, %v384_v63  ;;  %v3784_v63 = vld [vmem:[#allocation10 + $0x10] sm:$0xff]  }
 0x236   :  { %v2023_v25 = vpack.c.bf16 %v2019_v23, %v2019_v23  ;;  %v2025_v13 = vpack.c.bf16 %v2021_v24, %v2021_v24  ;;  %v2020_v2 = vsel %vm2012_vm3, %v3236_v56, %v2016_v59  ;;  %3198 = vmatpush3.bf16.msra.mxu1 %v3781_v6  ;;  %v2099_v10 = vrot.slane %v2090_v8, %v388_v1  ;;  %v3782_v24 = vld [vmem:[#allocation10] sm:$0xff]   ;;  %v3785_v1 = vld [vmem:[#allocation10 + $0x18] sm:$0xff]  }
 0x237   :  { %v2024_v3 = vpack.c.bf16 %v2020_v2, %v2020_v2  ;;  %3214 = vmatprep.subr.bf16.mxu1 %v3945_v7 }
 0x238   :  { %2454 = vmatprep.mubr.bf16.mxu0 %v2023_v25 }
 0x239   :  { %2455 = vmatmul.mubr.bf16.vlgmr.msra.gmra.mrb[4].mxu0 %v2022_v11  ;;  %v3787_v11 = vld [vmem:[#allocation10 + $0x28] sm:$0xff]  }
 0x23a   :  { %2464 = vmatpush1.bf16.msra.mxu0 %v3718_v26  ;;  %2495 = vmatprep.mubr.bf16.mxu0 %v2025_v13  ;;  %v3786_v26 = vld [vmem:[#allocation10 + $0x20] sm:$0xff]   ;;  %v3789_v13 = vld [vmem:[#allocation10 + $0x38] sm:$0xff]  }
 0x23b   :  { %2465 = vmatprep.subr.bf16.mxu0 %v3723_v27  ;;  %v3788_v27 = vld [vmem:[#allocation10 + $0x30] sm:$0xff]  }
 0x23e   :  { %2466 = vmatpush1.bf16.msra.mxu0 %v3721_v28 }
 0x23f   :  { %2467 = vmatprep.subr.bf16.mxu0 %v3726_v29  ;;  %v3157_v29 = vld [vmem:[%s4144_s6] ss:$0 sm:$0xff]  ;;  %s3947_s6 = smov [#allocation11]  }
 0x242   :  { %2468 = vmatpush1.bf16.msra.mxu0 %v3724_v30 }
 0x243   :  { %2469 = vmatprep.subr.bf16.mxu0 %v3729_v31 }
 0x246   :  { %2470 = vmatpush1.bf16.msra.mxu0 %v3727_v32 }
 0x247   :  { %2471 = vmatprep.subr.bf16.mxu0 %v3732_v33 }
 0x24a   :  { %2472 = vmatpush1.bf16.msra.mxu0 %v3730_v34 }
 0x24b   :  { %2473 = vmatprep.subr.bf16.mxu0 %v3735_v35 }
 0x24e   :  { %2474 = vmatpush1.bf16.msra.mxu0 %v3733_v36 }
 0x24f   :  { %2475 = vmatprep.subr.bf16.mxu0 %v3738_v37 }
 0x252   :  { %2476 = vmatpush1.bf16.msra.mxu0 %v3736_v38  ;;  %v2803_v38 = vand.u32 127, %v382_v61 }
 0x253   :  { %2477 = vmatprep.subr.bf16.mxu0 %v3741_v39  ;;  %v3174_v39 = vld [vmem:[%s4146_s8] ss:$0 sm:$0xff]  ;;  %s2826_s8 = sshll.u32 %s3947_s6, 4  ;;  %s2827_s8 = int_to_ptr.vmem [resolvable:$true] %s2826_s8 }
 0x254   :  { %vm2804_vm8 = vcmp.lt.s32.totalorder %v2803_v38, 14  ;;  %s3904_s12 = scalar_lea.vmem %s2827_s8, 64  ;;  %p3909_p13 = scmp.lt.s32.totalorder %s2827_s8, %s2827_s8 }
 0x255   :  { %p3905_p12 = scmp.ne.s32.totalorder %s2827_s8, %s3904_s12  ;;  %p3910_p0 = scmp.lt.s32.totalorder %s3904_s12, %s3904_s12 }
 0x256   :  { %2478 = vmatpush1.bf16.msra.mxu0 %v3739_v40 }
 0x257   :  { %2479 = vmatprep.subr.bf16.mxu0 %v3744_v41  ;;  %p3911_p1 = por %p3910_p0, %p3909_p13 }
 0x259   :  { %p3912_p2 = pnand %p3911_p1, %p3905_p12 }
 0x25a   :  { %2480 = vmatpush1.bf16.msra.mxu0 %v3742_v42 }
 0x25b   :  { %2481 = vmatprep.subr.bf16.mxu0 %v3747_v43 }
 0x25e   :  { %2482 = vmatpush1.bf16.msra.mxu0 %v3745_v44 }
 0x25f   :  { %2483 = vmatprep.subr.bf16.mxu0 %v3750_v45 }
 0x262   :  { %2484 = vmatpush1.bf16.msra.mxu0 %v3748_v46 }
 0x263   :  { %2485 = vmatprep.subr.bf16.mxu0 %v3753_v47 }
 0x266   :  { %2486 = vmatpush1.bf16.msra.mxu0 %v3751_v48 }
 0x267   :  { %2487 = vmatprep.subr.bf16.mxu0 %v3756_v49 }
 0x26a   :  { %2488 = vmatpush1.bf16.msra.mxu0 %v3754_v51 }
 0x26b   :  { %2489 = vmatprep.subr.bf16.mxu0 %v3759_v52 }
 0x26e   :  { %2490 = vmatpush1.bf16.msra.mxu0 %v3757_v54 }
 0x26f   :  { %2491 = vmatprep.subr.bf16.mxu0 %v3762_v55 }
 0x272   :  { %2492 = vmatpush1.bf16.msra.mxu0 %v3760_v57 }
 0x273   :  { %2493 = vmatprep.subr.bf16.mxu0 %v3765_v58 }
 0x276   :  { %2494 = vmatpush1.bf16.msra.mxu0 %v3763_v60 }
 0x279   :  { %2496 = vmatmul.mubr.bf16.vlgmr.msra.gmra.mrb[4].mxu0 %v2024_v3 }
 0x34c   :  { %v2497_v12 = vpop.f32.mrb[4].mxu0 }
 0x34d   :  { %v3238_v14 = vadd.f32 %v2497_v12, %v2095_v9  ;;  %v2499_v15 = vpop.f32.mrb[5].mxu0 }
 0x34e   :  { %v3239_v16 = vadd.f32 %v2499_v15, %v2099_v10  ;;  %v2501_v17 = vpop.f32.mrb[6].mxu0 }
 0x34f   :  { %vm2504_vm4 = vcmp.ge.f32.partialorder %v3238_v14, 0.0  ;;  %v2506_v18 = vmul.f32 0.18, %v3238_v14  ;;  %v2502_v19 = vpop.f32.mrb[7].mxu0 }
 0x350   :  { %vm2505_vm5 = vcmp.ge.f32.partialorder %v3239_v16, 0.0  ;;  %v2507_v20 = vmul.f32 0.18, %v3239_v16 }
 0x351   :  { %v2508_v21 = vsel %vm2504_vm4, %v3238_v14, %v2506_v18 }
 0x352   :  { %v2509_v22 = vsel %vm2505_vm5, %v3239_v16, %v2507_v20  ;;  %v2510_v25 = vpack.c.bf16 %v2508_v21, %v2508_v21 }
 0x353   :  { %v2511_v23 = vpack.c.bf16 %v2509_v22, %v2509_v22 }
 0x355   :  { %2679 = vmatprep.mubr.bf16.mxu1 %v2511_v23 }
 0x356   :  { %2680 = vmatmul.mubr.bf16.vlgmr.msra.gmra.mrb[4].mxu1 %v2510_v25 }
 0x357   :  { %3215 = vmatpush3.bf16.msra.mxu1 %v3782_v24  ;;  %3230 = vmatprep.mubr.msk.bf16.mxu1 %vm3946_vm6, %v3945_v7 }
 0x358   :  { %3216 = vmatprep.subr.bf16.mxu1 %v3945_v7 }
 0x35b   :  { %3217 = vmatpush3.bf16.msra.mxu1 %v3783_v62 }
 0x35c   :  { %3218 = vmatprep.subr.bf16.mxu1 %v3945_v7 }
 0x35f   :  { %3219 = vmatpush3.bf16.msra.mxu1 %v3784_v63 }
 0x360   :  { %3220 = vmatprep.subr.bf16.mxu1 %v3945_v7 }
 0x363   :  { %3221 = vmatpush3.bf16.msra.mxu1 %v3785_v1 }
 0x364   :  { %3222 = vmatprep.subr.bf16.mxu1 %v3945_v7 }
 0x367   :  { %3223 = vmatpush3.bf16.msra.mxu1 %v3786_v26 }
 0x368   :  { %3224 = vmatprep.subr.bf16.mxu1 %v3945_v7 }
 0x36b   :  { %3225 = vmatpush3.bf16.msra.mxu1 %v3787_v11 }
 0x36c   :  { %3226 = vmatprep.subr.bf16.mxu1 %v3945_v7 }
 0x36f   :  { %3227 = vmatpush3.bf16.msra.mxu1 %v3788_v27 }
 0x370   :  { %3228 = vmatprep.subr.bf16.mxu1 %v3945_v7 }
 0x373   :  { %3229 = vmatpush3.bf16.msra.mxu1 %v3789_v13 }
 0x429   :  { %v3199_v28 = vpop.f32.mrb[4].mxu1 }
 0x42a   :  { %v3200_v30 = vpop.f32.mrb[5].mxu1 }
 0x42b   :  { %v3201_v31 = vadd.f32 %v3200_v30, %v3199_v28  ;;  %v3202_v32 = vpop.f32.mrb[6].mxu1 }
 0x42c   :  { %v3203_v33 = vpop.f32.mrb[7].mxu1 }
 0x42d   :  { %v2682_v34 = vadd.f32 %v3201_v31, %v3157_v29 }
 0x42f   :  { %vm2687_vm7 = vcmp.ge.f32.partialorder %v2682_v34, 0.0  ;;  %v2688_v35 = vmul.f32 0.18, %v2682_v34 }
 0x431   :  { %v2689_v36 = vsel %vm2687_vm7, %v2682_v34, %v2688_v35 }
 0x432   :  { %v2690_v37 = vpack.c.bf16 %v2689_v36, %v2689_v36 }
 0x434   :  { %3231 = vmatmul.mubr.bf16.vlgmr.msra.gmra.mrb[8].mxu1 %v2690_v37 }
 0x507   :  { %v2796_v40 = vpop.f32.mrb[8].mxu1 }
 0x508   :  { %v2797_v41 = vadd.f32 %v3174_v39, %v2796_v40  ;;  %v3232_v42 = vpop.f32.mrb[9].mxu1 }
 0x509   :  { %v2799_v43 = vpop.f32.mrb[10].mxu1 }
 0x50a   :  { %v3233_v44 = vpop.f32.mrb[11].mxu1  ;;  %v2805_v45 = vsel %vm2804_vm8, %v2797_v41, -inf }
 0x50b   :  { %v2807_v46 = vsel %vm2806_vm9, %v2805_v45, -inf }
 0x50c   :  { %2808 = vmax.xlane.f32.xlu0 %v2807_v46 }
 0x599   :  { %v2809_v47 = vpop.xlane.xlu0 %2808 }
 0x59a   :  { %v2810_v48 = vsub.f32 %v2805_v45, %v2809_v47 }
 0x59c   :  { %v2811_v49 = vmul.f32 1.442695, %v2810_v48 }
 0x59e   :  { %3790 = vpow2.f32 %v2811_v49 }
 0x5a8   :  { %v3791_v50 = vpop.eup %3790 }
 0x5a9   :  { %v2813_v61 = vsel %vm2806_vm9, %v3791_v50, 0.0 }
 0x5aa   :  { %2814 = vadd.xlane.f32.xlu0 %v2813_v61 }
 0x637   :  { %v2815_v51 = vpop.xlane.xlu0 %2814 }
 0x638   :  { %3792 = vlog2.f32 %v2815_v51 }
 0x642   :  { %v3793_v52 = vpop.eup %3792 }
 0x643   :  { %v2817_v53 = vmul.f32 0.6931472, %v3793_v52 }
 0x645   :  { %v2818_v54 = vsub.f32 %v2810_v48, %v2817_v53 }
 0x647   :  { %2819 = vst [vmem:[#allocation11] sm:$0xf] %v2818_v54 }
 0x648   :  { %3915 = shalt.err (!%p3912_p2)
}
 0x649   :  { %s3916_s15 = scalar_lea.hbm %s4147_s9, 64 }
 0x64a   :  { %p3917_p3 = scmp.ne.s32.totalorder %s4147_s9, %s3916_s15  ;;  %p3920_p4 = scmp.lt.u32.totalorder %s3916_s15, %s4147_s9 }
 0x64c   :  { %p3922_p5 = pnand %p3920_p4, %p3917_p3 }
 0x64e   :  { %3925 = shalt.err (!%p3922_p5)
}
 0x64f   :  { %2829 = dma.vmem_to_hbm [thread:$0]  %s2827_s8, 64, %s4147_s9, [#allocation4]  }
 0x650   :  { %3932 = dma.done.wait [#allocation4], 64  }
 0x651   :  { %3933 = vsyncadd [#allocation4], 4294967232 }
 0x652   :  { %2833 = vsyncpa [#allocation3], 1 }
 0x653   :  { %2834 = vsyncpa [#allocation6], 1 }
 0x654   :  { %2835 = vsyncpa [#allocation9], 1 }
 0x655   :  { %2836 = vsyncpa [#allocation4], 1 }

// kernel: tpu_custom_call.1
= control target key start
LH: loop header
LB: loop body
LE: loop exit
PB: predicated region body
PF: predicated region fallthrough
CT: control target
= control target key end

     0   :  { %14 = vsyncpa [#allocation3], 0  ;;  %s4138_s0 = inlined_call_operand.hbm [shape: f32[4,1024], index: 0, kind: input, shape index: {}]   ;;  %s4139_s1 = inlined_call_operand.hbm [shape: bf16[1024,512], index: 1, kind: input, shape index: {}]   ;;  %s4140_s2 = inlined_call_operand.vmem [shape: f32[1,512], index: 2, kind: input, shape index: {}]   ;;  %s4141_s3 = inlined_call_operand.hbm [shape: bf16[512,256], index: 3, kind: input, shape index: {}]   ;;  %s4142_s4 = inlined_call_operand.vmem [shape: f32[1,256], index: 4, kind: input, shape index: {}]   ;;  %s4143_s5 = inlined_call_operand.hbm [shape: bf16[256,128], index: 5, kind: input, shape index: {}]   ;;  %s4144_s6 = inlined_call_operand.vmem [shape: f32[1,128], index: 6, kind: input, shape index: {}]   ;;  %s4145_s7 = inlined_call_operand.hbm [shape: bf16[128,128], index: 7, kind: input, shape index: {}]   ;;  %s4146_s8 = inlined_call_operand.vmem [shape: f32[1,128], index: 8, kind: input, shape index: {}]   ;;  %s4147_s9 = inlined_call_operand.hbm [shape: f32[4,128], index: 9, kind: output, shape index: {}]  }
   0x1   :  { %15 = vsyncpa [#allocation6], 0 }
   0x2   :  { %16 = vsyncpa [#allocation9], 0 }
   0x3   :  { %17 = vsyncpa [#allocation4], 0  ;;  %s3934_s30 = smov [#allocation5]   ;;  %s3794_s13 = scalar_lea.hbm %s4139_s1, 32768 }
   0x4   :  { %s33_s10 = sshll.u32 %s3934_s30, 4  ;;  %p3795_p0 = scmp.ne.s32.totalorder %s4139_s1, %s3794_s13  ;;  %s34_s10 = int_to_ptr.vmem [resolvable:$true] %s33_s10 }
   0x5   :  { %p3798_p1 = scmp.lt.u32.totalorder %s3794_s13, %s4139_s1 }
   0x7   :  { %p3800_p2 = pnand %p3798_p1, %p3795_p0 }
   0x9   :  { %3803 = shalt.err (!%p3800_p2)
}
   0xa   :  { %s3804_s18 = scalar_lea.vmem %s34_s10, 32768  ;;  %p3809_p4 = scmp.lt.s32.totalorder %s34_s10, %s34_s10 }
   0xb   :  { %p3805_p3 = scmp.ne.s32.totalorder %s34_s10, %s3804_s18  ;;  %p3810_p5 = scmp.lt.s32.totalorder %s3804_s18, %s3804_s18 }
   0xd   :  { %p3811_p6 = por %p3810_p5, %p3809_p4 }
   0xf   :  { %p3812_p7 = pnand %p3811_p6, %p3805_p3 }
  0x11   :  { %3815 = shalt.err (!%p3812_p7)
}
  0x12   :  { %s3935_s19 = smov 256   ;;  %s3936_s20 = smov 16  }
  0x13   :  { %39 = dma.hbm_to_vmem [thread:$0]  %s4139_s1, 32768, %s34_s10, [#allocation6], %s3935_s19, %s3935_s19, %s3936_s20  }
  0x14   :  { %s3937_s23 = smov [#allocation8]   ;;  %s3816_s27 = scalar_lea.hbm %s4143_s5, 2048 }
  0x15   :  { %s61_s24 = sshll.u32 %s3937_s23, 4  ;;  %p3817_p8 = scmp.ne.s32.totalorder %s4143_s5, %s3816_s27  ;;  %s62_s24 = int_to_ptr.vmem [resolvable:$true] %s61_s24 }
  0x16   :  { %p3820_p9 = scmp.lt.u32.totalorder %s3816_s27, %s4143_s5 }
  0x18   :  { %p3822_p10 = pnand %p3820_p9, %p3817_p8 }
  0x1a   :  { %3825 = shalt.err (!%p3822_p10)
}
  0x1b   :  { %s3826_s12 = scalar_lea.vmem %s62_s24, 2048  ;;  %p3831_p12 = scmp.lt.s32.totalorder %s62_s24, %s62_s24 }
  0x1c   :  { %p3827_p11 = scmp.ne.s32.totalorder %s62_s24, %s3826_s12  ;;  %p3832_p13 = scmp.lt.s32.totalorder %s3826_s12, %s3826_s12 }
  0x1e   :  { %p3833_p0 = por %p3832_p13, %p3831_p12 }
  0x20   :  { %p3834_p1 = pnand %p3833_p0, %p3827_p11 }
  0x22   :  { %3837 = shalt.err (!%p3834_p1)
}
  0x23   :  { %s3938_s1 = smov 64   ;;  %s3939_s10 = smov 4  }
  0x24   :  { %67 = dma.hbm_to_vmem [thread:$0]  %s4143_s5, 2048, %s62_s24, [#allocation9], %s3938_s1, %s3938_s1, %s3939_s10  }
  0x25   :  { %s3940_s15 = smov [#allocation2]   ;;  %s3941_s17 = smov [#allocation7]  }
  0x26   :  { %s24_s16 = sshll.u32 %s3940_s15, 4  ;;  %s47_s18 = sshll.u32 %s3941_s17, 4  ;;  %s25_s16 = int_to_ptr.vmem [resolvable:$true] %s24_s16  ;;  %s4025_s18 = int_to_ptr.vmem [resolvable:$true] %s47_s18 }
  0x27   :  { %s3838_s21 = scalar_lea.hbm %s4138_s0, 512 }
  0x28   :  { %p3839_p2 = scmp.ne.s32.totalorder %s4138_s0, %s3838_s21  ;;  %p3842_p3 = scmp.lt.u32.totalorder %s3838_s21, %s4138_s0 }
  0x2a   :  { %p3844_p4 = pnand %p3842_p3, %p3839_p2 }
  0x2c   :  { %3847 = shalt.err (!%p3844_p4)
}
  0x2d   :  { %s3848_s5 = scalar_lea.vmem %s25_s16, 512  ;;  %p3853_p6 = scmp.lt.s32.totalorder %s25_s16, %s25_s16 }
  0x2e   :  { %p3849_p5 = scmp.ne.s32.totalorder %s25_s16, %s3848_s5  ;;  %p3854_p7 = scmp.lt.s32.totalorder %s3848_s5, %s3848_s5 }
  0x30   :  { %p3855_p8 = por %p3854_p7, %p3853_p6 }
  0x32   :  { %p3856_p9 = pnand %p3855_p8, %p3849_p5 }
  0x34   :  { %3859 = shalt.err (!%p3856_p9)
}
  0x35   :  { %27 = dma.hbm_to_vmem [thread:$0]  %s4138_s0, 512, %s25_s16, [#allocation3]  }
  0x36   :  { %s3860_s30 = scalar_lea.hbm %s4141_s3, 8192 }
  0x37   :  { %p3861_p10 = scmp.ne.s32.totalorder %s4141_s3, %s3860_s30  ;;  %p3864_p11 = scmp.lt.u32.totalorder %s3860_s30, %s4141_s3 }
  0x39   :  { %p3866_p12 = pnand %p3864_p11, %p3861_p10 }
  0x3b   :  { %3869 = shalt.err (!%p3866_p12)
}
  0x3c   :  { %s3870_s15 = scalar_lea.vmem %s4025_s18, 8192  ;;  %p3875_p0 = scmp.lt.s32.totalorder %s4025_s18, %s4025_s18 }
  0x3d   :  { %p3871_p13 = scmp.ne.s32.totalorder %s4025_s18, %s3870_s15  ;;  %p3876_p1 = scmp.lt.s32.totalorder %s3870_s15, %s3870_s15 }
  0x3f   :  { %p3877_p2 = por %p3876_p1, %p3875_p0 }
  0x41   :  { %p3878_p3 = pnand %p3877_p2, %p3871_p13 }
  0x43   :  { %3881 = shalt.err (!%p3878_p3)
}
  0x44   :  { %s3942_s0 = smov 128   ;;  %s3943_s16 = smov 8  }
  0x45   :  { %53 = dma.hbm_to_vmem [thread:$0]  %s4141_s3, 8192, %s4025_s18, [#allocation6], %s3942_s0, %s3942_s0, %s3943_s16  }
  0x46   :  { %s3944_s20 = smov [#allocation10]   ;;  %s3882_s25 = scalar_lea.hbm %s4145_s7, 1024 }
  0x47   :  { %s75_s21 = sshll.u32 %s3944_s20, 4  ;;  %p3883_p4 = scmp.ne.s32.totalorder %s4145_s7, %s3882_s25  ;;  %s76_s21 = int_to_ptr.vmem [resolvable:$true] %s75_s21 }
  0x48   :  { %p3886_p5 = scmp.lt.u32.totalorder %s3882_s25, %s4145_s7 }
  0x4a   :  { %p3888_p6 = pnand %p3886_p5, %p3883_p4 }
  0x4c   :  { %3891 = shalt.err (!%p3888_p6)
}
  0x4d   :  { %s3892_s28 = scalar_lea.vmem %s76_s21, 1024  ;;  %p3897_p8 = scmp.lt.s32.totalorder %s76_s21, %s76_s21 }
  0x4e   :  { %p3893_p7 = scmp.ne.s32.totalorder %s76_s21, %s3892_s28  ;;  %p3898_p9 = scmp.lt.s32.totalorder %s3892_s28, %s3892_s28 }
  0x50   :  { %p3899_p10 = por %p3898_p9, %p3897_p8 }
  0x52   :  { %p3900_p11 = pnand %p3899_p10, %p3893_p7 }
  0x54   :  { %3903 = shalt.err (!%p3900_p11)
}
  0x55   :  { %81 = dma.hbm_to_vmem [thread:$0]  %s4145_s7, 1024, %s76_s21, [#allocation9], %s3938_s1, %s3938_s1, %s3939_s10  }
  0x56   :  { %3926 = dma.done.wait [#allocation3], 512  }
  0x57   :  { %3927 = vsyncadd [#allocation3], 4294966784 }
  0x58   :  { %3928 = dma.done.wait [#allocation6], 40960  }
  0x59   :  { %3929 = vsyncadd [#allocation6], 4294926336 }
  0x5a   :  { %3930 = dma.done.wait [#allocation9], 3072  }
  0x5b   :  { %3931 = vsyncadd [#allocation9], 4294964224  ;;  %v3282_v0 = vld [vmem:[#allocation5 + $0x4] ss:$16 sps:$4 sm:$0xff]   ;;  %v3284_v1 = vld [vmem:[#allocation5 + $0xc] ss:$16 sps:$4 sm:$0xff]  }
  0x5c   :  { %1682 = vmatprep.subr.bf16.mxu0 %v3282_v0  ;;  %v3286_v2 = vld [vmem:[#allocation5] ss:$16 sps:$4 sm:$0xff]   ;;  %v3287_v3 = vld [vmem:[#allocation5 + $0x8] ss:$16 sps:$4 sm:$0xff]   ;;  %1846 = vmatprep.subr.bf16.mxu1 %v3284_v1  ;;  %v3288_v4 = vld [vmem:[#allocation5 + $0x24] ss:$16 sps:$4 sm:$0xff]  }
  0x5d   :  { %1683 = vmatpush1.bf16.msra.mxu0 %v3286_v2  ;;  %1847 = vmatpush1.bf16.msra.mxu1 %v3287_v3  ;;  %v3290_v5 = vld [vmem:[#allocation5 + $0x2c] ss:$16 sps:$4 sm:$0xff]   ;;  %v3292_v6 = vld [vmem:[#allocation5 + $0x20] ss:$16 sps:$4 sm:$0xff]   ;;  %v3293_v7 = vld [vmem:[#allocation5 + $0x28] ss:$16 sps:$4 sm:$0xff]  }
  0x5e   :  { %1684 = vmatprep.subr.bf16.mxu0 %v3288_v4  ;;  %1848 = vmatprep.subr.bf16.mxu1 %v3290_v5  ;;  %v3294_v8 = vld [vmem:[#allocation5 + $0x44] ss:$16 sps:$4 sm:$0xff]   ;;  %v3296_v9 = vld [vmem:[#allocation5 + $0x4c] ss:$16 sps:$4 sm:$0xff]   ;;  %v3298_v10 = vld [vmem:[#allocation5 + $0x40] ss:$16 sps:$4 sm:$0xff]  }
  0x5f   :  { %v3299_v11 = vld [vmem:[#allocation5 + $0x48] ss:$16 sps:$4 sm:$0xff]   ;;  %v3300_v12 = vld [vmem:[#allocation5 + $0x64] ss:$16 sps:$4 sm:$0xff]   ;;  %v3302_v13 = vld [vmem:[#allocation5 + $0x6c] ss:$16 sps:$4 sm:$0xff]  }
  0x60   :  { %v3304_v14 = vld [vmem:[#allocation5 + $0x60] ss:$16 sps:$4 sm:$0xff]   ;;  %v3305_v15 = vld [vmem:[#allocation5 + $0x68] ss:$16 sps:$4 sm:$0xff]   ;;  %v3306_v16 = vld [vmem:[#allocation5 + $0x84] ss:$16 sps:$4 sm:$0xff]  }
  0x61   :  { %1685 = vmatpush1.bf16.msra.mxu0 %v3292_v6  ;;  %1849 = vmatpush1.bf16.msra.mxu1 %v3293_v7  ;;  %v3308_v17 = vld [vmem:[#allocation5 + $0x8c] ss:$16 sps:$4 sm:$0xff]   ;;  %v3310_v18 = vld [vmem:[#allocation5 + $0x80] ss:$16 sps:$4 sm:$0xff]   ;;  %v3311_v19 = vld [vmem:[#allocation5 + $0x88] ss:$16 sps:$4 sm:$0xff]  }
  0x62   :  { %1686 = vmatprep.subr.bf16.mxu0 %v3294_v8  ;;  %1850 = vmatprep.subr.bf16.mxu1 %v3296_v9  ;;  %v3312_v20 = vld [vmem:[#allocation5 + $0xa4] ss:$16 sps:$4 sm:$0xff]   ;;  %v3314_v21 = vld [vmem:[#allocation5 + $0xac] ss:$16 sps:$4 sm:$0xff]   ;;  %v3316_v22 = vld [vmem:[#allocation5 + $0xa0] ss:$16 sps:$4 sm:$0xff]  }
  0x63   :  { %v3317_v23 = vld [vmem:[#allocation5 + $0xa8] ss:$16 sps:$4 sm:$0xff]   ;;  %v3318_v24 = vld [vmem:[#allocation5 + $0xc4] ss:$16 sps:$4 sm:$0xff]   ;;  %v3320_v25 = vld [vmem:[#allocation5 + $0xcc] ss:$16 sps:$4 sm:$0xff]  }
  0x64   :  { %v3322_v26 = vld [vmem:[#allocation5 + $0xc0] ss:$16 sps:$4 sm:$0xff]   ;;  %v3323_v27 = vld [vmem:[#allocation5 + $0xc8] ss:$16 sps:$4 sm:$0xff]   ;;  %v3324_v28 = vld [vmem:[#allocation5 + $0xe4] ss:$16 sps:$4 sm:$0xff]  }
  0x65   :  { %1687 = vmatpush1.bf16.msra.mxu0 %v3298_v10  ;;  %1851 = vmatpush1.bf16.msra.mxu1 %v3299_v11  ;;  %v3326_v29 = vld [vmem:[#allocation5 + $0xec] ss:$16 sps:$4 sm:$0xff]   ;;  %v3328_v30 = vld [vmem:[#allocation5 + $0xe0] ss:$16 sps:$4 sm:$0xff]   ;;  %v3329_v31 = vld [vmem:[#allocation5 + $0xe8] ss:$16 sps:$4 sm:$0xff]  }
  0x66   :  { %1688 = vmatprep.subr.bf16.mxu0 %v3300_v12  ;;  %1852 = vmatprep.subr.bf16.mxu1 %v3302_v13  ;;  %v3330_v32 = vld [vmem:[#allocation5 + $0x104] ss:$16 sps:$4 sm:$0xff]   ;;  %v3332_v33 = vld [vmem:[#allocation5 + $0x10c] ss:$16 sps:$4 sm:$0xff]   ;;  %v3334_v34 = vld [vmem:[#allocation5 + $0x100] ss:$16 sps:$4 sm:$0xff]  }
  0x67   :  { %v3335_v35 = vld [vmem:[#allocation5 + $0x108] ss:$16 sps:$4 sm:$0xff]   ;;  %v3336_v36 = vld [vmem:[#allocation5 + $0x124] ss:$16 sps:$4 sm:$0xff]   ;;  %v3338_v37 = vld [vmem:[#allocation5 + $0x12c] ss:$16 sps:$4 sm:$0xff]  }
  0x68   :  { %v3340_v38 = vld [vmem:[#allocation5 + $0x120] ss:$16 sps:$4 sm:$0xff]   ;;  %v3341_v39 = vld [vmem:[#allocation5 + $0x128] ss:$16 sps:$4 sm:$0xff]   ;;  %v3342_v40 = vld [vmem:[#allocation5 + $0x144] ss:$16 sps:$4 sm:$0xff]  }
  0x69   :  { %1689 = vmatpush1.bf16.msra.mxu0 %v3304_v14  ;;  %1853 = vmatpush1.bf16.msra.mxu1 %v3305_v15  ;;  %v3344_v41 = vld [vmem:[#allocation5 + $0x14c] ss:$16 sps:$4 sm:$0xff]   ;;  %v3346_v42 = vld [vmem:[#allocation5 + $0x140] ss:$16 sps:$4 sm:$0xff]   ;;  %v3347_v43 = vld [vmem:[#allocation5 + $0x148] ss:$16 sps:$4 sm:$0xff]  }
  0x6a   :  { %1690 = vmatprep.subr.bf16.mxu0 %v3306_v16  ;;  %1854 = vmatprep.subr.bf16.mxu1 %v3308_v17  ;;  %v3348_v44 = vld [vmem:[#allocation5 + $0x164] ss:$16 sps:$4 sm:$0xff]   ;;  %v3350_v45 = vld [vmem:[#allocation5 + $0x16c] ss:$16 sps:$4 sm:$0xff]   ;;  %v3352_v47 = vld [vmem:[#allocation5 + $0x160] ss:$16 sps:$4 sm:$0xff]  }
  0x6b   :  { %v100_v46 = vld [vmem:[#allocation2] sm:$0xff]  ;;  %v3353_v49 = vld [vmem:[#allocation5 + $0x168] ss:$16 sps:$4 sm:$0xff]   ;;  %v3356_v51 = vld [vmem:[#allocation5 + $0x18c] ss:$16 sps:$4 sm:$0xff]   ;;  %vm3946_vm6 = vmmov 0  }
  0x6c   :  { %v108_v48 = vcombine.high %v100_v46, %v100_v46  ;;  %v3354_v50 = vld [vmem:[#allocation5 + $0x184] ss:$16 sps:$4 sm:$0xff]   ;;  %v3358_v53 = vld [vmem:[#allocation5 + $0x180] ss:$16 sps:$4 sm:$0xff]   ;;  %v3359_v54 = vld [vmem:[#allocation5 + $0x188] ss:$16 sps:$4 sm:$0xff]   ;;  %v116_v6 = vpack.c.bf16 %v100_v46, %v100_v46 }
  0x6d   :  { %1691 = vmatpush1.bf16.msra.mxu0 %v3310_v18  ;;  %1855 = vmatpush1.bf16.msra.mxu1 %v3311_v19  ;;  %v3360_v55 = vld [vmem:[#allocation5 + $0x1a4] ss:$16 sps:$4 sm:$0xff]   ;;  %v3362_v56 = vld [vmem:[#allocation5 + $0x1ac] ss:$16 sps:$4 sm:$0xff]   ;;  %v3364_v57 = vld [vmem:[#allocation5 + $0x1a0] ss:$16 sps:$4 sm:$0xff]  }
  0x6e   :  { %1692 = vmatprep.subr.bf16.mxu0 %v3312_v20  ;;  %1856 = vmatprep.subr.bf16.mxu1 %v3314_v21  ;;  %v117_v52 = vpack.c.bf16 %v108_v48, %v108_v48  ;;  %v3365_v58 = vld [vmem:[#allocation5 + $0x1a8] ss:$16 sps:$4 sm:$0xff]   ;;  %v3366_v59 = vld [vmem:[#allocation5 + $0x1c4] ss:$16 sps:$4 sm:$0xff]   ;;  %v3368_v60 = vld [vmem:[#allocation5 + $0x1cc] ss:$16 sps:$4 sm:$0xff]  }
  0x6f   :  { %v3370_v61 = vld [vmem:[#allocation5 + $0x1c0] ss:$16 sps:$4 sm:$0xff]   ;;  %v3371_v62 = vld [vmem:[#allocation5 + $0x1c8] ss:$16 sps:$4 sm:$0xff]   ;;  %v3372_v63 = vld [vmem:[#allocation5 + $0x1e4] ss:$16 sps:$4 sm:$0xff]  }
  0x70   :  { %1714 = vmatprep.mubr.bf16.mxu0 %v117_v52  ;;  %1878 = vmatprep.mubr.bf16.mxu1 %v117_v52  ;;  %v3374_v0 = vld [vmem:[#allocation5 + $0x1ec] ss:$16 sps:$4 sm:$0xff]   ;;  %v3376_v1 = vld [vmem:[#allocation5 + $0x1e0] ss:$16 sps:$4 sm:$0xff]   ;;  %v3377_v2 = vld [vmem:[#allocation5 + $0x1e8] ss:$16 sps:$4 sm:$0xff]  }
  0x71   :  { %1693 = vmatpush1.bf16.msra.mxu0 %v3316_v22  ;;  %1857 = vmatpush1.bf16.msra.mxu1 %v3317_v23  ;;  %v3381_v3 = vld [vmem:[#allocation5 + $0x204] ss:$16 sps:$4 sm:$0xff]   ;;  %v3384_v4 = vld [vmem:[#allocation5 + $0x20c] ss:$16 sps:$4 sm:$0xff]   ;;  %v3379_v5 = vld [vmem:[#allocation5 + $0x200] ss:$16 sps:$4 sm:$0xff]  }
  0x72   :  { %1694 = vmatprep.subr.bf16.mxu0 %v3318_v24  ;;  %1858 = vmatprep.subr.bf16.mxu1 %v3320_v25  ;;  %v3382_v7 = vld [vmem:[#allocation5 + $0x208] ss:$16 sps:$4 sm:$0xff]   ;;  %v3387_v8 = vld [vmem:[#allocation5 + $0x224] ss:$16 sps:$4 sm:$0xff]   ;;  %v3390_v9 = vld [vmem:[#allocation5 + $0x22c] ss:$16 sps:$4 sm:$0xff]  }
  0x73   :  { %v3385_v10 = vld [vmem:[#allocation5 + $0x220] ss:$16 sps:$4 sm:$0xff]   ;;  %v3388_v11 = vld [vmem:[#allocation5 + $0x228] ss:$16 sps:$4 sm:$0xff]   ;;  %v3393_v12 = vld [vmem:[#allocation5 + $0x244] ss:$16 sps:$4 sm:$0xff]  }
  0x74   :  { %v3396_v13 = vld [vmem:[#allocation5 + $0x24c] ss:$16 sps:$4 sm:$0xff]   ;;  %v3391_v14 = vld [vmem:[#allocation5 + $0x240] ss:$16 sps:$4 sm:$0xff]   ;;  %v3394_v15 = vld [vmem:[#allocation5 + $0x248] ss:$16 sps:$4 sm:$0xff]  }
  0x75   :  { %1695 = vmatpush1.bf16.msra.mxu0 %v3322_v26  ;;  %1859 = vmatpush1.bf16.msra.mxu1 %v3323_v27  ;;  %v3399_v16 = vld [vmem:[#allocation5 + $0x264] ss:$16 sps:$4 sm:$0xff]   ;;  %v3402_v17 = vld [vmem:[#allocation5 + $0x26c] ss:$16 sps:$4 sm:$0xff]   ;;  %v3397_v18 = vld [vmem:[#allocation5 + $0x260] ss:$16 sps:$4 sm:$0xff]  }
  0x76   :  { %1696 = vmatprep.subr.bf16.mxu0 %v3324_v28  ;;  %1860 = vmatprep.subr.bf16.mxu1 %v3326_v29  ;;  %v3400_v19 = vld [vmem:[#allocation5 + $0x268] ss:$16 sps:$4 sm:$0xff]   ;;  %v3405_v20 = vld [vmem:[#allocation5 + $0x284] ss:$16 sps:$4 sm:$0xff]   ;;  %v3408_v21 = vld [vmem:[#allocation5 + $0x28c] ss:$16 sps:$4 sm:$0xff]  }
  0x77   :  { %v3403_v22 = vld [vmem:[#allocation5 + $0x280] ss:$16 sps:$4 sm:$0xff]   ;;  %v3406_v23 = vld [vmem:[#allocation5 + $0x288] ss:$16 sps:$4 sm:$0xff]   ;;  %v3411_v24 = vld [vmem:[#allocation5 + $0x2a4] ss:$16 sps:$4 sm:$0xff]  }
  0x78   :  { %v3414_v25 = vld [vmem:[#allocation5 + $0x2ac] ss:$16 sps:$4 sm:$0xff]   ;;  %v3409_v26 = vld [vmem:[#allocation5 + $0x2a0] ss:$16 sps:$4 sm:$0xff]   ;;  %v3412_v27 = vld [vmem:[#allocation5 + $0x2a8] ss:$16 sps:$4 sm:$0xff]  }
  0x79   :  { %1697 = vmatpush1.bf16.msra.mxu0 %v3328_v30  ;;  %1861 = vmatpush1.bf16.msra.mxu1 %v3329_v31  ;;  %v3417_v28 = vld [vmem:[#allocation5 + $0x2c4] ss:$16 sps:$4 sm:$0xff]   ;;  %v3420_v29 = vld [vmem:[#allocation5 + $0x2cc] ss:$16 sps:$4 sm:$0xff]   ;;  %v3436_v46 = vld [vmem:[#allocation5 + $0x328] ss:$16 sps:$4 sm:$0xff]  }
  0x7a   :  { %1698 = vmatprep.subr.bf16.mxu0 %v3330_v32  ;;  %1862 = vmatprep.subr.bf16.mxu1 %v3332_v33  ;;  %v4071_v30 = vld [vmem:[#allocation2 + $0x8] sm:$0xff]  ;;  %v3415_v32 = vld [vmem:[#allocation5 + $0x2c0] ss:$16 sps:$4 sm:$0xff]   ;;  %vm2806_vm9 = vcmask 1043456  }
  0x7b   :  { %v109_v31 = vcombine.high %v4071_v30, %v4071_v30  ;;  %v3418_v33 = vld [vmem:[#allocation5 + $0x2c8] ss:$16 sps:$4 sm:$0xff]   ;;  %v3444_v48 = vld [vmem:[#allocation5 + $0x34c] ss:$16 sps:$4 sm:$0xff]  }
  0x7c   :  { %v3450_v52 = vld [vmem:[#allocation5 + $0x36c] ss:$16 sps:$4 sm:$0xff]  }
  0x7d   :  { %1699 = vmatpush1.bf16.msra.mxu0 %v3334_v34  ;;  %1863 = vmatpush1.bf16.msra.mxu1 %v3335_v35  ;;  %v119_v34 = vpack.c.bf16 %v109_v31, %v109_v31  ;;  %v3423_v35 = vld [vmem:[#allocation5 + $0x2e4] ss:$16 sps:$4 sm:$0xff]  }
  0x7e   :  { %1700 = vmatprep.subr.bf16.mxu0 %v3336_v36  ;;  %1864 = vmatprep.subr.bf16.mxu1 %v3338_v37  ;;  %v3426_v36 = vld [vmem:[#allocation5 + $0x2ec] ss:$16 sps:$4 sm:$0xff]   ;;  %v3421_v37 = vld [vmem:[#allocation5 + $0x2e0] ss:$16 sps:$4 sm:$0xff]   ;;  %v3508_v31 = vld [vmem:[#allocation5 + $0x4a4] ss:$16 sps:$4 sm:$0xff]  }
  0x81   :  { %1701 = vmatpush1.bf16.msra.mxu0 %v3340_v38  ;;  %1865 = vmatpush1.bf16.msra.mxu1 %v3341_v39  ;;  %v3424_v38 = vld [vmem:[#allocation5 + $0x2e8] ss:$16 sps:$4 sm:$0xff]   ;;  %v3429_v39 = vld [vmem:[#allocation5 + $0x304] ss:$16 sps:$4 sm:$0xff]  }
  0x82   :  { %1702 = vmatprep.subr.bf16.mxu0 %v3342_v40  ;;  %1866 = vmatprep.subr.bf16.mxu1 %v3344_v41  ;;  %v3432_v40 = vld [vmem:[#allocation5 + $0x30c] ss:$16 sps:$4 sm:$0xff]   ;;  %v3427_v41 = vld [vmem:[#allocation5 + $0x300] ss:$16 sps:$4 sm:$0xff]  }
  0x85   :  { %1703 = vmatpush1.bf16.msra.mxu0 %v3346_v42  ;;  %1867 = vmatpush1.bf16.msra.mxu1 %v3347_v43  ;;  %v3430_v42 = vld [vmem:[#allocation5 + $0x308] ss:$16 sps:$4 sm:$0xff]   ;;  %v3435_v43 = vld [vmem:[#allocation5 + $0x324] ss:$16 sps:$4 sm:$0xff]  }
  0x86   :  { %1704 = vmatprep.subr.bf16.mxu0 %v3348_v44  ;;  %1868 = vmatprep.subr.bf16.mxu1 %v3350_v45  ;;  %v3438_v44 = vld [vmem:[#allocation5 + $0x32c] ss:$16 sps:$4 sm:$0xff]   ;;  %v3433_v45 = vld [vmem:[#allocation5 + $0x320] ss:$16 sps:$4 sm:$0xff]  }
  0x89   :  { %1705 = vmatpush1.bf16.msra.mxu0 %v3352_v47  ;;  %1869 = vmatpush1.bf16.msra.mxu1 %v3353_v49  ;;  %v3441_v47 = vld [vmem:[#allocation5 + $0x344] ss:$16 sps:$4 sm:$0xff]   ;;  %v3439_v49 = vld [vmem:[#allocation5 + $0x340] ss:$16 sps:$4 sm:$0xff]  }
  0x8a   :  { %1706 = vmatprep.subr.bf16.mxu0 %v3354_v50  ;;  %1870 = vmatprep.subr.bf16.mxu1 %v3356_v51  ;;  %v3442_v50 = vld [vmem:[#allocation5 + $0x348] ss:$16 sps:$4 sm:$0xff]   ;;  %v3447_v51 = vld [vmem:[#allocation5 + $0x364] ss:$16 sps:$4 sm:$0xff]  }
  0x8d   :  { %1707 = vmatpush1.bf16.msra.mxu0 %v3358_v53  ;;  %1871 = vmatpush1.bf16.msra.mxu1 %v3359_v54  ;;  %v3445_v53 = vld [vmem:[#allocation5 + $0x360] ss:$16 sps:$4 sm:$0xff]   ;;  %v3448_v54 = vld [vmem:[#allocation5 + $0x368] ss:$16 sps:$4 sm:$0xff]  }
  0x8e   :  { %1708 = vmatprep.subr.bf16.mxu0 %v3360_v55  ;;  %1872 = vmatprep.subr.bf16.mxu1 %v3362_v56  ;;  %v3453_v55 = vld [vmem:[#allocation5 + $0x384] ss:$16 sps:$4 sm:$0xff]   ;;  %v3456_v56 = vld [vmem:[#allocation5 + $0x38c] ss:$16 sps:$4 sm:$0xff]  }
  0x91   :  { %1709 = vmatpush1.bf16.msra.mxu0 %v3364_v57  ;;  %1873 = vmatpush1.bf16.msra.mxu1 %v3365_v58  ;;  %v3451_v57 = vld [vmem:[#allocation5 + $0x380] ss:$16 sps:$4 sm:$0xff]   ;;  %v3454_v58 = vld [vmem:[#allocation5 + $0x388] ss:$16 sps:$4 sm:$0xff]  }
  0x92   :  { %1710 = vmatprep.subr.bf16.mxu0 %v3366_v59  ;;  %1874 = vmatprep.subr.bf16.mxu1 %v3368_v60  ;;  %v3459_v59 = vld [vmem:[#allocation5 + $0x3a4] ss:$16 sps:$4 sm:$0xff]   ;;  %v3462_v60 = vld [vmem:[#allocation5 + $0x3ac] ss:$16 sps:$4 sm:$0xff]  }
  0x95   :  { %1711 = vmatpush1.bf16.msra.mxu0 %v3370_v61  ;;  %1875 = vmatpush1.bf16.msra.mxu1 %v3371_v62  ;;  %v3457_v61 = vld [vmem:[#allocation5 + $0x3a0] ss:$16 sps:$4 sm:$0xff]   ;;  %v3460_v62 = vld [vmem:[#allocation5 + $0x3a8] ss:$16 sps:$4 sm:$0xff]  }
  0x96   :  { %1712 = vmatprep.subr.bf16.mxu0 %v3372_v63  ;;  %1876 = vmatprep.subr.bf16.mxu1 %v3374_v0  ;;  %v3465_v63 = vld [vmem:[#allocation5 + $0x3c4] ss:$16 sps:$4 sm:$0xff]   ;;  %v3468_v0 = vld [vmem:[#allocation5 + $0x3cc] ss:$16 sps:$4 sm:$0xff]  }
  0x99   :  { %1713 = vmatpush1.bf16.msra.mxu0 %v3376_v1  ;;  %1877 = vmatpush1.bf16.msra.mxu1 %v3377_v2  ;;  %v3463_v1 = vld [vmem:[#allocation5 + $0x3c0] ss:$16 sps:$4 sm:$0xff]   ;;  %v3466_v2 = vld [vmem:[#allocation5 + $0x3c8] ss:$16 sps:$4 sm:$0xff]  }
  0x9a   :  { %1723 = vmatprep.subr.bf16.mxu0 %v3381_v3  ;;  %1887 = vmatprep.subr.bf16.mxu1 %v3384_v4  ;;  %v3471_v3 = vld [vmem:[#allocation5 + $0x3e4] ss:$16 sps:$4 sm:$0xff]   ;;  %v3474_v4 = vld [vmem:[#allocation5 + $0x3ec] ss:$16 sps:$4 sm:$0xff]  }
  0x9c   :  { %1715 = vmatmul.mubr.bf16.vlgmr.msra.gmra.mrb[0].mxu0 %v116_v6  ;;  %1879 = vmatmul.mubr.bf16.vlgmr.msra.gmra.mrb[0].mxu1 %v116_v6  ;;  %v3472_v6 = vld [vmem:[#allocation5 + $0x3e8] ss:$16 sps:$4 sm:$0xff]  }
  0x9d   :  { %1724 = vmatpush1.bf16.msra.mxu0 %v3379_v5  ;;  %1888 = vmatpush1.bf16.msra.mxu1 %v3382_v7  ;;  %v3469_v5 = vld [vmem:[#allocation5 + $0x3e0] ss:$16 sps:$4 sm:$0xff]   ;;  %v3478_v7 = vld [vmem:[#allocation5 + $0x404] ss:$16 sps:$4 sm:$0xff]  }
  0x9e   :  { %1725 = vmatprep.subr.bf16.mxu0 %v3387_v8  ;;  %1889 = vmatprep.subr.bf16.mxu1 %v3390_v9  ;;  %v3481_v8 = vld [vmem:[#allocation5 + $0x40c] ss:$16 sps:$4 sm:$0xff]   ;;  %v118_v9 = vpack.c.bf16 %v4071_v30, %v4071_v30  ;;  %v3503_v30 = vld [vmem:[#allocation5 + $0x488] ss:$16 sps:$4 sm:$0xff]  }
  0x9f   :  { %1755 = vmatprep.mubr.bf16.mxu0 %v119_v34  ;;  %1919 = vmatprep.mubr.bf16.mxu1 %v119_v34  ;;  %v3509_v34 = vld [vmem:[#allocation5 + $0x4a8] ss:$16 sps:$4 sm:$0xff]  }
  0xa1   :  { %1726 = vmatpush1.bf16.msra.mxu0 %v3385_v10  ;;  %1890 = vmatpush1.bf16.msra.mxu1 %v3388_v11  ;;  %v3476_v10 = vld [vmem:[#allocation5 + $0x400] ss:$16 sps:$4 sm:$0xff]   ;;  %v3479_v11 = vld [vmem:[#allocation5 + $0x408] ss:$16 sps:$4 sm:$0xff]  }
  0xa2   :  { %1727 = vmatprep.subr.bf16.mxu0 %v3393_v12  ;;  %1891 = vmatprep.subr.bf16.mxu1 %v3396_v13  ;;  %v3484_v12 = vld [vmem:[#allocation5 + $0x424] ss:$16 sps:$4 sm:$0xff]  }
  0xa3   :  { %v4077_v13 = vld [vmem:[#allocation2 + $0x10] sm:$0xff] }
  0xa5   :  { %1728 = vmatpush1.bf16.msra.mxu0 %v3391_v14  ;;  %1892 = vmatpush1.bf16.msra.mxu1 %v3394_v15  ;;  %v3487_v14 = vld [vmem:[#allocation5 + $0x42c] ss:$16 sps:$4 sm:$0xff]   ;;  %v110_v15 = vcombine.high %v4077_v13, %v4077_v13 }
  0xa6   :  { %1729 = vmatprep.subr.bf16.mxu0 %v3399_v16  ;;  %1893 = vmatprep.subr.bf16.mxu1 %v3402_v17  ;;  %v3482_v16 = vld [vmem:[#allocation5 + $0x420] ss:$16 sps:$4 sm:$0xff]  }
  0xa7   :  { %v121_v17 = vpack.c.bf16 %v110_v15, %v110_v15  ;;  %v3573_v15 = vld [vmem:[#allocation5 + $0x600] ss:$16 sps:$4 sm:$0xff]  }
  0xa9   :  { %1730 = vmatpush1.bf16.msra.mxu0 %v3397_v18  ;;  %1894 = vmatpush1.bf16.msra.mxu1 %v3400_v19  ;;  %v3485_v18 = vld [vmem:[#allocation5 + $0x428] ss:$16 sps:$4 sm:$0xff]   ;;  %v3490_v19 = vld [vmem:[#allocation5 + $0x444] ss:$16 sps:$4 sm:$0xff]  }
  0xaa   :  { %1731 = vmatprep.subr.bf16.mxu0 %v3405_v20  ;;  %1895 = vmatprep.subr.bf16.mxu1 %v3408_v21  ;;  %v3493_v20 = vld [vmem:[#allocation5 + $0x44c] ss:$16 sps:$4 sm:$0xff]   ;;  %v3488_v21 = vld [vmem:[#allocation5 + $0x440] ss:$16 sps:$4 sm:$0xff]  }
  0xad   :  { %1732 = vmatpush1.bf16.msra.mxu0 %v3403_v22  ;;  %1896 = vmatpush1.bf16.msra.mxu1 %v3406_v23  ;;  %v3491_v22 = vld [vmem:[#allocation5 + $0x448] ss:$16 sps:$4 sm:$0xff]   ;;  %v3496_v23 = vld [vmem:[#allocation5 + $0x464] ss:$16 sps:$4 sm:$0xff]  }
  0xae   :  { %1733 = vmatprep.subr.bf16.mxu0 %v3411_v24  ;;  %1897 = vmatprep.subr.bf16.mxu1 %v3414_v25  ;;  %v3499_v24 = vld [vmem:[#allocation5 + $0x46c] ss:$16 sps:$4 sm:$0xff]   ;;  %v3494_v25 = vld [vmem:[#allocation5 + $0x460] ss:$16 sps:$4 sm:$0xff]  }
  0xb1   :  { %1734 = vmatpush1.bf16.msra.mxu0 %v3409_v26  ;;  %1898 = vmatpush1.bf16.msra.mxu1 %v3412_v27  ;;  %v3497_v26 = vld [vmem:[#allocation5 + $0x468] ss:$16 sps:$4 sm:$0xff]   ;;  %v3502_v27 = vld [vmem:[#allocation5 + $0x484] ss:$16 sps:$4 sm:$0xff]  }
  0xb2   :  { %1735 = vmatprep.subr.bf16.mxu0 %v3417_v28  ;;  %1899 = vmatprep.subr.bf16.mxu1 %v3420_v29  ;;  %v3505_v28 = vld [vmem:[#allocation5 + $0x48c] ss:$16 sps:$4 sm:$0xff]   ;;  %v3500_v29 = vld [vmem:[#allocation5 + $0x480] ss:$16 sps:$4 sm:$0xff]  }
  0xb5   :  { %1736 = vmatpush1.bf16.msra.mxu0 %v3415_v32  ;;  %1900 = vmatpush1.bf16.msra.mxu1 %v3418_v33  ;;  %v3511_v32 = vld [vmem:[#allocation5 + $0x4ac] ss:$16 sps:$4 sm:$0xff]   ;;  %v3506_v33 = vld [vmem:[#allocation5 + $0x4a0] ss:$16 sps:$4 sm:$0xff]  }
  0xb6   :  { %1737 = vmatprep.subr.bf16.mxu0 %v3423_v35  ;;  %1901 = vmatprep.subr.bf16.mxu1 %v3426_v36  ;;  %v3514_v35 = vld [vmem:[#allocation5 + $0x4c4] ss:$16 sps:$4 sm:$0xff]   ;;  %v3517_v36 = vld [vmem:[#allocation5 + $0x4cc] ss:$16 sps:$4 sm:$0xff]  }
  0xb9   :  { %1738 = vmatpush1.bf16.msra.mxu0 %v3421_v37  ;;  %1902 = vmatpush1.bf16.msra.mxu1 %v3424_v38  ;;  %v3512_v37 = vld [vmem:[#allocation5 + $0x4c0] ss:$16 sps:$4 sm:$0xff]   ;;  %v3515_v38 = vld [vmem:[#allocation5 + $0x4c8] ss:$16 sps:$4 sm:$0xff]  }
  0xba   :  { %1739 = vmatprep.subr.bf16.mxu0 %v3429_v39  ;;  %1903 = vmatprep.subr.bf16.mxu1 %v3432_v40  ;;  %v3520_v39 = vld [vmem:[#allocation5 + $0x4e4] ss:$16 sps:$4 sm:$0xff]   ;;  %v3523_v40 = vld [vmem:[#allocation5 + $0x4ec] ss:$16 sps:$4 sm:$0xff]  }
  0xbd   :  { %1740 = vmatpush1.bf16.msra.mxu0 %v3427_v41  ;;  %1904 = vmatpush1.bf16.msra.mxu1 %v3430_v42  ;;  %v3518_v41 = vld [vmem:[#allocation5 + $0x4e0] ss:$16 sps:$4 sm:$0xff]   ;;  %v3521_v42 = vld [vmem:[#allocation5 + $0x4e8] ss:$16 sps:$4 sm:$0xff]  }
  0xbe   :  { %1741 = vmatprep.subr.bf16.mxu0 %v3435_v43  ;;  %1905 = vmatprep.subr.bf16.mxu1 %v3438_v44  ;;  %v3526_v43 = vld [vmem:[#allocation5 + $0x504] ss:$16 sps:$4 sm:$0xff]   ;;  %v3529_v44 = vld [vmem:[#allocation5 + $0x50c] ss:$16 sps:$4 sm:$0xff]  }
  0xc1   :  { %1742 = vmatpush1.bf16.msra.mxu0 %v3433_v45  ;;  %1906 = vmatpush1.bf16.msra.mxu1 %v3436_v46  ;;  %v3524_v45 = vld [vmem:[#allocation5 + $0x500] ss:$16 sps:$4 sm:$0xff]   ;;  %v3527_v46 = vld [vmem:[#allocation5 + $0x508] ss:$16 sps:$4 sm:$0xff]  }
  0xc2   :  { %1743 = vmatprep.subr.bf16.mxu0 %v3441_v47  ;;  %1907 = vmatprep.subr.bf16.mxu1 %v3444_v48  ;;  %v3532_v47 = vld [vmem:[#allocation5 + $0x524] ss:$16 sps:$4 sm:$0xff]   ;;  %v3535_v48 = vld [vmem:[#allocation5 + $0x52c] ss:$16 sps:$4 sm:$0xff]  }
  0xc5   :  { %1744 = vmatpush1.bf16.msra.mxu0 %v3439_v49  ;;  %1908 = vmatpush1.bf16.msra.mxu1 %v3442_v50  ;;  %v3530_v49 = vld [vmem:[#allocation5 + $0x520] ss:$16 sps:$4 sm:$0xff]   ;;  %v3533_v50 = vld [vmem:[#allocation5 + $0x528] ss:$16 sps:$4 sm:$0xff]  }
  0xc6   :  { %1745 = vmatprep.subr.bf16.mxu0 %v3447_v51  ;;  %1909 = vmatprep.subr.bf16.mxu1 %v3450_v52  ;;  %v3538_v51 = vld [vmem:[#allocation5 + $0x544] ss:$16 sps:$4 sm:$0xff]   ;;  %v3541_v52 = vld [vmem:[#allocation5 + $0x54c] ss:$16 sps:$4 sm:$0xff]  }
  0xc9   :  { %1746 = vmatpush1.bf16.msra.mxu0 %v3445_v53  ;;  %1910 = vmatpush1.bf16.msra.mxu1 %v3448_v54  ;;  %v3536_v53 = vld [vmem:[#allocation5 + $0x540] ss:$16 sps:$4 sm:$0xff]   ;;  %v3539_v54 = vld [vmem:[#allocation5 + $0x548] ss:$16 sps:$4 sm:$0xff]  }
  0xca   :  { %1747 = vmatprep.subr.bf16.mxu0 %v3453_v55  ;;  %1911 = vmatprep.subr.bf16.mxu1 %v3456_v56  ;;  %v3544_v55 = vld [vmem:[#allocation5 + $0x564] ss:$16 sps:$4 sm:$0xff]   ;;  %v3547_v56 = vld [vmem:[#allocation5 + $0x56c] ss:$16 sps:$4 sm:$0xff]  }
  0xcd   :  { %1748 = vmatpush1.bf16.msra.mxu0 %v3451_v57  ;;  %1912 = vmatpush1.bf16.msra.mxu1 %v3454_v58  ;;  %v3542_v57 = vld [vmem:[#allocation5 + $0x560] ss:$16 sps:$4 sm:$0xff]   ;;  %v3545_v58 = vld [vmem:[#allocation5 + $0x568] ss:$16 sps:$4 sm:$0xff]  }
  0xce   :  { %1749 = vmatprep.subr.bf16.mxu0 %v3459_v59  ;;  %1913 = vmatprep.subr.bf16.mxu1 %v3462_v60  ;;  %v3550_v59 = vld [vmem:[#allocation5 + $0x584] ss:$16 sps:$4 sm:$0xff]   ;;  %v3553_v60 = vld [vmem:[#allocation5 + $0x58c] ss:$16 sps:$4 sm:$0xff]  }
  0xd1   :  { %1750 = vmatpush1.bf16.msra.mxu0 %v3457_v61  ;;  %1914 = vmatpush1.bf16.msra.mxu1 %v3460_v62  ;;  %v3548_v61 = vld [vmem:[#allocation5 + $0x580] ss:$16 sps:$4 sm:$0xff]   ;;  %v3551_v62 = vld [vmem:[#allocation5 + $0x588] ss:$16 sps:$4 sm:$0xff]  }
  0xd2   :  { %1751 = vmatprep.subr.bf16.mxu0 %v3465_v63  ;;  %1915 = vmatprep.subr.bf16.mxu1 %v3468_v0  ;;  %v3556_v63 = vld [vmem:[#allocation5 + $0x5a4] ss:$16 sps:$4 sm:$0xff]   ;;  %v3559_v0 = vld [vmem:[#allocation5 + $0x5ac] ss:$16 sps:$4 sm:$0xff]  }
  0xd5   :  { %1752 = vmatpush1.bf16.msra.mxu0 %v3463_v1  ;;  %1916 = vmatpush1.bf16.msra.mxu1 %v3466_v2  ;;  %v3554_v1 = vld [vmem:[#allocation5 + $0x5a0] ss:$16 sps:$4 sm:$0xff]   ;;  %v3557_v2 = vld [vmem:[#allocation5 + $0x5a8] ss:$16 sps:$4 sm:$0xff]  }
  0xd6   :  { %1753 = vmatprep.subr.bf16.mxu0 %v3471_v3  ;;  %1917 = vmatprep.subr.bf16.mxu1 %v3474_v4  ;;  %v3562_v3 = vld [vmem:[#allocation5 + $0x5c4] ss:$16 sps:$4 sm:$0xff]   ;;  %v3565_v4 = vld [vmem:[#allocation5 + $0x5cc] ss:$16 sps:$4 sm:$0xff]  }
  0xd9   :  { %1754 = vmatpush1.bf16.msra.mxu0 %v3469_v5  ;;  %1918 = vmatpush1.bf16.msra.mxu1 %v3472_v6  ;;  %v3560_v5 = vld [vmem:[#allocation5 + $0x5c0] ss:$16 sps:$4 sm:$0xff]   ;;  %v3563_v6 = vld [vmem:[#allocation5 + $0x5c8] ss:$16 sps:$4 sm:$0xff]  }
  0xda   :  { %1764 = vmatprep.subr.bf16.mxu0 %v3478_v7  ;;  %1928 = vmatprep.subr.bf16.mxu1 %v3481_v8  ;;  %v3568_v7 = vld [vmem:[#allocation5 + $0x5e4] ss:$16 sps:$4 sm:$0xff]   ;;  %v3571_v8 = vld [vmem:[#allocation5 + $0x5ec] ss:$16 sps:$4 sm:$0xff]  }
  0xdc   :  { %1756 = vmatmul.mubr.bf16.vlgmr.msra.gmra.mrb[0].mxu0 %v118_v9  ;;  %1920 = vmatmul.mubr.bf16.vlgmr.msra.gmra.mrb[0].mxu1 %v118_v9  ;;  %v3566_v9 = vld [vmem:[#allocation5 + $0x5e0] ss:$16 sps:$4 sm:$0xff]  }
  0xdd   :  { %1765 = vmatpush1.bf16.msra.mxu0 %v3476_v10  ;;  %1929 = vmatpush1.bf16.msra.mxu1 %v3479_v11  ;;  %v3569_v10 = vld [vmem:[#allocation5 + $0x5e8] ss:$16 sps:$4 sm:$0xff]  }
  0xde   :  { %1766 = vmatprep.subr.bf16.mxu0 %v3484_v12  ;;  %1930 = vmatprep.subr.bf16.mxu1 %v3487_v14  ;;  %v4081_v11 = vld [vmem:[#allocation2 + $0x18] sm:$0xff]  ;;  %v3575_v12 = vld [vmem:[#allocation5 + $0x604] ss:$16 sps:$4 sm:$0xff]  }
  0xdf   :  { %1796 = vmatprep.mubr.bf16.mxu0 %v121_v17  ;;  %1960 = vmatprep.mubr.bf16.mxu1 %v121_v17  ;;  %v3578_v14 = vld [vmem:[#allocation5 + $0x60c] ss:$16 sps:$4 sm:$0xff]   ;;  %v111_v17 = vcombine.high %v4081_v11, %v4081_v11 }
  0xe1   :  { %1767 = vmatpush1.bf16.msra.mxu0 %v3482_v16  ;;  %1931 = vmatpush1.bf16.msra.mxu1 %v3485_v18  ;;  %v3576_v16 = vld [vmem:[#allocation5 + $0x608] ss:$16 sps:$4 sm:$0xff]   ;;  %v120_v18 = vpack.c.bf16 %v4077_v13, %v4077_v13  ;;  %v3593_v13 = vld [vmem:[#allocation5 + $0x664] ss:$16 sps:$4 sm:$0xff]  }
  0xe2   :  { %1768 = vmatprep.subr.bf16.mxu0 %v3490_v19  ;;  %1932 = vmatprep.subr.bf16.mxu1 %v3493_v20  ;;  %v3581_v19 = vld [vmem:[#allocation5 + $0x624] ss:$16 sps:$4 sm:$0xff]   ;;  %v3584_v20 = vld [vmem:[#allocation5 + $0x62c] ss:$16 sps:$4 sm:$0xff]  }
  0xe5   :  { %1769 = vmatpush1.bf16.msra.mxu0 %v3488_v21  ;;  %1933 = vmatpush1.bf16.msra.mxu1 %v3491_v22  ;;  %v3579_v21 = vld [vmem:[#allocation5 + $0x620] ss:$16 sps:$4 sm:$0xff]   ;;  %v3582_v22 = vld [vmem:[#allocation5 + $0x628] ss:$16 sps:$4 sm:$0xff]  }
  0xe6   :  { %1770 = vmatprep.subr.bf16.mxu0 %v3496_v23  ;;  %1934 = vmatprep.subr.bf16.mxu1 %v3499_v24  ;;  %v123_v23 = vpack.c.bf16 %v111_v17, %v111_v17  ;;  %v3587_v24 = vld [vmem:[#allocation5 + $0x644] ss:$16 sps:$4 sm:$0xff]  }
  0xe7   :  { %v3672_v17 = vld [vmem:[#allocation7 + $0x4] ss:$8 sps:$4 sm:$0xff]  }
  0xe9   :  { %1771 = vmatpush1.bf16.msra.mxu0 %v3494_v25  ;;  %1935 = vmatpush1.bf16.msra.mxu1 %v3497_v26  ;;  %v3590_v25 = vld [vmem:[#allocation5 + $0x64c] ss:$16 sps:$4 sm:$0xff]   ;;  %v3585_v26 = vld [vmem:[#allocation5 + $0x640] ss:$16 sps:$4 sm:$0xff]  }
  0xea   :  { %1772 = vmatprep.subr.bf16.mxu0 %v3502_v27  ;;  %1936 = vmatprep.subr.bf16.mxu1 %v3505_v28  ;;  %v3588_v27 = vld [vmem:[#allocation5 + $0x648] ss:$16 sps:$4 sm:$0xff]   ;;  %v3596_v28 = vld [vmem:[#allocation5 + $0x66c] ss:$16 sps:$4 sm:$0xff]  }
  0xed   :  { %1773 = vmatpush1.bf16.msra.mxu0 %v3500_v29  ;;  %1937 = vmatpush1.bf16.msra.mxu1 %v3503_v30  ;;  %v3591_v29 = vld [vmem:[#allocation5 + $0x660] ss:$16 sps:$4 sm:$0xff]   ;;  %v3594_v30 = vld [vmem:[#allocation5 + $0x668] ss:$16 sps:$4 sm:$0xff]  }
  0xee   :  { %1774 = vmatprep.subr.bf16.mxu0 %v3508_v31  ;;  %1938 = vmatprep.subr.bf16.mxu1 %v3511_v32  ;;  %v3599_v31 = vld [vmem:[#allocation5 + $0x684] ss:$16 sps:$4 sm:$0xff]   ;;  %v3602_v32 = vld [vmem:[#allocation5 + $0x68c] ss:$16 sps:$4 sm:$0xff]  }
  0xf1   :  { %1775 = vmatpush1.bf16.msra.mxu0 %v3506_v33  ;;  %1939 = vmatpush1.bf16.msra.mxu1 %v3509_v34  ;;  %v3597_v33 = vld [vmem:[#allocation5 + $0x680] ss:$16 sps:$4 sm:$0xff]   ;;  %v3600_v34 = vld [vmem:[#allocation5 + $0x688] ss:$16 sps:$4 sm:$0xff]  }
  0xf2   :  { %1776 = vmatprep.subr.bf16.mxu0 %v3514_v35  ;;  %1940 = vmatprep.subr.bf16.mxu1 %v3517_v36  ;;  %v3605_v35 = vld [vmem:[#allocation5 + $0x6a4] ss:$16 sps:$4 sm:$0xff]   ;;  %v3608_v36 = vld [vmem:[#allocation5 + $0x6ac] ss:$16 sps:$4 sm:$0xff]  }
  0xf5   :  { %1777 = vmatpush1.bf16.msra.mxu0 %v3512_v37  ;;  %1941 = vmatpush1.bf16.msra.mxu1 %v3515_v38  ;;  %v3603_v37 = vld [vmem:[#allocation5 + $0x6a0] ss:$16 sps:$4 sm:$0xff]   ;;  %v3606_v38 = vld [vmem:[#allocation5 + $0x6a8] ss:$16 sps:$4 sm:$0xff]  }
  0xf6   :  { %1778 = vmatprep.subr.bf16.mxu0 %v3520_v39  ;;  %1942 = vmatprep.subr.bf16.mxu1 %v3523_v40  ;;  %v3611_v39 = vld [vmem:[#allocation5 + $0x6c4] ss:$16 sps:$4 sm:$0xff]   ;;  %v3614_v40 = vld [vmem:[#allocation5 + $0x6cc] ss:$16 sps:$4 sm:$0xff]  }
  0xf9   :  { %1779 = vmatpush1.bf16.msra.mxu0 %v3518_v41  ;;  %1943 = vmatpush1.bf16.msra.mxu1 %v3521_v42  ;;  %v3609_v41 = vld [vmem:[#allocation5 + $0x6c0] ss:$16 sps:$4 sm:$0xff]   ;;  %v3612_v42 = vld [vmem:[#allocation5 + $0x6c8] ss:$16 sps:$4 sm:$0xff]  }
  0xfa   :  { %1780 = vmatprep.subr.bf16.mxu0 %v3526_v43  ;;  %1944 = vmatprep.subr.bf16.mxu1 %v3529_v44  ;;  %v3617_v43 = vld [vmem:[#allocation5 + $0x6e4] ss:$16 sps:$4 sm:$0xff]   ;;  %v3620_v44 = vld [vmem:[#allocation5 + $0x6ec] ss:$16 sps:$4 sm:$0xff]  }
  0xfd   :  { %1781 = vmatpush1.bf16.msra.mxu0 %v3524_v45  ;;  %1945 = vmatpush1.bf16.msra.mxu1 %v3527_v46  ;;  %v3615_v45 = vld [vmem:[#allocation5 + $0x6e0] ss:$16 sps:$4 sm:$0xff]   ;;  %v3618_v46 = vld [vmem:[#allocation5 + $0x6e8] ss:$16 sps:$4 sm:$0xff]  }
  0xfe   :  { %1782 = vmatprep.subr.bf16.mxu0 %v3532_v47  ;;  %1946 = vmatprep.subr.bf16.mxu1 %v3535_v48  ;;  %v3623_v47 = vld [vmem:[#allocation5 + $0x704] ss:$16 sps:$4 sm:$0xff]   ;;  %v3626_v48 = vld [vmem:[#allocation5 + $0x70c] ss:$16 sps:$4 sm:$0xff]  }
 0x101   :  { %1783 = vmatpush1.bf16.msra.mxu0 %v3530_v49  ;;  %1947 = vmatpush1.bf16.msra.mxu1 %v3533_v50  ;;  %v3621_v49 = vld [vmem:[#allocation5 + $0x700] ss:$16 sps:$4 sm:$0xff]   ;;  %v3624_v50 = vld [vmem:[#allocation5 + $0x708] ss:$16 sps:$4 sm:$0xff]  }
 0x102   :  { %1784 = vmatprep.subr.bf16.mxu0 %v3538_v51  ;;  %1948 = vmatprep.subr.bf16.mxu1 %v3541_v52  ;;  %v3629_v51 = vld [vmem:[#allocation5 + $0x724] ss:$16 sps:$4 sm:$0xff]   ;;  %v3632_v52 = vld [vmem:[#allocation5 + $0x72c] ss:$16 sps:$4 sm:$0xff]  }
 0x105   :  { %1785 = vmatpush1.bf16.msra.mxu0 %v3536_v53  ;;  %1949 = vmatpush1.bf16.msra.mxu1 %v3539_v54  ;;  %v3627_v53 = vld [vmem:[#allocation5 + $0x720] ss:$16 sps:$4 sm:$0xff]   ;;  %v3630_v54 = vld [vmem:[#allocation5 + $0x728] ss:$16 sps:$4 sm:$0xff]  }
 0x106   :  { %1786 = vmatprep.subr.bf16.mxu0 %v3544_v55  ;;  %1950 = vmatprep.subr.bf16.mxu1 %v3547_v56  ;;  %v3635_v55 = vld [vmem:[#allocation5 + $0x744] ss:$16 sps:$4 sm:$0xff]   ;;  %v3638_v56 = vld [vmem:[#allocation5 + $0x74c] ss:$16 sps:$4 sm:$0xff]  }
 0x109   :  { %1787 = vmatpush1.bf16.msra.mxu0 %v3542_v57  ;;  %1951 = vmatpush1.bf16.msra.mxu1 %v3545_v58  ;;  %v3633_v57 = vld [vmem:[#allocation5 + $0x740] ss:$16 sps:$4 sm:$0xff]   ;;  %v3636_v58 = vld [vmem:[#allocation5 + $0x748] ss:$16 sps:$4 sm:$0xff]  }
 0x10a   :  { %1788 = vmatprep.subr.bf16.mxu0 %v3550_v59  ;;  %1952 = vmatprep.subr.bf16.mxu1 %v3553_v60  ;;  %v3641_v59 = vld [vmem:[#allocation5 + $0x764] ss:$16 sps:$4 sm:$0xff]   ;;  %v3644_v60 = vld [vmem:[#allocation5 + $0x76c] ss:$16 sps:$4 sm:$0xff]  }
 0x10d   :  { %1789 = vmatpush1.bf16.msra.mxu0 %v3548_v61  ;;  %1953 = vmatpush1.bf16.msra.mxu1 %v3551_v62  ;;  %v3639_v61 = vld [vmem:[#allocation5 + $0x760] ss:$16 sps:$4 sm:$0xff]   ;;  %v3642_v62 = vld [vmem:[#allocation5 + $0x768] ss:$16 sps:$4 sm:$0xff]  }
 0x10e   :  { %1790 = vmatprep.subr.bf16.mxu0 %v3556_v63  ;;  %1954 = vmatprep.subr.bf16.mxu1 %v3559_v0  ;;  %v3647_v63 = vld [vmem:[#allocation5 + $0x784] ss:$16 sps:$4 sm:$0xff]   ;;  %v3650_v0 = vld [vmem:[#allocation5 + $0x78c] ss:$16 sps:$4 sm:$0xff]  }
 0x111   :  { %1791 = vmatpush1.bf16.msra.mxu0 %v3554_v1  ;;  %1955 = vmatpush1.bf16.msra.mxu1 %v3557_v2  ;;  %v3645_v1 = vld [vmem:[#allocation5 + $0x780] ss:$16 sps:$4 sm:$0xff]   ;;  %v3648_v2 = vld [vmem:[#allocation5 + $0x788] ss:$16 sps:$4 sm:$0xff]  }
 0x112   :  { %1792 = vmatprep.subr.bf16.mxu0 %v3562_v3  ;;  %1956 = vmatprep.subr.bf16.mxu1 %v3565_v4  ;;  %v3653_v3 = vld [vmem:[#allocation5 + $0x7a4] ss:$16 sps:$4 sm:$0xff]   ;;  %v3656_v4 = vld [vmem:[#allocation5 + $0x7ac] ss:$16 sps:$4 sm:$0xff]  }
 0x115   :  { %1793 = vmatpush1.bf16.msra.mxu0 %v3560_v5  ;;  %1957 = vmatpush1.bf16.msra.mxu1 %v3563_v6  ;;  %v3651_v5 = vld [vmem:[#allocation5 + $0x7a0] ss:$16 sps:$4 sm:$0xff]   ;;  %v3654_v6 = vld [vmem:[#allocation5 + $0x7a8] ss:$16 sps:$4 sm:$0xff]  }
 0x116   :  { %1794 = vmatprep.subr.bf16.mxu0 %v3568_v7  ;;  %1958 = vmatprep.subr.bf16.mxu1 %v3571_v8  ;;  %v3659_v7 = vld [vmem:[#allocation5 + $0x7c4] ss:$16 sps:$4 sm:$0xff]   ;;  %v3662_v8 = vld [vmem:[#allocation5 + $0x7cc] ss:$16 sps:$4 sm:$0xff]  }
 0x119   :  { %1795 = vmatpush1.bf16.msra.mxu0 %v3566_v9  ;;  %1959 = vmatpush1.bf16.msra.mxu1 %v3569_v10  ;;  %v3657_v9 = vld [vmem:[#allocation5 + $0x7c0] ss:$16 sps:$4 sm:$0xff]   ;;  %v3660_v10 = vld [vmem:[#allocation5 + $0x7c8] ss:$16 sps:$4 sm:$0xff]  }
 0x11a   :  { %1805 = vmatprep.subr.bf16.mxu0 %v3575_v12  ;;  %1969 = vmatprep.subr.bf16.mxu1 %v3578_v14  ;;  %v3665_v12 = vld [vmem:[#allocation5 + $0x7e4] ss:$16 sps:$4 sm:$0xff]   ;;  %v3668_v14 = vld [vmem:[#allocation5 + $0x7ec] ss:$16 sps:$4 sm:$0xff]  }
 0x11c   :  { %1797 = vmatmul.mubr.bf16.vlgmr.msra.gmra.mrb[0].mxu0 %v120_v18  ;;  %1961 = vmatmul.mubr.bf16.vlgmr.msra.gmra.mrb[0].mxu1 %v120_v18  ;;  %v122_v18 = vpack.c.bf16 %v4081_v11, %v4081_v11  ;;  %v3682_v11 = vld [vmem:[#allocation7 + $0x40] ss:$8 sps:$4 sm:$0xff]  }
 0x11d   :  { %1806 = vmatpush1.bf16.msra.mxu0 %v3573_v15  ;;  %1970 = vmatpush1.bf16.msra.mxu1 %v3576_v16  ;;  %v3663_v15 = vld [vmem:[#allocation5 + $0x7e0] ss:$16 sps:$4 sm:$0xff]   ;;  %v3666_v16 = vld [vmem:[#allocation5 + $0x7e8] ss:$16 sps:$4 sm:$0xff]  }
 0x11e   :  { %1807 = vmatprep.subr.bf16.mxu0 %v3581_v19  ;;  %1971 = vmatprep.subr.bf16.mxu1 %v3584_v20  ;;  %v3670_v19 = vld [vmem:[#allocation7] ss:$8 sps:$4 sm:$0xff]   ;;  %v3675_v20 = vld [vmem:[#allocation7 + $0x14] ss:$8 sps:$4 sm:$0xff]  }
 0x11f   :  { %1837 = vmatprep.mubr.bf16.mxu0 %v123_v23  ;;  %2001 = vmatprep.mubr.bf16.mxu1 %v123_v23  ;;  %v3676_v23 = vld [vmem:[#allocation7 + $0x20] ss:$8 sps:$4 sm:$0xff]  }
 0x121   :  { %1808 = vmatpush1.bf16.msra.mxu0 %v3579_v21  ;;  %1972 = vmatpush1.bf16.msra.mxu1 %v3582_v22  ;;  %v3673_v21 = vld [vmem:[#allocation7 + $0x10] ss:$8 sps:$4 sm:$0xff]   ;;  %v3678_v22 = vld [vmem:[#allocation7 + $0x24] ss:$8 sps:$4 sm:$0xff]  }
 0x122   :  { %1809 = vmatprep.subr.bf16.mxu0 %v3587_v24  ;;  %1973 = vmatprep.subr.bf16.mxu1 %v3590_v25  ;;  %v3681_v24 = vld [vmem:[#allocation7 + $0x34] ss:$8 sps:$4 sm:$0xff]   ;;  %v3679_v25 = vld [vmem:[#allocation7 + $0x30] ss:$8 sps:$4 sm:$0xff]  }
 0x125   :  { %1810 = vmatpush1.bf16.msra.mxu0 %v3585_v26  ;;  %1974 = vmatpush1.bf16.msra.mxu1 %v3588_v27  ;;  %v3684_v26 = vld [vmem:[#allocation7 + $0x44] ss:$8 sps:$4 sm:$0xff]   ;;  %v3687_v27 = vld [vmem:[#allocation7 + $0x54] ss:$8 sps:$4 sm:$0xff]  }
 0x126   :  { %1811 = vmatprep.subr.bf16.mxu0 %v3593_v13  ;;  %1975 = vmatprep.subr.bf16.mxu1 %v3596_v28  ;;  %v3685_v13 = vld [vmem:[#allocation7 + $0x50] ss:$8 sps:$4 sm:$0xff]   ;;  %v3690_v28 = vld [vmem:[#allocation7 + $0x64] ss:$8 sps:$4 sm:$0xff]  }
 0x129   :  { %1812 = vmatpush1.bf16.msra.mxu0 %v3591_v29  ;;  %1976 = vmatpush1.bf16.msra.mxu1 %v3594_v30  ;;  %v3688_v29 = vld [vmem:[#allocation7 + $0x60] ss:$8 sps:$4 sm:$0xff]   ;;  %v3693_v30 = vld [vmem:[#allocation7 + $0x74] ss:$8 sps:$4 sm:$0xff]  }
 0x12a   :  { %1813 = vmatprep.subr.bf16.mxu0 %v3599_v31  ;;  %1977 = vmatprep.subr.bf16.mxu1 %v3602_v32  ;;  %v3691_v31 = vld [vmem:[#allocation7 + $0x70] ss:$8 sps:$4 sm:$0xff]   ;;  %v3696_v32 = vld [vmem:[#allocation7 + $0x84] ss:$8 sps:$4 sm:$0xff]  }
 0x12d   :  { %1814 = vmatpush1.bf16.msra.mxu0 %v3597_v33  ;;  %1978 = vmatpush1.bf16.msra.mxu1 %v3600_v34  ;;  %v3694_v33 = vld [vmem:[#allocation7 + $0x80] ss:$8 sps:$4 sm:$0xff]   ;;  %v3699_v34 = vld [vmem:[#allocation7 + $0x94] ss:$8 sps:$4 sm:$0xff]  }
 0x12e   :  { %1815 = vmatprep.subr.bf16.mxu0 %v3605_v35  ;;  %1979 = vmatprep.subr.bf16.mxu1 %v3608_v36  ;;  %v3697_v35 = vld [vmem:[#allocation7 + $0x90] ss:$8 sps:$4 sm:$0xff]   ;;  %v3702_v36 = vld [vmem:[#allocation7 + $0xa4] ss:$8 sps:$4 sm:$0xff]  }
 0x131   :  { %1816 = vmatpush1.bf16.msra.mxu0 %v3603_v37  ;;  %1980 = vmatpush1.bf16.msra.mxu1 %v3606_v38  ;;  %v3700_v37 = vld [vmem:[#allocation7 + $0xa0] ss:$8 sps:$4 sm:$0xff]   ;;  %v3705_v38 = vld [vmem:[#allocation7 + $0xb4] ss:$8 sps:$4 sm:$0xff]  }
 0x132   :  { %1817 = vmatprep.subr.bf16.mxu0 %v3611_v39  ;;  %1981 = vmatprep.subr.bf16.mxu1 %v3614_v40  ;;  %v3703_v39 = vld [vmem:[#allocation7 + $0xb0] ss:$8 sps:$4 sm:$0xff]   ;;  %v3708_v40 = vld [vmem:[#allocation7 + $0xc4] ss:$8 sps:$4 sm:$0xff]  }
 0x135   :  { %1818 = vmatpush1.bf16.msra.mxu0 %v3609_v41  ;;  %1982 = vmatpush1.bf16.msra.mxu1 %v3612_v42  ;;  %v3706_v41 = vld [vmem:[#allocation7 + $0xc0] ss:$8 sps:$4 sm:$0xff]   ;;  %v3711_v42 = vld [vmem:[#allocation7 + $0xd4] ss:$8 sps:$4 sm:$0xff]  }
 0x136   :  { %1819 = vmatprep.subr.bf16.mxu0 %v3617_v43  ;;  %1983 = vmatprep.subr.bf16.mxu1 %v3620_v44  ;;  %v3709_v43 = vld [vmem:[#allocation7 + $0xd0] ss:$8 sps:$4 sm:$0xff]   ;;  %v3714_v44 = vld [vmem:[#allocation7 + $0xe4] ss:$8 sps:$4 sm:$0xff]  }
 0x139   :  { %1820 = vmatpush1.bf16.msra.mxu0 %v3615_v45  ;;  %1984 = vmatpush1.bf16.msra.mxu1 %v3618_v46  ;;  %v3712_v45 = vld [vmem:[#allocation7 + $0xe0] ss:$8 sps:$4 sm:$0xff]   ;;  %v3717_v46 = vld [vmem:[#allocation7 + $0xf4] ss:$8 sps:$4 sm:$0xff]  }
 0x13a   :  { %1821 = vmatprep.subr.bf16.mxu0 %v3623_v47  ;;  %1985 = vmatprep.subr.bf16.mxu1 %v3626_v48  ;;  %v3715_v47 = vld [vmem:[#allocation7 + $0xf0] ss:$8 sps:$4 sm:$0xff]   ;;  %v3720_v48 = vld [vmem:[#allocation7 + $0x104] ss:$8 sps:$4 sm:$0xff]  }
 0x13d   :  { %1822 = vmatpush1.bf16.msra.mxu0 %v3621_v49  ;;  %1986 = vmatpush1.bf16.msra.mxu1 %v3624_v50  ;;  %v3766_v49 = vld [vmem:[#allocation8 + $0x40] sm:$0xff]  }
 0x13e   :  { %1823 = vmatprep.subr.bf16.mxu0 %v3629_v51  ;;  %1987 = vmatprep.subr.bf16.mxu1 %v3632_v52  ;;  %v3767_v50 = vld [vmem:[#allocation8] sm:$0xff]   ;;  %v3768_v51 = vld [vmem:[#allocation8 + $0x48] sm:$0xff]  }
 0x13f   :  { %v3769_v52 = vld [vmem:[#allocation8 + $0x8] sm:$0xff]  }
 0x141   :  { %1824 = vmatpush1.bf16.msra.mxu0 %v3627_v53  ;;  %1988 = vmatpush1.bf16.msra.mxu1 %v3630_v54  ;;  %v3770_v53 = vld [vmem:[#allocation8 + $0x50] sm:$0xff]  }
 0x142   :  { %1825 = vmatprep.subr.bf16.mxu0 %v3635_v55  ;;  %1989 = vmatprep.subr.bf16.mxu1 %v3638_v56  ;;  %v3771_v54 = vld [vmem:[#allocation8 + $0x10] sm:$0xff]   ;;  %v3772_v55 = vld [vmem:[#allocation8 + $0x58] sm:$0xff]  }
 0x143   :  { %v3773_v56 = vld [vmem:[#allocation8 + $0x18] sm:$0xff]  }
 0x145   :  { %1826 = vmatpush1.bf16.msra.mxu0 %v3633_v57  ;;  %1990 = vmatpush1.bf16.msra.mxu1 %v3636_v58  ;;  %v3774_v57 = vld [vmem:[#allocation8 + $0x60] sm:$0xff]  }
 0x146   :  { %1827 = vmatprep.subr.bf16.mxu0 %v3641_v59  ;;  %1991 = vmatprep.subr.bf16.mxu1 %v3644_v60  ;;  %v3775_v58 = vld [vmem:[#allocation8 + $0x20] sm:$0xff]   ;;  %v3776_v59 = vld [vmem:[#allocation8 + $0x68] sm:$0xff]  }
 0x147   :  { %v3777_v60 = vld [vmem:[#allocation8 + $0x28] sm:$0xff]  }
 0x149   :  { %1828 = vmatpush1.bf16.msra.mxu0 %v3639_v61  ;;  %1992 = vmatpush1.bf16.msra.mxu1 %v3642_v62  ;;  %v382_v61 = vlaneseq }
 0x14a   :  { %1829 = vmatprep.subr.bf16.mxu0 %v3647_v63  ;;  %1993 = vmatprep.subr.bf16.mxu1 %v3650_v0  ;;  %v4096_v0 = vld [vmem:[%s4140_s2] sm:$0xf] }
 0x14b   :  { %v4090_v62 = vshrl.u32 %v382_v61, 7 }
 0x14d   :  { %1830 = vmatpush1.bf16.msra.mxu0 %v3645_v1  ;;  %1994 = vmatpush1.bf16.msra.mxu1 %v3648_v2  ;;  %v384_v63 = vsub.s32 0, %v4090_v62  ;;  %v388_v1 = vsub.s32 1, %v4090_v62  ;;  %v396_v2 = vsub.s32 3, %v4090_v62 }
 0x14e   :  { %1831 = vmatprep.subr.bf16.mxu0 %v3653_v3  ;;  %1995 = vmatprep.subr.bf16.mxu1 %v3656_v4 }
 0x14f   :  { %v385_v3 = vrot.slane %v4096_v0, %v384_v63  ;;  %v389_v4 = vrot.slane %v4096_v0, %v388_v1 }
 0x151   :  { %1832 = vmatpush1.bf16.msra.mxu0 %v3651_v5  ;;  %1996 = vmatpush1.bf16.msra.mxu1 %v3654_v6  ;;  %v397_v5 = vrot.slane %v4096_v0, %v396_v2 }
 0x152   :  { %1833 = vmatprep.subr.bf16.mxu0 %v3659_v7  ;;  %1997 = vmatprep.subr.bf16.mxu1 %v3662_v8 }
 0x155   :  { %1834 = vmatpush1.bf16.msra.mxu0 %v3657_v9  ;;  %1998 = vmatpush1.bf16.msra.mxu1 %v3660_v10 }
 0x156   :  { %1835 = vmatprep.subr.bf16.mxu0 %v3665_v12  ;;  %1999 = vmatprep.subr.bf16.mxu1 %v3668_v14 }
 0x159   :  { %1836 = vmatpush1.bf16.msra.mxu0 %v3663_v15  ;;  %2000 = vmatpush1.bf16.msra.mxu1 %v3666_v16 }
 0x15a   :  { %2422 = vmatprep.subr.bf16.mxu0 %v3672_v17  ;;  %3183 = vmatprep.subr.bf16.mxu1 %v3766_v49  ;;  %v3756_v49 = vld [vmem:[#allocation7 + $0x1c4] ss:$8 sps:$4 sm:$0xff]  }
 0x15c   :  { %1838 = vmatmul.mubr.bf16.vlgmr.msra.gmra.mrb[0].mxu0 %v122_v18  ;;  %2002 = vmatmul.mubr.bf16.vlgmr.msra.gmra.mrb[0].mxu1 %v122_v18 }
 0x15d   :  { %2423 = vmatpush1.bf16.msra.mxu0 %v3670_v19  ;;  %3184 = vmatpush3.bf16.msra.mxu1 %v3767_v50  ;;  %v392_v50 = vsub.s32 2, %v4090_v62  ;;  %v3783_v62 = vld [vmem:[#allocation10 + $0x8] sm:$0xff]  }
 0x15e   :  { %2424 = vmatprep.subr.bf16.mxu0 %v3675_v20  ;;  %3185 = vmatprep.subr.bf16.mxu1 %v3768_v51  ;;  %v3754_v51 = vld [vmem:[#allocation7 + $0x1c0] ss:$8 sps:$4 sm:$0xff]  }
 0x161   :  { %2425 = vmatpush1.bf16.msra.mxu0 %v3673_v21  ;;  %3186 = vmatpush3.bf16.msra.mxu1 %v3769_v52  ;;  %v3759_v52 = vld [vmem:[#allocation7 + $0x1d4] ss:$8 sps:$4 sm:$0xff]  }
 0x162   :  { %2426 = vmatprep.subr.bf16.mxu0 %v3678_v22  ;;  %3187 = vmatprep.subr.bf16.mxu1 %v3770_v53  ;;  %v393_v53 = vrot.slane %v4096_v0, %v392_v50  ;;  %v3778_v0 = vld [vmem:[#allocation8 + $0x70] sm:$0xff]  }
 0x165   :  { %2427 = vmatpush1.bf16.msra.mxu0 %v3676_v23  ;;  %3188 = vmatpush3.bf16.msra.mxu1 %v3771_v54  ;;  %v3757_v54 = vld [vmem:[#allocation7 + $0x1d0] ss:$8 sps:$4 sm:$0xff]  }
 0x166   :  { %2428 = vmatprep.subr.bf16.mxu0 %v3681_v24  ;;  %3189 = vmatprep.subr.bf16.mxu1 %v3772_v55  ;;  %v3762_v55 = vld [vmem:[#allocation7 + $0x1e4] ss:$8 sps:$4 sm:$0xff]  }
 0x169   :  { %2429 = vmatpush1.bf16.msra.mxu0 %v3679_v25  ;;  %3190 = vmatpush3.bf16.msra.mxu1 %v3773_v56 }
 0x16a   :  { %2430 = vmatprep.subr.bf16.mxu0 %v3684_v26  ;;  %3191 = vmatprep.subr.bf16.mxu1 %v3774_v57  ;;  %v3718_v26 = vld [vmem:[#allocation7 + $0x100] ss:$8 sps:$4 sm:$0xff]  }
 0x16b   :  { %v3760_v57 = vld [vmem:[#allocation7 + $0x1e0] ss:$8 sps:$4 sm:$0xff]  }
 0x16d   :  { %2431 = vmatpush1.bf16.msra.mxu0 %v3682_v11  ;;  %3192 = vmatpush3.bf16.msra.mxu1 %v3775_v58  ;;  %v3765_v58 = vld [vmem:[#allocation7 + $0x1f4] ss:$8 sps:$4 sm:$0xff]  }
 0x16e   :  { %2432 = vmatprep.subr.bf16.mxu0 %v3687_v27  ;;  %3193 = vmatprep.subr.bf16.mxu1 %v3776_v59  ;;  %v3723_v27 = vld [vmem:[#allocation7 + $0x114] ss:$8 sps:$4 sm:$0xff]  }
 0x171   :  { %2433 = vmatpush1.bf16.msra.mxu0 %v3685_v13  ;;  %3194 = vmatpush3.bf16.msra.mxu1 %v3777_v60  ;;  %v3763_v60 = vld [vmem:[#allocation7 + $0x1f0] ss:$8 sps:$4 sm:$0xff]  }
 0x172   :  { %2434 = vmatprep.subr.bf16.mxu0 %v3690_v28  ;;  %v3721_v28 = vld [vmem:[#allocation7 + $0x110] ss:$8 sps:$4 sm:$0xff]   ;;  %3195 = vmatprep.subr.bf16.mxu1 %v3778_v0 }
 0x175   :  { %2435 = vmatpush1.bf16.msra.mxu0 %v3688_v29  ;;  %v3726_v29 = vld [vmem:[#allocation7 + $0x124] ss:$8 sps:$4 sm:$0xff]  }
 0x176   :  { %2436 = vmatprep.subr.bf16.mxu0 %v3693_v30  ;;  %v3724_v30 = vld [vmem:[#allocation7 + $0x120] ss:$8 sps:$4 sm:$0xff]  }
 0x179   :  { %2437 = vmatpush1.bf16.msra.mxu0 %v3691_v31  ;;  %v3729_v31 = vld [vmem:[#allocation7 + $0x134] ss:$8 sps:$4 sm:$0xff]  }
 0x17a   :  { %2438 = vmatprep.subr.bf16.mxu0 %v3696_v32  ;;  %v3727_v32 = vld [vmem:[#allocation7 + $0x130] ss:$8 sps:$4 sm:$0xff]  }
 0x17d   :  { %2439 = vmatpush1.bf16.msra.mxu0 %v3694_v33  ;;  %v3732_v33 = vld [vmem:[#allocation7 + $0x144] ss:$8 sps:$4 sm:$0xff]  }
 0x17e   :  { %2440 = vmatprep.subr.bf16.mxu0 %v3699_v34  ;;  %v3730_v34 = vld [vmem:[#allocation7 + $0x140] ss:$8 sps:$4 sm:$0xff]  }
 0x181   :  { %2441 = vmatpush1.bf16.msra.mxu0 %v3697_v35  ;;  %v3735_v35 = vld [vmem:[#allocation7 + $0x154] ss:$8 sps:$4 sm:$0xff]  }
 0x182   :  { %2442 = vmatprep.subr.bf16.mxu0 %v3702_v36  ;;  %v3733_v36 = vld [vmem:[#allocation7 + $0x150] ss:$8 sps:$4 sm:$0xff]  }
 0x185   :  { %2443 = vmatpush1.bf16.msra.mxu0 %v3700_v37  ;;  %v3738_v37 = vld [vmem:[#allocation7 + $0x164] ss:$8 sps:$4 sm:$0xff]  }
 0x186   :  { %2444 = vmatprep.subr.bf16.mxu0 %v3705_v38  ;;  %v3736_v38 = vld [vmem:[#allocation7 + $0x160] ss:$8 sps:$4 sm:$0xff]  }
 0x189   :  { %2445 = vmatpush1.bf16.msra.mxu0 %v3703_v39  ;;  %v3741_v39 = vld [vmem:[#allocation7 + $0x174] ss:$8 sps:$4 sm:$0xff]  }
 0x18a   :  { %2446 = vmatprep.subr.bf16.mxu0 %v3708_v40  ;;  %v3739_v40 = vld [vmem:[#allocation7 + $0x170] ss:$8 sps:$4 sm:$0xff]  }
 0x18d   :  { %2447 = vmatpush1.bf16.msra.mxu0 %v3706_v41  ;;  %v3744_v41 = vld [vmem:[#allocation7 + $0x184] ss:$8 sps:$4 sm:$0xff]  }
 0x18e   :  { %2448 = vmatprep.subr.bf16.mxu0 %v3711_v42  ;;  %v3742_v42 = vld [vmem:[#allocation7 + $0x180] ss:$8 sps:$4 sm:$0xff]  }
 0x191   :  { %2449 = vmatpush1.bf16.msra.mxu0 %v3709_v43  ;;  %v3747_v43 = vld [vmem:[#allocation7 + $0x194] ss:$8 sps:$4 sm:$0xff]  }
 0x192   :  { %2450 = vmatprep.subr.bf16.mxu0 %v3714_v44  ;;  %v3745_v44 = vld [vmem:[#allocation7 + $0x190] ss:$8 sps:$4 sm:$0xff]  }
 0x195   :  { %2451 = vmatpush1.bf16.msra.mxu0 %v3712_v45  ;;  %v3750_v45 = vld [vmem:[#allocation7 + $0x1a4] ss:$8 sps:$4 sm:$0xff]  }
 0x196   :  { %2452 = vmatprep.subr.bf16.mxu0 %v3717_v46  ;;  %v3748_v46 = vld [vmem:[#allocation7 + $0x1a0] ss:$8 sps:$4 sm:$0xff]  }
 0x199   :  { %2453 = vmatpush1.bf16.msra.mxu0 %v3715_v47  ;;  %v3753_v47 = vld [vmem:[#allocation7 + $0x1b4] ss:$8 sps:$4 sm:$0xff]  }
 0x19a   :  { %2463 = vmatprep.subr.bf16.mxu0 %v3720_v48  ;;  %v3751_v48 = vld [vmem:[#allocation7 + $0x1b0] ss:$8 sps:$4 sm:$0xff]  }
 0x22f   :  { %v1839_v6 = vpop.f32.mrb[0].mxu0  ;;  %v4107_v7 = vpop.f32.mrb[0].mxu1 }
 0x230   :  { %v3234_v8 = vadd.f32 %v1839_v6, %v385_v3  ;;  %v1841_v9 = vpop.f32.mrb[1].mxu0  ;;  %v2005_v10 = vpop.f32.mrb[1].mxu1  ;;  %v3236_v56 = vadd.f32 %v4107_v7, %v393_v53  ;;  %v3781_v6 = vld [vmem:[#allocation8 + $0x38] sm:$0xff]   ;;  %v3945_v7 = vmov 0.0  }
 0x231   :  { %v3235_v12 = vadd.f32 %v1841_v9, %v389_v4  ;;  %v3237_v14 = vadd.f32 %v2005_v10, %v397_v5  ;;  %v1843_v15 = vpop.f32.mrb[2].mxu0  ;;  %v2007_v16 = vpop.f32.mrb[2].mxu1  ;;  %v3779_v4 = vld [vmem:[#allocation8 + $0x30] sm:$0xff]   ;;  %v3780_v5 = vld [vmem:[#allocation8 + $0x78] sm:$0xff]  }
 0x232   :  { %vm2010_vm0 = vcmp.ge.f32.partialorder %v3234_v8, 0.0  ;;  %v2014_v17 = vmul.f32 0.18, %v3234_v8  ;;  %v1844_v21 = vpop.f32.mrb[3].mxu0  ;;  %v2008_v22 = vpop.f32.mrb[3].mxu1  ;;  %vm2012_vm3 = vcmp.ge.f32.partialorder %v3236_v56, 0.0  ;;  %3196 = vmatpush3.bf16.msra.mxu1 %v3779_v4 }
 0x233   :  { %vm2011_vm1 = vcmp.ge.f32.partialorder %v3235_v12, 0.0  ;;  %v2015_v18 = vmul.f32 0.18, %v3235_v12  ;;  %vm2013_vm2 = vcmp.ge.f32.partialorder %v3237_v14, 0.0  ;;  %v2017_v19 = vmul.f32 0.18, %v3237_v14  ;;  %3197 = vmatprep.subr.bf16.mxu1 %v3780_v5 }
 0x234   :  { %v2018_v20 = vsel %vm2010_vm0, %v3234_v8, %v2014_v17  ;;  %v2016_v59 = vmul.f32 0.18, %v3236_v56  ;;  %v2090_v8 = vld [vmem:[%s4142_s4] sm:$0x3] }
 0x235   :  { %v2019_v23 = vsel %vm2011_vm1, %v3235_v12, %v2015_v18  ;;  %v2021_v24 = vsel %vm2013_vm2, %v3237_v14, %v2017_v19  ;;  %v2022_v11 = vpack.c.bf16 %v2018_v20, %v2018_v20  ;;  %v2095_v9 = vrot.slane %v2090_v8, %v384_v63  ;;  %v3784_v63 = vld [vmem:[#allocation10 + $0x10] sm:$0xff]  }
 0x236   :  { %v2023_v25 = vpack.c.bf16 %v2019_v23, %v2019_v23  ;;  %v2025_v13 = vpack.c.bf16 %v2021_v24, %v2021_v24  ;;  %v2020_v2 = vsel %vm2012_vm3, %v3236_v56, %v2016_v59  ;;  %3198 = vmatpush3.bf16.msra.mxu1 %v3781_v6  ;;  %v2099_v10 = vrot.slane %v2090_v8, %v388_v1  ;;  %v3782_v24 = vld [vmem:[#allocation10] sm:$0xff]   ;;  %v3785_v1 = vld [vmem:[#allocation10 + $0x18] sm:$0xff]  }
 0x237   :  { %v2024_v3 = vpack.c.bf16 %v2020_v2, %v2020_v2  ;;  %3214 = vmatprep.subr.bf16.mxu1 %v3945_v7 }
 0x238   :  { %2454 = vmatprep.mubr.bf16.mxu0 %v2023_v25 }
 0x239   :  { %2455 = vmatmul.mubr.bf16.vlgmr.msra.gmra.mrb[4].mxu0 %v2022_v11  ;;  %v3787_v11 = vld [vmem:[#allocation10 + $0x28] sm:$0xff]  }
 0x23a   :  { %2464 = vmatpush1.bf16.msra.mxu0 %v3718_v26  ;;  %2495 = vmatprep.mubr.bf16.mxu0 %v2025_v13  ;;  %v3786_v26 = vld [vmem:[#allocation10 + $0x20] sm:$0xff]   ;;  %v3789_v13 = vld [vmem:[#allocation10 + $0x38] sm:$0xff]  }
 0x23b   :  { %2465 = vmatprep.subr.bf16.mxu0 %v3723_v27  ;;  %v3788_v27 = vld [vmem:[#allocation10 + $0x30] sm:$0xff]  }
 0x23e   :  { %2466 = vmatpush1.bf16.msra.mxu0 %v3721_v28 }
 0x23f   :  { %2467 = vmatprep.subr.bf16.mxu0 %v3726_v29  ;;  %v3157_v29 = vld [vmem:[%s4144_s6] ss:$0 sm:$0xff]  ;;  %s3947_s6 = smov [#allocation11]  }
 0x242   :  { %2468 = vmatpush1.bf16.msra.mxu0 %v3724_v30 }
 0x243   :  { %2469 = vmatprep.subr.bf16.mxu0 %v3729_v31 }
 0x246   :  { %2470 = vmatpush1.bf16.msra.mxu0 %v3727_v32 }
 0x247   :  { %2471 = vmatprep.subr.bf16.mxu0 %v3732_v33 }
 0x24a   :  { %2472 = vmatpush1.bf16.msra.mxu0 %v3730_v34 }
 0x24b   :  { %2473 = vmatprep.subr.bf16.mxu0 %v3735_v35 }
 0x24e   :  { %2474 = vmatpush1.bf16.msra.mxu0 %v3733_v36 }
 0x24f   :  { %2475 = vmatprep.subr.bf16.mxu0 %v3738_v37 }
 0x252   :  { %2476 = vmatpush1.bf16.msra.mxu0 %v3736_v38  ;;  %v2803_v38 = vand.u32 127, %v382_v61 }
 0x253   :  { %2477 = vmatprep.subr.bf16.mxu0 %v3741_v39  ;;  %v3174_v39 = vld [vmem:[%s4146_s8] ss:$0 sm:$0xff]  ;;  %s2826_s8 = sshll.u32 %s3947_s6, 4  ;;  %s2827_s8 = int_to_ptr.vmem [resolvable:$true] %s2826_s8 }
 0x254   :  { %vm2804_vm8 = vcmp.lt.s32.totalorder %v2803_v38, 14  ;;  %s3904_s12 = scalar_lea.vmem %s2827_s8, 64  ;;  %p3909_p13 = scmp.lt.s32.totalorder %s2827_s8, %s2827_s8 }
 0x255   :  { %p3905_p12 = scmp.ne.s32.totalorder %s2827_s8, %s3904_s12  ;;  %p3910_p0 = scmp.lt.s32.totalorder %s3904_s12, %s3904_s12 }
 0x256   :  { %2478 = vmatpush1.bf16.msra.mxu0 %v3739_v40 }
 0x257   :  { %2479 = vmatprep.subr.bf16.mxu0 %v3744_v41  ;;  %p3911_p1 = por %p3910_p0, %p3909_p13 }
 0x259   :  { %p3912_p2 = pnand %p3911_p1, %p3905_p12 }
 0x25a   :  { %2480 = vmatpush1.bf16.msra.mxu0 %v3742_v42 }
 0x25b   :  { %2481 = vmatprep.subr.bf16.mxu0 %v3747_v43 }
 0x25e   :  { %2482 = vmatpush1.bf16.msra.mxu0 %v3745_v44 }
 0x25f   :  { %2483 = vmatprep.subr.bf16.mxu0 %v3750_v45 }
 0x262   :  { %2484 = vmatpush1.bf16.msra.mxu0 %v3748_v46 }
 0x263   :  { %2485 = vmatprep.subr.bf16.mxu0 %v3753_v47 }
 0x266   :  { %2486 = vmatpush1.bf16.msra.mxu0 %v3751_v48 }
 0x267   :  { %2487 = vmatprep.subr.bf16.mxu0 %v3756_v49 }
 0x26a   :  { %2488 = vmatpush1.bf16.msra.mxu0 %v3754_v51 }
 0x26b   :  { %2489 = vmatprep.subr.bf16.mxu0 %v3759_v52 }
 0x26e   :  { %2490 = vmatpush1.bf16.msra.mxu0 %v3757_v54 }
 0x26f   :  { %2491 = vmatprep.subr.bf16.mxu0 %v3762_v55 }
 0x272   :  { %2492 = vmatpush1.bf16.msra.mxu0 %v3760_v57 }
 0x273   :  { %2493 = vmatprep.subr.bf16.mxu0 %v3765_v58 }
 0x276   :  { %2494 = vmatpush1.bf16.msra.mxu0 %v3763_v60 }
 0x279   :  { %2496 = vmatmul.mubr.bf16.vlgmr.msra.gmra.mrb[4].mxu0 %v2024_v3 }
 0x34c   :  { %v2497_v12 = vpop.f32.mrb[4].mxu0 }
 0x34d   :  { %v3238_v14 = vadd.f32 %v2497_v12, %v2095_v9  ;;  %v2499_v15 = vpop.f32.mrb[5].mxu0 }
 0x34e   :  { %v3239_v16 = vadd.f32 %v2499_v15, %v2099_v10  ;;  %v2501_v17 = vpop.f32.mrb[6].mxu0 }
 0x34f   :  { %vm2504_vm4 = vcmp.ge.f32.partialorder %v3238_v14, 0.0  ;;  %v2506_v18 = vmul.f32 0.18, %v3238_v14  ;;  %v2502_v19 = vpop.f32.mrb[7].mxu0 }
 0x350   :  { %vm2505_vm5 = vcmp.ge.f32.partialorder %v3239_v16, 0.0  ;;  %v2507_v20 = vmul.f32 0.18, %v3239_v16 }
 0x351   :  { %v2508_v21 = vsel %vm2504_vm4, %v3238_v14, %v2506_v18 }
 0x352   :  { %v2509_v22 = vsel %vm2505_vm5, %v3239_v16, %v2507_v20  ;;  %v2510_v25 = vpack.c.bf16 %v2508_v21, %v2508_v21 }
 0x353   :  { %v2511_v23 = vpack.c.bf16 %v2509_v22, %v2509_v22 }
 0x355   :  { %2679 = vmatprep.mubr.bf16.mxu1 %v2511_v23 }
 0x356   :  { %2680 = vmatmul.mubr.bf16.vlgmr.msra.gmra.mrb[4].mxu1 %v2510_v25 }
 0x357   :  { %3215 = vmatpush3.bf16.msra.mxu1 %v3782_v24  ;;  %3230 = vmatprep.mubr.msk.bf16.mxu1 %vm3946_vm6, %v3945_v7 }
 0x358   :  { %3216 = vmatprep.subr.bf16.mxu1 %v3945_v7 }
 0x35b   :  { %3217 = vmatpush3.bf16.msra.mxu1 %v3783_v62 }
 0x35c   :  { %3218 = vmatprep.subr.bf16.mxu1 %v3945_v7 }
 0x35f   :  { %3219 = vmatpush3.bf16.msra.mxu1 %v3784_v63 }
 0x360   :  { %3220 = vmatprep.subr.bf16.mxu1 %v3945_v7 }
 0x363   :  { %3221 = vmatpush3.bf16.msra.mxu1 %v3785_v1 }
 0x364   :  { %3222 = vmatprep.subr.bf16.mxu1 %v3945_v7 }
 0x367   :  { %3223 = vmatpush3.bf16.msra.mxu1 %v3786_v26 }
 0x368   :  { %3224 = vmatprep.subr.bf16.mxu1 %v3945_v7 }
 0x36b   :  { %3225 = vmatpush3.bf16.msra.mxu1 %v3787_v11 }
 0x36c   :  { %3226 = vmatprep.subr.bf16.mxu1 %v3945_v7 }
 0x36f   :  { %3227 = vmatpush3.bf16.msra.mxu1 %v3788_v27 }
 0x370   :  { %3228 = vmatprep.subr.bf16.mxu1 %v3945_v7 }
 0x373   :  { %3229 = vmatpush3.bf16.msra.mxu1 %v3789_v13 }
 0x429   :  { %v3199_v28 = vpop.f32.mrb[4].mxu1 }
 0x42a   :  { %v3200_v30 = vpop.f32.mrb[5].mxu1 }
 0x42b   :  { %v3201_v31 = vadd.f32 %v3200_v30, %v3199_v28  ;;  %v3202_v32 = vpop.f32.mrb[6].mxu1 }
 0x42c   :  { %v3203_v33 = vpop.f32.mrb[7].mxu1 }
 0x42d   :  { %v2682_v34 = vadd.f32 %v3201_v31, %v3157_v29 }
 0x42f   :  { %vm2687_vm7 = vcmp.ge.f32.partialorder %v2682_v34, 0.0  ;;  %v2688_v35 = vmul.f32 0.18, %v2682_v34 }
 0x431   :  { %v2689_v36 = vsel %vm2687_vm7, %v2682_v34, %v2688_v35 }
 0x432   :  { %v2690_v37 = vpack.c.bf16 %v2689_v36, %v2689_v36 }
 0x434   :  { %3231 = vmatmul.mubr.bf16.vlgmr.msra.gmra.mrb[8].mxu1 %v2690_v37 }
 0x507   :  { %v2796_v40 = vpop.f32.mrb[8].mxu1 }
 0x508   :  { %v2797_v41 = vadd.f32 %v3174_v39, %v2796_v40  ;;  %v3232_v42 = vpop.f32.mrb[9].mxu1 }
 0x509   :  { %v2799_v43 = vpop.f32.mrb[10].mxu1 }
 0x50a   :  { %v3233_v44 = vpop.f32.mrb[11].mxu1  ;;  %v2805_v45 = vsel %vm2804_vm8, %v2797_v41, -inf }
 0x50b   :  { %v2807_v46 = vsel %vm2806_vm9, %v2805_v45, -inf }
 0x50c   :  { %2808 = vmax.xlane.f32.xlu0 %v2807_v46 }
 0x599   :  { %v2809_v47 = vpop.xlane.xlu0 %2808 }
 0x59a   :  { %v2810_v48 = vsub.f32 %v2805_v45, %v2809_v47 }
 0x59c   :  { %v2811_v49 = vmul.f32 1.442695, %v2810_v48 }
 0x59e   :  { %3790 = vpow2.f32 %v2811_v49 }
 0x5a8   :  { %v3791_v50 = vpop.eup %3790 }
 0x5a9   :  { %v2813_v61 = vsel %vm2806_vm9, %v3791_v50, 0.0 }
 0x5aa   :  { %2814 = vadd.xlane.f32.xlu0 %v2813_v61 }
 0x637   :  { %v2815_v51 = vpop.xlane.xlu0 %2814 }
 0x638   :  { %3792 = vlog2.f32 %v2815_v51 }
 0x642   :  { %v3793_v52 = vpop.eup %3792 }
 0x643   :  { %v2817_v53 = vmul.f32 0.6931472, %v3793_v52 }
 0x645   :  { %v2818_v54 = vsub.f32 %v2810_v48, %v2817_v53 }
 0x647   :  { %2819 = vst [vmem:[#allocation11] sm:$0xf] %v2818_v54 }
 0x648   :  { %3915 = shalt.err (!%p3912_p2)
}
 0x649   :  { %s3916_s15 = scalar_lea.hbm %s4147_s9, 64 }
 0x64a   :  { %p3917_p3 = scmp.ne.s32.totalorder %s4147_s9, %s3916_s15  ;;  %p3920_p4 = scmp.lt.u32.totalorder %s3916_s15, %s4147_s9 }
 0x64c   :  { %p3922_p5 = pnand %p3920_p4, %p3917_p3 }
 0x64e   :  { %3925 = shalt.err (!%p3922_p5)
}
 0x64f   :  { %2829 = dma.vmem_to_hbm [thread:$0]  %s2827_s8, 64, %s4147_s9, [#allocation4]  }
 0x650   :  { %3932 = dma.done.wait [#allocation4], 64  }
 0x651   :  { %3933 = vsyncadd [#allocation4], 4294967232 }
 0x652   :  { %2833 = vsyncpa [#allocation3], 1 }
 0x653   :  { %2834 = vsyncpa [#allocation6], 1 }
 0x654   :  { %2835 = vsyncpa [#allocation9], 1 }
 0x655   :  { %2836 = vsyncpa [#allocation4], 1 }

</bundles_post_ra>
